<compile_context>
chip_gen: v7x
topology: tpu7x:2x2x1
jax: 0.10.0
libtpu: 0.0.40
codegen_flags: <defaults>
</compile_context>

<pallas_src>
import functools

import jax
import jax.numpy as jnp
import numpy as np
from jax.experimental import pallas as pl
from jax.experimental.pallas import tpu as pltpu


def _softplus(y):
    # matches torch.nn.Softplus(beta=1, threshold=20).  The non-selected branch may
    # produce inf for huge y (e.g. padded tail rows); jnp.where discards it.
    return jnp.where(y > 20.0, y, jnp.log1p(jnp.exp(y)))


def sincosres_kernel(x_ref, w01_ref, pb_ref, wsc_ref, o_ref, *, out_dim):
    # Stage 1: one (TB, in_dim) @ (in_dim, 3*out_dim) matmul, f32 accumulation.
    #   columns [0, out_dim)        : x1              (alpha folded into weight)
    #   columns [out_dim, 2*out_dim): x1  (duplicate, gets +pi/2 phase -> cos via sin)
    #   columns [2*out_dim, 3*out_dim): y_old pre-bias
    t = jnp.dot(x_ref[...], w01_ref[...], preferred_element_type=jnp.float32)
    t = t + pb_ref[...]                       # fused [0 | pi/2 | bx] phase+bias add (f32)

    sc = jnp.sin(t[:, : 2 * out_dim])         # [sin(x1), cos(x1)] in one EUP pass, f32
    y_old = t[:, 2 * out_dim:]

    # Stage 2: one (TB, 2*out_dim) @ (2*out_dim, out_dim) matmul, f32 accumulation.
    y_new = jnp.dot(sc.astype(wsc_ref.dtype), wsc_ref[...],
                    preferred_element_type=jnp.float32)

    o_ref[...] = _softplus(y_old + y_new).astype(o_ref.dtype)


def make_sincosres_params(wx_t, bx, w1_t, ws_t, wc_t, *, alpha,
                          operand_dtype=jnp.bfloat16):
    """Build the fused weight slabs once (module-init time), not per call.

    wx_t, w1_t: (in_dim, out_dim)   pre-transposed Linear weights (x @ W form)
    ws_t, wc_t: (out_dim, out_dim)
    bx:         (1, out_dim) or (out_dim,)
    """
    in_dim, out_dim = wx_t.shape
    w1a = alpha * w1_t                                   # fold alpha into process_x1
    w01 = jnp.concatenate([w1a, w1a, wx_t], axis=1).astype(operand_dtype)   # (in, 3*out)
    wsc = jnp.concatenate([ws_t, wc_t], axis=0).astype(operand_dtype)       # (2*out, out)
    phase_bias = jnp.concatenate(
        [jnp.zeros((1, out_dim), jnp.float32),
         jnp.full((1, out_dim), np.pi / 2, jnp.float32),
         jnp.reshape(bx, (1, out_dim)).astype(jnp.float32)],
        axis=1)                                                              # (1, 3*out) f32
    return w01, phase_bias, wsc


def _default_min_grid_steps():
    # v7x has 2 TensorCores per chip: make sure the 1-D grid has enough steps for
    # dimension_semantics=("parallel",) to shard across both.  v5e/v6e: 1 TC -> 1.
    try:
        kind = jax.devices()[0].device_kind.lower()
    except Exception:
        return 1
    return 4 if ("v7" in kind or "7x" in kind) else 1


def sincosres(x, w01, phase_bias, wsc, *, block_b=8192, min_grid_steps=None,
              out_dtype=None):
    B, in_dim = x.shape
    out_dim = w01.shape[1] // 3
    operand_dtype = w01.dtype
    # In a real model the activations already live in operand_dtype; for the demo we
    # cast here (one extra XLA op outside the kernel).
    x = x.astype(operand_dtype)
    out_dtype = out_dtype or operand_dtype

    if min_grid_steps is None:
        min_grid_steps = _default_min_grid_steps()

    # Batch tile: as large as block_b allows (amortizes the ~0.35 us/step overhead on
    # this HBM-bound kernel), capped so v7x still gets >= min_grid_steps grid steps.
    tb = min(B, block_b)
    if min_grid_steps > 1:
        tb = min(tb, max(8, pl.cdiv(B, min_grid_steps)))
    if tb < B:
        tb = max(8, (tb // 8) * 8)           # keep sublane-aligned when tiling
    grid = (pl.cdiv(B, tb),)

    # Explicit scoped-VMEM limit: double-buffered x/y tiles + resident weights +
    # f32 intermediates (t, sin, epilogue).  Covers v5e's 16 MiB default at big tiles;
    # capped at 64 MiB (v7x physical VMEM).
    itemsize = jnp.dtype(operand_dtype).itemsize
    out_itemsize = jnp.dtype(out_dtype).itemsize
    io_bytes = 2 * tb * (in_dim * itemsize + out_dim * out_itemsize)
    weight_bytes = (w01.size + wsc.size) * itemsize + phase_bias.size * 4
    interm_bytes = tb * 6 * out_dim * 4
    vmem_needed = io_bytes + weight_bytes + interm_bytes
    vmem_limit_bytes = int(min(64 << 20, max(2 * vmem_needed, 32 << 20)))

    kernel = functools.partial(sincosres_kernel, out_dim=out_dim)

    return pl.pallas_call(
        kernel,
        out_shape=jax.ShapeDtypeStruct((B, out_dim), out_dtype),
        grid=grid,
        in_specs=[
            pl.BlockSpec((tb, in_dim), lambda i: (i, 0)),                # x (batch-tiled)
            pl.BlockSpec((in_dim, 3 * out_dim), lambda i: (0, 0)),       # [aW1|aW1|Wx] resident
            pl.BlockSpec((1, 3 * out_dim), lambda i: (0, 0)),            # [0|pi/2|bx] resident
            pl.BlockSpec((2 * out_dim, out_dim), lambda i: (0, 0)),      # [Ws;Wc] resident
        ],
        out_specs=pl.BlockSpec((tb, out_dim), lambda i: (i, 0)),
        compiler_params=pltpu.CompilerParams(
            dimension_semantics=("parallel",),
            vmem_limit_bytes=vmem_limit_bytes),
    )(x, w01, phase_bias, wsc)


def reference(x, wx_t, bx, w1_t, ws_t, wc_t, *, alpha):
    y_old = x @ wx_t + jnp.reshape(bx, (1, -1))
    x1 = (alpha * x) @ w1_t
    y_new = jnp.sin(x1) @ ws_t + jnp.cos(x1) @ wc_t
    return _softplus(y_old + y_new)


if __name__ == "__main__":
    # Module config: in_dim != out_dim so process_x is a Linear; is_first=False.
    # Small shapes; block_b=128 so the demo still exercises a multi-step grid.
    B, in_dim, out_dim = 256, 32, 64
    alpha = 3.0
    is_first = False

    key = jax.random.PRNGKey(0)
    kx, kwx, kbx, kw1, kws, kwc = jax.random.split(key, 6)

    x = jax.random.normal(kx, (B, in_dim), dtype=jnp.float32)

    # process_x: nn.Linear(in_dim, out_dim) default init ~ U(-1/sqrt(in), 1/sqrt(in))
    lim = 1.0 / np.sqrt(in_dim)
    wx_t = jax.random.uniform(kwx, (in_dim, out_dim), minval=-lim, maxval=lim,
                              dtype=jnp.float32)
    bx = jax.random.uniform(kbx, (1, out_dim), minval=-lim, maxval=lim,
                            dtype=jnp.float32)

    # process_x1: init_weight(..., alpha, is_first=False) -> U(-sqrt(6/in)/alpha, +)
    lim1 = (1.0 / in_dim) if is_first else np.sqrt(6.0 / in_dim) / alpha
    w1_t = jax.random.uniform(kw1, (in_dim, out_dim), minval=-lim1, maxval=lim1,
                              dtype=jnp.float32)

    # linear2s / linear2c: nn.Linear(out_dim, out_dim) default init
    lim2 = 1.0 / np.sqrt(out_dim)
    ws_t = jax.random.uniform(kws, (out_dim, out_dim), minval=-lim2, maxval=lim2,
                              dtype=jnp.float32)
    wc_t = jax.random.uniform(kwc, (out_dim, out_dim), minval=-lim2, maxval=lim2,
                              dtype=jnp.float32)

    y_ref = reference(x, wx_t, bx, w1_t, ws_t, wc_t, alpha=alpha)

    # --- f32 operand path (module-exact semantics; cos via sin(x+pi/2) ~ 1 ulp) ---
    p32 = make_sincosres_params(wx_t, bx, w1_t, ws_t, wc_t, alpha=alpha,
                                operand_dtype=jnp.float32)
    y32 = jax.block_until_ready(sincosres(x, *p32, block_b=128))
    np.testing.assert_allclose(np.asarray(y32, dtype=np.float32),
                               np.asarray(y_ref), rtol=1e-5, atol=2e-5)

    # --- bf16 operand path (halves HBM traffic; ~1e-3 relative accuracy) ---
    p16 = make_sincosres_params(wx_t, bx, w1_t, ws_t, wc_t, alpha=alpha,
                                operand_dtype=jnp.bfloat16)
    y16 = jax.block_until_ready(sincosres(x, *p16, block_b=128))
    np.testing.assert_allclose(np.asarray(y16, dtype=np.float32),
                               np.asarray(y_ref), rtol=3e-2, atol=3e-2)

    print("KERNEL_OK")
</pallas_src>

<mosaic_0001>
module attributes {stable_mosaic.version = 11 : i64} {
  func.func @sincosres_kernel(%arg0: i32, %arg1: memref<128x32xf32, #tpu.memory_space<vmem>>, %arg2: memref<32x192xf32, #tpu.memory_space<vmem>>, %arg3: memref<1x192xf32, #tpu.memory_space<vmem>>, %arg4: memref<128x64xf32, #tpu.memory_space<vmem>>, %arg5: memref<128x64xf32, #tpu.memory_space<vmem>>) attributes {dimension_semantics = [#tpu.dimension_semantics<parallel>], iteration_bounds = array<i64: 2>, scalar_prefetch = 0 : i64, scratch_operands = 0 : i64, tpu.core_type = #tpu.core_type<tc>, window_params = [{transform_indices = @transform_0, window_bounds = array<i64: 128, 32>}, {pipeline_mode = #tpu.pipeline_mode<synchronous>, transform_indices = @transform_1, window_bounds = array<i64: 32, 192>}, {pipeline_mode = #tpu.pipeline_mode<synchronous>, transform_indices = @transform_2, window_bounds = array<i64: 1, 192>}, {pipeline_mode = #tpu.pipeline_mode<synchronous>, transform_indices = @transform_3, window_bounds = array<i64: 128, 64>}, {transform_indices = @transform_4, window_bounds = array<i64: 128, 64>}]} {
    %c0 = arith.constant 0 : index
    %c0_0 = arith.constant 0 : index
    %0 = vector.load %arg1[%c0, %c0_0] : memref<128x32xf32, #tpu.memory_space<vmem>>, vector<128x32xf32>
    %c0_1 = arith.constant 0 : index
    %c0_2 = arith.constant 0 : index
    %1 = vector.load %arg2[%c0_1, %c0_2] : memref<32x192xf32, #tpu.memory_space<vmem>>, vector<32x192xf32>
    %cst = arith.constant dense<0.000000e+00> : vector<128x192xf32>
    %2 = tpu.matmul %0, %1, %cst {dimension_numbers = #tpu.dot_dimension_numbers<[1], [0], [0], [1], [0, 0, 1, 1], [], []>} : vector<128x32xf32>, vector<32x192xf32>, vector<128x192xf32> -> vector<128x192xf32>
    %c0_3 = arith.constant 0 : index
    %c0_4 = arith.constant 0 : index
    %3 = vector.load %arg3[%c0_3, %c0_4] : memref<1x192xf32, #tpu.memory_space<vmem>>, vector<1x192xf32>
    %4 = vector.broadcast %3 : vector<1x192xf32> to vector<128x192xf32>
    %5 = arith.addf %2, %4 : vector<128x192xf32>
    %6 = vector.extract_strided_slice %5 {offsets = [0, 0], sizes = [128, 128], strides = [1, 1]} : vector<128x192xf32> to vector<128x128xf32>
    %7 = math.sin %6 : vector<128x128xf32>
    %8 = vector.extract_strided_slice %5 {offsets = [0, 128], sizes = [128, 64], strides = [1, 1]} : vector<128x192xf32> to vector<128x64xf32>
    %c0_5 = arith.constant 0 : index
    %c0_6 = arith.constant 0 : index
    %9 = vector.load %arg4[%c0_5, %c0_6] : memref<128x64xf32, #tpu.memory_space<vmem>>, vector<128x64xf32>
    %cst_7 = arith.constant dense<0.000000e+00> : vector<128x64xf32>
    %10 = tpu.matmul %7, %9, %cst_7 {dimension_numbers = #tpu.dot_dimension_numbers<[1], [0], [0], [1], [0, 0, 1, 1], [], []>} : vector<128x128xf32>, vector<128x64xf32>, vector<128x64xf32> -> vector<128x64xf32>
    %11 = arith.addf %8, %10 : vector<128x64xf32>
    %cst_8 = arith.constant 2.000000e+01 : f32
    %12 = vector.broadcast %cst_8 : f32 to vector<128x64xf32>
    %13 = arith.cmpf ogt, %11, %12 : vector<128x64xf32>
    %14 = math.exp %11 : vector<128x64xf32>
    %15 = math.log1p %14 : vector<128x64xf32>
    %16 = arith.select %13, %11, %15 : vector<128x64xi1>, vector<128x64xf32>
    %c0_9 = arith.constant 0 : index
    %c0_10 = arith.constant 0 : index
    %17 = vector.load %arg5[%c0_9, %c0_10] : memref<128x64xf32, #tpu.memory_space<vmem>>, vector<128x64xf32>
    tpu.vector_store %arg5[%c0_9, %c0_10], %16 {strides = array<i32>} : memref<128x64xf32, #tpu.memory_space<vmem>>, vector<128x64xf32>,
    return
  }
  func.func @transform_0(%arg0: i32) -> (i32, i32) {
    %c0_i32 = arith.constant 0 : i32
    %c0_i32_0 = arith.constant 0 : i32
    return %arg0, %c0_i32 : i32, i32
  }
  func.func @transform_1(%arg0: i32) -> (i32, i32) {
    %c0_i32 = arith.constant 0 : i32
    %c0_i32_0 = arith.constant 0 : i32
    %c0_i32_1 = arith.constant 0 : i32
    return %c0_i32, %c0_i32_0 : i32, i32
  }
  func.func @transform_2(%arg0: i32) -> (i32, i32) {
    %c0_i32 = arith.constant 0 : i32
    %c0_i32_0 = arith.constant 0 : i32
    %c0_i32_1 = arith.constant 0 : i32
    return %c0_i32, %c0_i32_0 : i32, i32
  }
  func.func @transform_3(%arg0: i32) -> (i32, i32) {
    %c0_i32 = arith.constant 0 : i32
    %c0_i32_0 = arith.constant 0 : i32
    %c0_i32_1 = arith.constant 0 : i32
    return %c0_i32, %c0_i32_0 : i32, i32
  }
  func.func @transform_4(%arg0: i32) -> (i32, i32) {
    %c0_i32 = arith.constant 0 : i32
    %c0_i32_0 = arith.constant 0 : i32
    return %arg0, %c0_i32 : i32, i32
  }
}

</mosaic_0001>

<bundles_post_ra>
// kernel: tpu_custom_call.1
= control target key start
LH: loop header
LB: loop body
LE: loop exit
PB: predicated region body
PF: predicated region fallthrough
CT: control target
= control target key end

     0   :  { %s3036_s15 = smov 0   ;;  %s5023_s0 = inlined_call_operand.vmem [shape: f32[256,32], index: 0, kind: input, shape index: {}]   ;;  %s5024_s1 = inlined_call_operand.vmem [shape: f32[32,192], index: 1, kind: input, shape index: {}]   ;;  %s5025_s2 = inlined_call_operand.vmem [shape: f32[1,192], index: 2, kind: input, shape index: {}]   ;;  %s5026_s3 = inlined_call_operand.vmem [shape: f32[128,64], index: 3, kind: input, shape index: {}]   ;;  %s5027_s4 = inlined_call_operand.vmem [shape: f32[256,64], index: 4, kind: output, shape index: {}]  }
   0x1 LB: > { %s2569_s16 = sadd.s32 4294967295, %s3002_s15   ;;  %p2573_p0 = scmp.ge.s32.totalorder %s3002_s15, 1  ;;  %s3002_s15 = sphi %s3036_s15, %s14_s15  }
   0x2   : > { %p163_p1 = scmp.lt.s32.totalorder %s3002_s15, 3 }
   0x4   : > { %p164_p2 = pnand %p2573_p0, %p163_p1 }
   0x6   : > { %167 = sbr.rel (%p164_p2) target bundleno = 913 (0x391), region = 36 }
   0xd   : > { %v218_v0 = vld [vmem:[%s5024_s1 + $0x8] sm:$0xff]  ;;  %v220_v1 = vld [vmem:[%s5024_s1 + $0x18] sm:$0xff]  ;;  %v217_v2 = vld [vmem:[%s5024_s1] sm:$0xff]  ;;  %s2574_s23 = sshll.u32 %s2569_s16, 4  ;;  %v3004_v7 = vmov 0.0   ;;  %vm237_vm0 = vcmask 261120   ;;  %v227_v29 = vlaneseq }
   0xe   : > { %v2748_v3 = vpack.c.bf16 %v220_v1, %v218_v0  ;;  %v219_v4 = vld [vmem:[%s5024_s1 + $0x10] sm:$0xff]  ;;  %v222_v5 = vld [vmem:[%s5024_s1 + $0x28] sm:$0xff]  ;;  %v224_v6 = vld [vmem:[%s5024_s1 + $0x38] sm:$0xff]  ;;  %350 = vmatprep.mubr.f32.mxu0 %v3004_v7  ;;  %p190_p3 = scmp.lt.s32.totalorder %s2574_s23, 31 }
   0xf   : > { %v2750_v8 = vpack.c.bf16 %v219_v4, %v217_v2  ;;  %v2752_v9 = vpack.c.bf16 %v224_v6, %v222_v5  ;;  %v221_v10 = vld [vmem:[%s5024_s1 + $0x20] sm:$0xff]  ;;  %v223_v11 = vld [vmem:[%s5024_s1 + $0x30] sm:$0xff]  ;;  %v3110_v30 = vshrl.u32 %v227_v29, 7  ;;  %v5034_v2 = vmov 683565275  }
  0x10   : > { %2749 = vmatprep.subr.bf16.mxu0 %v2748_v3  ;;  %s5303_s23 = smov (!%p190_p3, %s2574_s23), 31  ;;  %v2754_v12 = vpack.c.bf16 %v223_v11, %v221_v10  ;;  %v225_v32 = vld [vmem:[%s5025_s2] sm:$0x3]  ;;  %v5040_v11 = vmov 2102212464  }
  0x11   : > { %2751 = vmatpush1.bf16.msra.mxu0 %v2750_v8  ;;  %s2575_s8 = sshll.u32 %s5303_s23, 3  ;;  %5106 = vst [vmem:[#allocation2_spill] sm:$0xff] %v3110_v30  ;;  %v229_v31 = vsub.s32 0, %v3110_v30 }
  0x12   : > { %2753 = vmatprep.subr.bf16.mxu0 %v2752_v9  ;;  %s3076_s11 = scalar_lea.vmem %s5023_s0, %s2575_s8  ;;  %v5038_v9 = vmov 2131351028   ;;  %s4851_s29 = scalar_lea.vmem %s5027_s4, %s2575_s8 }
  0x13   : > { %v201_v13 = vld [vmem:[%s3076_s11] sm:$0xff]  ;;  %v202_v14 = vld [vmem:[%s3076_s11 + $0x8] sm:$0xff]  ;;  %v203_v15 = vld [vmem:[%s3076_s11 + $0x10] sm:$0xff]  ;;  %v3118_v35 = vrot.slane %v225_v32, %v229_v31 }
  0x14   : > { %v204_v16 = vld [vmem:[%s3076_s11 + $0x18] sm:$0xff]  ;;  %v205_v17 = vld [vmem:[%s3076_s11 + $0x20] sm:$0xff]  ;;  %v206_v18 = vld [vmem:[%s3076_s11 + $0x28] sm:$0xff] }
  0x15   : > { %2755 = vmatpush1.bf16.msra.mxu0 %v2754_v12  ;;  %v207_v19 = vld [vmem:[%s3076_s11 + $0x30] sm:$0xff]  ;;  %v208_v20 = vld [vmem:[%s3076_s11 + $0x38] sm:$0xff]  ;;  %v209_v21 = vld [vmem:[%s3076_s11 + $0x40] sm:$0xff] }
  0x16   : > { %v210_v22 = vld [vmem:[%s3076_s11 + $0x48] sm:$0xff]  ;;  %v211_v23 = vld [vmem:[%s3076_s11 + $0x50] sm:$0xff]  ;;  %v212_v24 = vld [vmem:[%s3076_s11 + $0x58] sm:$0xff] }
  0x17   : > { %v213_v25 = vld [vmem:[%s3076_s11 + $0x60] sm:$0xff]  ;;  %v214_v26 = vld [vmem:[%s3076_s11 + $0x68] sm:$0xff]  ;;  %v215_v27 = vld [vmem:[%s3076_s11 + $0x70] sm:$0xff] }
  0x18   : > { %2578 = vmatmul.mubr.msk.f32.vlgmr.msra.gmra.mrb[0].mxu0 %vm237_vm0, %v201_v13  ;;  %v216_v28 = vld [vmem:[%s3076_s11 + $0x78] sm:$0xff]  ;;  %v5042_v13 = vmov 920167782  }
  0x19   : > { %356 = vmatprep.mubr.f32.mxu0 %v3004_v7 }
  0x1c   : > { %2579 = vmatmul.mubr.msk.f32.gmra.mrb[2].mxu0 %vm237_vm0, %v202_v14 }
  0x1d   : > { %362 = vmatprep.mubr.f32.mxu0 %v3004_v7 }
  0x20   : > { %2580 = vmatmul.mubr.msk.f32.gmra.mrb[4].mxu0 %vm237_vm0, %v203_v15 }
  0x21   : > { %368 = vmatprep.mubr.f32.mxu0 %v3004_v7 }
  0x24   : > { %2581 = vmatmul.mubr.msk.f32.gmra.mrb[6].mxu0 %vm237_vm0, %v204_v16 }
  0x25   : > { %374 = vmatprep.mubr.f32.mxu0 %v3004_v7 }
  0x28   : > { %2582 = vmatmul.mubr.msk.f32.gmra.mrb[8].mxu0 %vm237_vm0, %v205_v17 }
  0x29   : > { %380 = vmatprep.mubr.f32.mxu0 %v3004_v7 }
  0x2c   : > { %2583 = vmatmul.mubr.msk.f32.gmra.mrb[10].mxu0 %vm237_vm0, %v206_v18 }
  0x2d   : > { %386 = vmatprep.mubr.f32.mxu0 %v3004_v7 }
  0x30   : > { %2584 = vmatmul.mubr.msk.f32.gmra.mrb[12].mxu0 %vm237_vm0, %v207_v19 }
  0x31   : > { %392 = vmatprep.mubr.f32.mxu0 %v3004_v7 }
  0x34   : > { %2585 = vmatmul.mubr.msk.f32.gmra.mrb[14].mxu0 %vm237_vm0, %v208_v20 }
  0x35   : > { %398 = vmatprep.mubr.f32.mxu0 %v3004_v7 }
  0x38   : > { %2586 = vmatmul.mubr.msk.f32.gmra.mrb[16].mxu0 %vm237_vm0, %v209_v21  ;;  %v5031_v21 = vmov 1326507024  }
  0x39   : > { %404 = vmatprep.mubr.f32.mxu0 %v3004_v7 }
  0x3c   : > { %2587 = vmatmul.mubr.msk.f32.gmra.mrb[18].mxu0 %vm237_vm0, %v210_v22 }
  0x3d   : > { %410 = vmatprep.mubr.f32.mxu0 %v3004_v7 }
  0x40   : > { %2588 = vmatmul.mubr.msk.f32.gmra.mrb[20].mxu0 %vm237_vm0, %v211_v23 }
  0x41   : > { %416 = vmatprep.mubr.f32.mxu0 %v3004_v7 }
  0x44   : > { %2589 = vmatmul.mubr.msk.f32.gmra.mrb[22].mxu0 %vm237_vm0, %v212_v24 }
  0x45   : > { %422 = vmatprep.mubr.f32.mxu0 %v3004_v7 }
  0x48   : > { %2590 = vmatmul.mubr.msk.f32.gmra.mrb[24].mxu0 %vm237_vm0, %v213_v25 }
  0x49   : > { %428 = vmatprep.mubr.f32.mxu0 %v3004_v7 }
  0x4c   : > { %2591 = vmatmul.mubr.msk.f32.gmra.mrb[26].mxu0 %vm237_vm0, %v214_v26 }
  0x4d   : > { %434 = vmatprep.mubr.f32.mxu0 %v3004_v7 }
  0x50   : > { %2592 = vmatmul.mubr.msk.f32.gmra.mrb[28].mxu0 %vm237_vm0, %v215_v27 }
  0x51   : > { %440 = vmatprep.mubr.f32.mxu0 %v3004_v7  ;;  %v5036_v7 = vmov 2475754826  }
  0x54   : > { %2593 = vmatmul.mubr.msk.f32.gmra.mrb[30].mxu0 %vm237_vm0, %v216_v28 }
  0xeb   : > { %v352_v33 = vpop.f32.mrb[0].mxu0 }
  0xec   : > { %v3116_v34 = vpop.f32.mrb[1].mxu0  ;;  %v3132_v44 = vadd.f32 %v352_v33, %v3118_v35 }
  0xed   : > { %5107 = vst [vmem:[#allocation3_spill] sm:$0xff] %v3116_v34 }
  0xee   : > { %5110 = vst [vmem:[#allocation6_spill] sm:$0xff] %v3132_v44  ;;  %v450_v53 = vand.u32 2139095040, %v3132_v44 }
  0xef   : > { %v358_v36 = vpop.f32.mrb[2].mxu0 }
  0xf0   : > { %v3121_v37 = vadd.f32 %v358_v36, %v3118_v35  ;;  %v3123_v38 = vpop.f32.mrb[3].mxu0  ;;  %v3150_v61 = vshrl.u32 %v450_v53, 23 }
  0xf1   : > { %5108 = vst [vmem:[#allocation4_spill] sm:$0xff] %v3123_v38 }
  0xf2   : > { %v554_v39 = vand.u32 2139095040, %v3121_v37  ;;  %v5030_v45 = vand.u32 2147483647, %v3121_v37 }
  0xf3   : > { %v364_v40 = vpop.f32.mrb[4].mxu0 }
  0xf4   : > { %v555_v41 = vshrl.u32 %v554_v39, 23  ;;  %v3127_v42 = vadd.f32 %v364_v40, %v3118_v35  ;;  %v3129_v43 = vpop.f32.mrb[5].mxu0  ;;  %v558_v54 = vand.u32 8388607, %v5030_v45 }
  0xf5   : > { %5109 = vst [vmem:[#allocation5_spill] sm:$0xff] %v3129_v43 }
  0xf6   : > { %v2598_v46 = vadd.s32 4294967169, %v555_v41  ;;  %v5029_v47 = vand.u32 2147483647, %v3127_v42  ;;  %v658_v48 = vand.u32 2139095040, %v3127_v42  ;;  %v559_v62 = vor.u32 8388608, %v558_v54 }
  0xf7   : > { %v370_v49 = vpop.f32.mrb[6].mxu0 }
  0xf8   : > { %v561_v50 = vadd.s32 1, %v2598_v46  ;;  %v3137_v51 = vpop.f32.mrb[7].mxu0  ;;  %v659_v52 = vshrl.u32 %v658_v48, 23  ;;  %v3144_v56 = vand.u32 8388607, %v5029_v47  ;;  %v3153_v0 = vadd.f32 %v370_v49, %v3118_v35 }
  0xf9   : > { %5111 = vst [vmem:[#allocation7_spill] sm:$0xff] %v3137_v51 }
  0xfa   : > { %vm562_vm1 = vcmp.gt.s32.totalorder %v561_v50, 0  ;;  %v2602_v55 = vadd.s32 4294967169, %v659_v52  ;;  %5113 = vst [vmem:[#allocation9_spill] sm:$0xff] %v3153_v0  ;;  %v663_v4 = vor.u32 8388608, %v3144_v56  ;;  %v599_v52 = vshll.u32 %v559_v62, 8 }
  0xfb   : > { %v3146_v57 = vpop.f32.mrb[8].mxu0  ;;  %v563_v58 = vsel %vm562_vm1, %v561_v50, 0 }
  0xfc   : > { %v3148_v59 = vpop.f32.mrb[9].mxu0  ;;  %v565_v60 = vand.u32 31, %v563_v58  ;;  %v564_v63 = vshrl.u32 %v563_v58, 5  ;;  %v665_v5 = vadd.s32 1, %v2602_v55  ;;  %v3192_v62 = vshll.u32 %v663_v4, 8 }
  0xfd   : > { %5112 = vst [vmem:[#allocation8_spill] sm:$0xff] %v3148_v59 }
  0xfe   : > { %v566_v1 = vsub.s32 32, %v565_v60  ;;  %v568_v3 = vshll.u32 %v5034_v2, %v565_v60  ;;  %v571_v8 = vshll.u32 %v5036_v7, %v565_v60  ;;  %v574_v10 = vshll.u32 %v5038_v9, %v565_v60 }
  0xff   : > { %v3157_v6 = vpop.f32.mrb[10].mxu0  ;;  %v577_v12 = vshll.u32 %v5040_v11, %v565_v60  ;;  %v580_v14 = vshll.u32 %v5042_v13, %v565_v60  ;;  %vm583_vm2 = vcmp.lt.s32.totalorder %v564_v63, 1  ;;  %vm584_vm3 = vcmp.lt.s32.totalorder %v564_v63, 2 }
 0x100   : > { %v3163_v15 = vpop.f32.mrb[11].mxu0  ;;  %v567_v16 = vshrl.u32 %v5034_v2, %v566_v1  ;;  %v569_v17 = vshrl.u32 %v5036_v7, %v566_v1  ;;  %v572_v18 = vshrl.u32 %v5038_v9, %v566_v1  ;;  %v575_v19 = vshrl.u32 %v5040_v11, %v566_v1 }
 0x101   : > { %5114 = vst [vmem:[#allocation10_spill] sm:$0xff] %v3163_v15  ;;  %v578_v20 = vshrl.u32 %v5042_v13, %v566_v1  ;;  %v581_v22 = vshrl.u32 %v5031_v21, %v566_v1  ;;  %vm585_vm4 = vcmp.lt.s32.totalorder %v564_v63, 3  ;;  %vm586_vm5 = vcmp.lt.s32.totalorder %v564_v63, 4 }
 0x102   : > { %v570_v23 = vor.u32 %v569_v17, %v568_v3  ;;  %v573_v24 = vor.u32 %v572_v18, %v571_v8  ;;  %v576_v25 = vor.u32 %v575_v19, %v574_v10  ;;  %vm666_vm6 = vcmp.gt.s32.totalorder %v665_v5, 0 }
 0x103   : > { %v3171_v26 = vpop.f32.mrb[12].mxu0  ;;  %v579_v27 = vor.u32 %v578_v20, %v577_v12  ;;  %v582_v28 = vor.u32 %v581_v22, %v580_v14  ;;  %v667_v46 = vsel %vm666_vm6, %v665_v5, 0  ;;  %v762_v14 = vand.u32 2139095040, %v3153_v0 }
 0x104   : > { %v3173_v29 = vpop.f32.mrb[13].mxu0  ;;  %v587_v31 = vsel %vm583_vm2, %v567_v16, %v570_v23  ;;  %v588_v32 = vsel %vm586_vm5, %v576_v25, 2102212464  ;;  %v591_v33 = vsel %vm583_vm2, %v570_v23, %v573_v24  ;;  %v595_v36 = vsel %vm583_vm2, %v573_v24, %v576_v25 }
 0x105   : > { %5115 = vst [vmem:[#allocation11_spill] sm:$0xff] %v3173_v29  ;;  %v589_v39 = vsel %vm585_vm4, %v573_v24, %v588_v32  ;;  %v592_v40 = vsel %vm586_vm5, %v579_v27, 920167782  ;;  %v596_v41 = vsel %vm586_vm5, %v582_v28, 1326507024  ;;  %v668_v56 = vshrl.u32 %v667_v46, 5 }
 0x106   : > { %v590_v48 = vsel %vm584_vm3, %v587_v31, %v589_v39  ;;  %v593_v49 = vsel %vm585_vm4, %v576_v25, %v592_v40  ;;  %v597_v50 = vsel %vm585_vm4, %v579_v27, %v596_v41  ;;  %v669_v58 = vand.u32 31, %v667_v46 }
 0x107   : > { %v3179_v53 = vpop.f32.mrb[14].mxu0  ;;  %v594_v54 = vsel %vm584_vm3, %v591_v33, %v593_v49  ;;  %v598_v55 = vsel %vm584_vm3, %v595_v36, %v597_v50  ;;  %v606_v10 = vmul.u32 %v599_v52, %v590_v48  ;;  %vm687_vm8 = vcmp.lt.s32.totalorder %v668_v56, 1 }
 0x108   : > { %v3183_v60 = vpop.f32.mrb[15].mxu0  ;;  %v3185_v1 = vmul.u32.u64.low %v599_v52, %v598_v55  ;;  %v3186_v3 = vmul.u32.u64.high %v599_v52, %v598_v55, %v3185_v1  ;;  %v3188_v5 = vmul.u32.u64.low %v599_v52, %v594_v54  ;;  %v3189_v8 = vmul.u32.u64.high %v599_v52, %v594_v54, %v3188_v5 }
 0x109   : > { %5116 = vst [vmem:[#allocation12_spill] sm:$0xff] %v3183_v60  ;;  %v670_v12 = vsub.s32 32, %v669_v58  ;;  %v672_v63 = vshll.u32 %v5034_v2, %v669_v58  ;;  %v675_v16 = vshll.u32 %v5036_v7, %v669_v58  ;;  %v678_v17 = vshll.u32 %v5038_v9, %v669_v58 }
 0x10a   : > { %v681_v18 = vshll.u32 %v5040_v11, %v669_v58  ;;  %v684_v4 = vshll.u32 %v5042_v13, %v669_v58  ;;  %vm608_vm7 = vc.u32 %v3186_v3, %v3188_v5  ;;  %v609_v25 = vadd.s32 1, %v3189_v8 }
 0x10b   : > { %v3199_v19 = vpop.f32.mrb[16].mxu0  ;;  %v673_v20 = vshrl.u32 %v5036_v7, %v670_v12  ;;  %v676_v22 = vshrl.u32 %v5038_v9, %v670_v12  ;;  %v679_v23 = vshrl.u32 %v5040_v11, %v670_v12  ;;  %v682_v27 = vshrl.u32 %v5042_v13, %v670_v12 }
 0x10c   : > { %v3205_v24 = vpop.f32.mrb[17].mxu0  ;;  %v685_v33 = vshrl.u32 %v5031_v21, %v670_v12  ;;  %v610_v36 = vsel %vm608_vm7, %v609_v25, %v3189_v8  ;;  %vm688_vm9 = vcmp.lt.s32.totalorder %v668_v56, 2  ;;  %vm690_vm10 = vcmp.lt.s32.totalorder %v668_v56, 4 }
 0x10d   : > { %5117 = vst [vmem:[#allocation13_spill] sm:$0xff] %v3205_v24  ;;  %v674_v28 = vor.u32 %v673_v20, %v672_v63  ;;  %v677_v31 = vor.u32 %v676_v22, %v675_v16  ;;  %v680_v32 = vor.u32 %v679_v23, %v678_v17  ;;  %v683_v39 = vor.u32 %v682_v27, %v681_v18 }
 0x10e   : > { %v611_v41 = vadd.s32 %v610_v36, %v606_v10  ;;  %v671_v46 = vshrl.u32 %v5034_v2, %v670_v12  ;;  %v686_v48 = vor.u32 %v685_v33, %v684_v4  ;;  %vm689_vm11 = vcmp.lt.s32.totalorder %v668_v56, 3 }
 0x10f   : > { %v3213_v40 = vpop.f32.mrb[18].mxu0  ;;  %v692_v49 = vsel %vm690_vm10, %v680_v32, 2102212464  ;;  %v695_v50 = vsel %vm687_vm8, %v674_v28, %v677_v31  ;;  %v696_v52 = vsel %vm690_vm10, %v683_v39, 920167782  ;;  %v699_v54 = vsel %vm687_vm8, %v677_v31, %v680_v32 }
 0x110   : > { %v612_v55 = vadd.s32 536870912, %v611_v41  ;;  %v691_v58 = vsel %vm687_vm8, %v671_v46, %v674_v28  ;;  %v697_v1 = vsel %vm689_vm11, %v680_v32, %v696_v52  ;;  %v700_v8 = vsel %vm690_vm10, %v686_v48, 1326507024  ;;  %v3220_v18 = vpop.f32.mrb[19].mxu0 }
 0x111   : > { %v693_v63 = vsel %vm689_vm11, %v677_v31, %v692_v49  ;;  %v698_v16 = vsel %vm688_vm9, %v695_v50, %v697_v1  ;;  %v701_v17 = vsel %vm689_vm11, %v683_v39, %v700_v8  ;;  %v763_v10 = vshrl.u32 %v762_v14, 23  ;;  %5118 = vst [vmem:[#allocation14_spill] sm:$0xff] %v3220_v18 }
 0x112   : > { %v3222_v12 = vshrl.u32 %v612_v55, 30  ;;  %v702_v20 = vsel %vm688_vm9, %v699_v54, %v701_v17  ;;  %v3226_v22 = vmul.u32.u64.low %v3192_v62, %v698_v16  ;;  %v3227_v23 = vmul.u32.u64.high %v3192_v62, %v698_v16, %v3226_v22 }
 0x113   : > { %v3231_v4 = vmul.u32.u64.low %v3192_v62, %v702_v20  ;;  %v3232_v25 = vmul.u32.u64.high %v3192_v62, %v702_v20, %v3231_v4  ;;  %v2606_v27 = vadd.s32 4294967169, %v763_v10  ;;  %v694_v14 = vsel %vm688_vm9, %v691_v58, %v693_v63  ;;  %v3236_v31 = vpop.f32.mrb[20].mxu0 }
 0x114   : > { %5119 = vst [vmem:[#allocation15_spill] sm:$0xff] %v3222_v12  ;;  %v614_v28 = vshll.u32 %v3222_v12, 30  ;;  %v2594_v33 = vadd.s32 4294967169, %v3150_v61  ;;  %v713_v39 = vadd.s32 1, %v3227_v23  ;;  %v710_v46 = vmul.u32 %v3192_v62, %v694_v14  ;;  %v3271_v47 = vpop.f32.mrb[21].mxu0 }
 0x115   : > { %v769_v32 = vadd.s32 1, %v2606_v27  ;;  %vm712_vm12 = vc.u32 %v3232_v25, %v3226_v22  ;;  %v5028_v48 = vand.u32 2147483647, %v3153_v0  ;;  %v3255_v16 = vadd.f32 %v3146_v57, %v3118_v35  ;;  %5122 = vst [vmem:[#allocation18_spill] sm:$0xff] %v3271_v47 }
 0x116   : > { %v3239_v36 = vsub.s32 %v611_v41, %v614_v28  ;;  %v714_v49 = vsel %vm712_vm12, %v713_v39, %v3227_v23  ;;  %v457_v41 = vadd.s32 1, %v2594_v33  ;;  %v5129_v15 = vmov 683565275  }
 0x117   : > { %vm770_vm13 = vcmp.gt.s32.totalorder %v769_v32, 0  ;;  %v715_v52 = vadd.s32 %v714_v49, %v710_v46  ;;  %v766_v62 = vand.u32 8388607, %v5028_v48  ;;  %5120 = vst [vmem:[#allocation16_spill] sm:$0xff] %v3255_v16 }
 0x118   : > { %v617_v56 = vsub.s32 0, %v3239_v36  ;;  %v771_v50 = vsel %vm770_vm13, %v769_v32, 0  ;;  %vm458_vm14 = vcmp.gt.s32.totalorder %v457_v41, 0 }
 0x119   : > { %v773_v54 = vand.u32 31, %v771_v50  ;;  %v716_v55 = vadd.s32 536870912, %v715_v52  ;;  %v772_v1 = vshrl.u32 %v771_v50, 5  ;;  %v767_v46 = vor.u32 8388608, %v766_v62 }
 0x11a   : > { %v2599_v61 = vmin.u32 %v617_v56, %v3239_v36  ;;  %v866_v50 = vand.u32 2139095040, %v3255_v16  ;;  %v3276_v62 = vadd.f32 %v3157_v6, %v3118_v35 }
 0x11b   : > { %v774_v58 = vsub.s32 32, %v773_v54  ;;  %v776_v8 = vshll.u32 %v5034_v2, %v773_v54  ;;  %v779_v63 = vshll.u32 %v5036_v7, %v773_v54  ;;  %v3257_v10 = vshrl.u32 %v716_v55, 30 }
 0x11c   : > { %v619_v17 = vclz %v2599_v61  ;;  %v785_v27 = vshll.u32 %v5040_v11, %v773_v54  ;;  %v782_v39 = vshll.u32 %v5038_v9, %v773_v54  ;;  %v788_v49 = vshll.u32 %v5042_v13, %v773_v54  ;;  %5123 = vst [vmem:[#allocation19_spill] sm:$0xff] %v3276_v62 }
 0x11d   : > { %5121 = vst [vmem:[#allocation17_spill] sm:$0xff] %v3257_v10  ;;  %v777_v20 = vshrl.u32 %v5036_v7, %v774_v58  ;;  %v780_v23 = vshrl.u32 %v5038_v9, %v774_v58  ;;  %v783_v4 = vshrl.u32 %v5040_v11, %v774_v58  ;;  %v786_v28 = vshrl.u32 %v5042_v13, %v774_v58 }
 0x11e   : > { %v789_v14 = vshrl.u32 %v5031_v21, %v774_v58  ;;  %v718_v32 = vshll.u32 %v3257_v10, 30  ;;  %vm791_vm15 = vcmp.lt.s32.totalorder %v772_v1, 1  ;;  %v2600_v45 = vadd.s32 4294967294, %v619_v17 }
 0x11f   : > { %v778_v33 = vor.u32 %v777_v20, %v776_v8  ;;  %v781_v57 = vor.u32 %v780_v23, %v779_v63  ;;  %v787_v56 = vor.u32 %v786_v28, %v785_v27  ;;  %v784_v61 = vor.u32 %v783_v4, %v782_v39  ;;  %v3280_v27 = vpop.f32.mrb[22].mxu0 }
 0x120   : > { %v3269_v55 = vsub.s32 %v715_v52, %v718_v32  ;;  %v790_v48 = vor.u32 %v789_v14, %v788_v49  ;;  %vm794_vm0 = vcmp.lt.s32.totalorder %v772_v1, 4  ;;  %vm793_vm1 = vcmp.lt.s32.totalorder %v772_v1, 3  ;;  %v3335_v60 = vpop.f32.mrb[23].mxu0 }
 0x121   : > { %v799_v8 = vsel %vm791_vm15, %v778_v33, %v781_v57  ;;  %v800_v54 = vsel %vm794_vm0, %v787_v56, 920167782  ;;  %v807_v63 = vshll.u32 %v767_v46, 8  ;;  %v867_v20 = vshrl.u32 %v866_v50, 23  ;;  %5128 = vst [vmem:[#allocation23_spill] sm:$0xff] %v3335_v60 }
 0x122   : > { %vm792_vm2 = vcmp.lt.s32.totalorder %v772_v1, 2  ;;  %v796_v23 = vsel %vm794_vm0, %v784_v61, 2102212464  ;;  %v801_v52 = vsel %vm793_vm1, %v784_v61, %v800_v54  ;;  %v803_v4 = vsel %vm791_vm15, %v781_v57, %v784_v61 }
 0x123   : > { %v721_v17 = vsub.s32 0, %v3269_v55  ;;  %v775_v28 = vshrl.u32 %v5034_v2, %v774_v58  ;;  %v802_v14 = vsel %vm792_vm2, %v799_v8, %v801_v52  ;;  %v804_v6 = vsel %vm794_vm0, %v790_v48, 1326507024 }
 0x124   : > { %vm2601_vm3 = vcmp.lt.s32.totalorder %v2600_v45, 0  ;;  %v805_v32 = vsel %vm793_vm1, %v787_v56, %v804_v6  ;;  %v3286_v39 = vmul.u32.u64.low %v807_v63, %v802_v14  ;;  %v3287_v46 = vmul.u32.u64.high %v807_v63, %v802_v14, %v3286_v39 }
 0x125   : > { %v795_v49 = vsel %vm791_vm15, %v775_v28, %v778_v33  ;;  %v797_v50 = vsel %vm793_vm1, %v781_v57, %v796_v23  ;;  %v806_v61 = vsel %vm792_vm2, %v803_v4, %v805_v32  ;;  %v5033_v58 = vand.u32 2147483647, %v3255_v16 }
 0x126   : > { %v3293_v54 = vmul.u32.u64.low %v807_v63, %v806_v61  ;;  %v3294_v21 = vmul.u32.u64.high %v807_v63, %v806_v61, %v3293_v54  ;;  %v2610_v8 = vadd.s32 4294967169, %v867_v20  ;;  %v459_v48 = vsel %vm458_vm14, %v457_v41, 0 }
 0x127   : > { %v3298_v52 = vsel %vm2601_vm3, 0, %v2600_v45  ;;  %v2603_v56 = vmin.u32 %v721_v17, %v3269_v55  ;;  %v798_v14 = vsel %vm792_vm2, %v795_v49, %v797_v50  ;;  %v817_v33 = vadd.s32 1, %v3287_v46 }
 0x128   : > { %v873_v28 = vadd.s32 1, %v2610_v8  ;;  %v970_v57 = vand.u32 2139095040, %v3276_v62  ;;  %v3304_v23 = vand.u32 31, %v459_v48  ;;  %v627_v4 = vsub.s32 4294967266, %v3298_v52 }
 0x129   : > { %v870_v20 = vand.u32 8388607, %v5033_v58  ;;  %v723_v6 = vclz %v2603_v56  ;;  %v814_v41 = vmul.u32 %v807_v63, %v798_v14  ;;  %vm816_vm4 = vc.u32 %v3294_v21, %v3286_v39 }
 0x12a   : > { %5124 = vst [vmem:[#allocation20_spill] sm:$0xff] %v3304_v23  ;;  %vm874_vm5 = vcmp.gt.s32.totalorder %v873_v28, 0  ;;  %v818_v45 = vsel %vm816_vm4, %v817_v33, %v3287_v46  ;;  %v971_v17 = vshrl.u32 %v970_v57, 23  ;;  %v3312_v32 = vshrl.u32 %v459_v48, 5 }
 0x12b   : > { %v875_v1 = vsel %vm874_vm5, %v873_v28, 0  ;;  %v819_v49 = vadd.s32 %v818_v45, %v814_v41  ;;  %v3315_v61 = vsub.s32 32, %v3304_v23  ;;  %v607_v54 = vadd.s32 %v3188_v5, %v3186_v3 }
 0x12c   : > { %v877_v50 = vand.u32 31, %v875_v1  ;;  %v623_v63 = vsub.s32 32, %v3298_v52  ;;  %v871_v8 = vor.u32 8388608, %v870_v20  ;;  %v3320_v56 = vadd.s32 127, %v627_v4 }
 0x12d   : > { %5125 = vst [vmem:[#allocation21_spill] sm:$0xff] %v3315_v61  ;;  %v2604_v14 = vadd.s32 4294967294, %v723_v6  ;;  %v820_v58 = vadd.s32 536870912, %v819_v49  ;;  %v876_v33 = vshrl.u32 %v875_v1, 5  ;;  %v2614_v57 = vadd.s32 4294967169, %v971_v17 }
 0x12e   : > { %v878_v46 = vsub.s32 32, %v877_v50  ;;  %v880_v48 = vshll.u32 %v5034_v2, %v877_v50  ;;  %v883_v28 = vshll.u32 %v5036_v7, %v877_v50  ;;  %v886_v5 = vshll.u32 %v5038_v9, %v877_v50 }
 0x12f   : > { %v3324_v41 = vshrl.u32 %v820_v58, 30  ;;  %v889_v20 = vshll.u32 %v5040_v11, %v877_v50  ;;  %v892_v1 = vshll.u32 %v5042_v13, %v877_v50  ;;  %v5127_v58 = vmov 1326507024  }
 0x130   : > { %v881_v45 = vshrl.u32 %v5036_v7, %v878_v46  ;;  %v884_v3 = vshrl.u32 %v5038_v9, %v878_v46  ;;  %v887_v4 = vshrl.u32 %v5040_v11, %v878_v46  ;;  %v890_v6 = vshrl.u32 %v5042_v13, %v878_v46 }
 0x131   : > { %5126 = vst [vmem:[#allocation22_spill] sm:$0xff] %v3324_v41  ;;  %v822_v2 = vshll.u32 %v3324_v41, 30  ;;  %v893_v24 = vshrl.u32 %v5127_v58, %v878_v46  ;;  %vm2605_vm6 = vcmp.lt.s32.totalorder %v2604_v14, 0  ;;  %v911_v29 = vshll.u32 %v871_v8, 8 }
 0x132   : > { %v882_v47 = vor.u32 %v881_v45, %v880_v48  ;;  %v885_v17 = vor.u32 %v884_v3, %v883_v28  ;;  %v888_v7 = vor.u32 %v887_v4, %v886_v5  ;;  %v891_v18 = vor.u32 %v890_v6, %v889_v20  ;;  %v3341_v5 = vpop.f32.mrb[24].mxu0 }
 0x133   : > { %v3337_v9 = vsub.s32 %v819_v49, %v822_v2  ;;  %v894_v59 = vor.u32 %v893_v24, %v892_v1  ;;  %vm895_vm7 = vcmp.lt.s32.totalorder %v876_v33, 1  ;;  %v977_v11 = vadd.s32 1, %v2614_v57  ;;  %v3400_v10 = vpop.f32.mrb[25].mxu0 }
 0x134   : > { %v879_v43 = vshrl.u32 %v5129_v15, %v878_v46  ;;  %vm897_vm8 = vcmp.lt.s32.totalorder %v876_v33, 3  ;;  %vm898_vm9 = vcmp.lt.s32.totalorder %v876_v33, 4  ;;  %v903_v50 = vsel %vm895_vm7, %v882_v47, %v885_v17  ;;  %5136 = vst [vmem:[#allocation26_spill] sm:$0xff] %v3400_v10 }
 0x135   : > { %v825_v48 = vsub.s32 0, %v3337_v9  ;;  %v900_v28 = vsel %vm898_vm9, %v888_v7, 2102212464  ;;  %v904_v45 = vsel %vm898_vm9, %v891_v18, 920167782  ;;  %v907_v3 = vsel %vm895_vm7, %v885_v17, %v888_v7 }
 0x136   : > { %v3344_v8 = vsel %vm2605_vm6, 0, %v2604_v14  ;;  %vm896_vm10 = vcmp.lt.s32.totalorder %v876_v33, 2  ;;  %v905_v2 = vsel %vm897_vm8, %v888_v7, %v904_v45  ;;  %v908_v24 = vsel %vm898_vm9, %v894_v59, 1326507024 }
 0x137   : > { %v899_v49 = vsel %vm895_vm7, %v879_v43, %v882_v47  ;;  %v901_v57 = vsel %vm897_vm8, %v885_v17, %v900_v28  ;;  %v906_v4 = vsel %vm896_vm10, %v903_v50, %v905_v2  ;;  %v909_v46 = vsel %vm897_vm8, %v891_v18, %v908_v24 }
 0x138   : > { %v2607_v20 = vmin.u32 %v825_v48, %v3337_v9  ;;  %v910_v6 = vsel %vm896_vm10, %v907_v3, %v909_v46  ;;  %v3347_v1 = vmul.u32.u64.low %v911_v29, %v906_v4  ;;  %v3348_v13 = vmul.u32.u64.high %v911_v29, %v906_v4, %v3347_v1 }
 0x139   : > { %v3351_v60 = vmul.u32.u64.low %v911_v29, %v910_v6  ;;  %v3352_v51 = vmul.u32.u64.high %v911_v29, %v910_v6, %v3351_v60  ;;  %v5044_v14 = vand.u32 2147483647, %v3276_v62  ;;  %vm978_vm11 = vcmp.gt.s32.totalorder %v977_v11, 0 }
 0x13a   : > { %v625_v33 = vshrl.u32 %v607_v54, %v623_v63  ;;  %v629_v59 = vshll.u32 %v3320_v56, 23  ;;  %v902_v43 = vsel %vm896_vm10, %v899_v49, %v901_v57  ;;  %v979_v47 = vsel %vm978_vm11, %v977_v11, 0 }
 0x13b   : > { %v5130_v7 = vmov 2102212464   ;;  %v731_v17 = vsub.s32 4294967266, %v3344_v8  ;;  %v981_v50 = vand.u32 31, %v979_v47  ;;  %v3363_v48 = vadd.f32 %v3171_v26, %v3118_v35 }
 0x13c   : > { %v3358_v18 = vshll.u32 %v5130_v7, %v3304_v23  ;;  %v5132_v60 = vmov 920167782   ;;  %v624_v54 = vshll.u32 %v3239_v36, %v3298_v52  ;;  %v827_v63 = vclz %v2607_v20 }
 0x13d   : > { %5131 = vst [vmem:[#allocation24_spill] sm:$0xff] %v3363_v48  ;;  %v3367_v28 = vshrl.u32 %v5132_v60, %v3315_v61  ;;  %v921_v11 = vadd.s32 1, %v3348_v13  ;;  %v711_v56 = vadd.s32 %v3226_v22, %v3232_v25  ;;  %v918_v45 = vmul.u32 %v911_v29, %v902_v43 }
 0x13e   : > { %vm920_vm12 = vc.u32 %v3352_v51, %v3347_v1  ;;  %v982_v3 = vsub.s32 32, %v981_v50  ;;  %v3376_v26 = vor.u32 %v625_v33, %v624_v54  ;;  %v3378_v2 = vor.u32 4788187, %v629_v59 }
 0x13f   : > { %v922_v24 = vsel %vm920_vm12, %v921_v11, %v3348_v13  ;;  %v974_v36 = vand.u32 8388607, %v5044_v14  ;;  %v727_v52 = vsub.s32 32, %v3344_v8  ;;  %v3384_v49 = vadd.s32 127, %v731_v17 }
 0x140   : > { %v923_v57 = vadd.s32 %v922_v24, %v918_v45  ;;  %v2608_v22 = vadd.s32 4294967294, %v827_v63  ;;  %v5133_v25 = vmov 2475754826   ;;  %v5134_v46 = vmov 2131351028  }
 0x141   : > { %v985_v4 = vshrl.u32 %v5133_v25, %v982_v3  ;;  %v988_v20 = vshrl.u32 %v5134_v46, %v982_v3  ;;  %v1074_v6 = vand.u32 2139095040, %v3363_v48  ;;  %v984_v13 = vshll.u32 %v5129_v15, %v981_v50 }
 0x142   : > { %v924_v33 = vadd.s32 536870912, %v923_v57  ;;  %v987_v59 = vshll.u32 %v5133_v25, %v981_v50  ;;  %v991_v43 = vshrl.u32 %v5130_v7, %v982_v3  ;;  %v980_v54 = vshrl.u32 %v979_v47, 5 }
 0x143   : > { %v990_v17 = vshll.u32 %v5134_v46, %v981_v50  ;;  %v993_v11 = vshll.u32 %v5130_v7, %v981_v50  ;;  %v994_v63 = vshrl.u32 %v5132_v60, %v982_v3  ;;  %v975_v24 = vor.u32 8388608, %v974_v36 }
 0x144   : > { %v3396_v45 = vshrl.u32 %v924_v33, 30  ;;  %v986_v14 = vor.u32 %v985_v4, %v984_v13  ;;  %v989_v29 = vor.u32 %v988_v20, %v987_v59  ;;  %v996_v30 = vshll.u32 %v5132_v60, %v981_v50  ;;  %v3409_v13 = vpop.f32.mrb[26].mxu0 }
 0x145   : > { %v992_v34 = vor.u32 %v991_v43, %v990_v17  ;;  %v995_v38 = vor.u32 %v994_v63, %v993_v11  ;;  %v997_v41 = vshrl.u32 %v5127_v58, %v982_v3  ;;  %v728_v47 = vshll.u32 %v3269_v55, %v3344_v8  ;;  %5137 = vst [vmem:[#allocation27_spill] sm:$0xff] %v3409_v13  ;;  %v3487_v13 = vpop.f32.mrb[27].mxu0 }
 0x146   : > { %5135 = vst [vmem:[#allocation25_spill] sm:$0xff] %v3396_v45  ;;  %v729_v12 = vshrl.u32 %v711_v56, %v727_v52  ;;  %v733_v44 = vshll.u32 %v3384_v49, 23  ;;  %v926_v33 = vshll.u32 %v3396_v45, 30  ;;  %vm2609_vm13 = vcmp.lt.s32.totalorder %v2608_v22, 0  ;;  %5142 = vst [vmem:[#allocation31_spill] sm:$0xff] %v3487_v13 }
 0x147   : > { %v998_v36 = vor.u32 %v997_v41, %v996_v30  ;;  %vm999_vm14 = vcmp.lt.s32.totalorder %v980_v54, 1  ;;  %v1075_v4 = vshrl.u32 %v1074_v6, 23  ;;  %vm1001_vm15 = vcmp.lt.s32.totalorder %v980_v54, 3 }
 0x148   : > { %v3406_v20 = vsub.s32 %v923_v57, %v926_v33  ;;  %vm1002_vm0 = vcmp.lt.s32.totalorder %v980_v54, 4  ;;  %v1007_v50 = vsel %vm999_vm14, %v986_v14, %v989_v29  ;;  %v1011_v55 = vsel %vm999_vm14, %v989_v29, %v992_v34 }
 0x149   : > { %v1004_v59 = vsel %vm1002_vm0, %v992_v34, 2102212464  ;;  %v1008_v43 = vsel %vm1002_vm0, %v995_v38, 920167782  ;;  %v1012_v8 = vsel %vm1002_vm0, %v998_v36, 1326507024  ;;  %v983_v56 = vshrl.u32 %v5129_v15, %v982_v3 }
 0x14a   : > { %vm1000_vm1 = vcmp.lt.s32.totalorder %v980_v54, 2  ;;  %v1009_v30 = vsel %vm1001_vm15, %v992_v34, %v1008_v43  ;;  %v1015_v41 = vshll.u32 %v975_v24, 8  ;;  %v3415_v52 = vsel %vm2609_vm13, 0, %v2608_v22 }
 0x14b   : > { %v1010_v49 = vsel %vm1000_vm1, %v1007_v50, %v1009_v30  ;;  %v1013_v57 = vsel %vm1001_vm15, %v995_v38, %v1012_v8  ;;  %v2618_v6 = vadd.s32 4294967169, %v1075_v4  ;;  %v929_v17 = vsub.s32 0, %v3406_v20 }
 0x14c   : > { %v1003_v11 = vsel %vm999_vm14, %v983_v56, %v986_v14  ;;  %v1005_v63 = vsel %vm1001_vm15, %v989_v29, %v1004_v59  ;;  %v1014_v3 = vsel %vm1000_vm1, %v1011_v55, %v1013_v57  ;;  %v3432_v22 = vor.u32 %v3367_v28, %v3358_v18 }
 0x14d   : > { %v3423_v33 = vmul.u32.u64.low %v1015_v41, %v1014_v3  ;;  %v3424_v36 = vmul.u32.u64.high %v1015_v41, %v1014_v3, %v3423_v33  ;;  %v3426_v34 = vmul.u32.u64.low %v1015_v41, %v1010_v49  ;;  %v3427_v24 = vmul.u32.u64.high %v1015_v41, %v1010_v49, %v3426_v34 }
 0x14e   : > { %5138 = vst [vmem:[#allocation28_spill] sm:$0xff] %v3432_v22  ;;  %v3436_v38 = vshll.u32 %v5132_v60, %v3304_v23  ;;  %v3440_v14 = vshrl.u32 %v5127_v58, %v3315_v61  ;;  %v1081_v29 = vadd.s32 1, %v2618_v6  ;;  %v631_v4 = vand.u32 2147483647, %v3378_v2 }
 0x14f   : > { %v633_v50 = vcvt.s32.f32 %v3376_v26  ;;  %v3444_v59 = vor.u32 %v729_v12, %v728_v47  ;;  %v1006_v43 = vsel %vm1000_vm1, %v1003_v11, %v1005_v63  ;;  %v3447_v55 = vor.u32 4788187, %v733_v44 }
 0x150   : > { %v835_v18 = vsub.s32 4294967266, %v3415_v52  ;;  %v5139_v28 = vand.u32 2147483647, %v3363_v48  ;;  %vm1082_vm2 = vcmp.gt.s32.totalorder %v1081_v29, 0  ;;  %v2611_v56 = vmin.u32 %v929_v17, %v3406_v20 }
 0x151   : > { %vm1024_vm3 = vc.u32 %v3424_v36, %v3426_v34  ;;  %v1025_v2 = vadd.s32 1, %v3427_v24  ;;  %v1083_v26 = vsel %vm1082_vm2, %v1081_v29, 0  ;;  %v1022_v54 = vmul.u32 %v1015_v41, %v1006_v43 }
 0x152   : > { %v1078_v8 = vand.u32 8388607, %v5139_v28  ;;  %v1085_v44 = vand.u32 31, %v1083_v26  ;;  %v3460_v47 = vadd.f32 %v3179_v53, %v3118_v35  ;;  %v3462_v30 = vmul.f32 %v633_v50, %v631_v4 }
 0x153   : > { %v737_v49 = vcvt.s32.f32 %v3444_v59  ;;  %v815_v57 = vadd.s32 %v3286_v39, %v3294_v21  ;;  %v1026_v6 = vsel %vm1024_vm3, %v1025_v2, %v3427_v24  ;;  %v735_v17 = vand.u32 2147483647, %v3447_v55 }
 0x154   : > { %5140 = vst [vmem:[#allocation29_spill] sm:$0xff] %v3460_v47  ;;  %v831_v11 = vsub.s32 32, %v3415_v52  ;;  %v1027_v63 = vadd.s32 %v1026_v6, %v1022_v54  ;;  %v1079_v41 = vor.u32 8388608, %v1078_v8  ;;  %v832_v3 = vshll.u32 %v3337_v9, %v3415_v52 }
 0x155   : > { %v836_v53 = vadd.s32 127, %v835_v18  ;;  %v931_v33 = vclz %v2611_v56  ;;  %v1086_v29 = vsub.s32 32, %v1085_v44  ;;  %v1088_v50 = vshll.u32 %v5129_v15, %v1085_v44 }
 0x156   : > { %v1028_v4 = vadd.s32 536870912, %v1027_v63  ;;  %v1091_v59 = vshll.u32 %v5133_v25, %v1085_v44  ;;  %v1178_v21 = vand.u32 2139095040, %v3460_v47  ;;  %v1094_v43 = vshll.u32 %v5134_v46, %v1085_v44 }
 0x157   : > { %v1089_v39 = vshrl.u32 %v5133_v25, %v1086_v29  ;;  %v1092_v24 = vshrl.u32 %v5134_v46, %v1086_v29  ;;  %v1095_v55 = vshrl.u32 %v5130_v7, %v1086_v29  ;;  %v1084_v9 = vshrl.u32 %v1083_v26, 5 }
 0x158   : > { %v3479_v28 = vshrl.u32 %v1028_v4, 30  ;;  %v1097_v52 = vshll.u32 %v5130_v7, %v1085_v44  ;;  %v1098_v18 = vshrl.u32 %v5132_v60, %v1086_v29  ;;  %v833_v8 = vshrl.u32 %v815_v57, %v831_v11 }
 0x159   : > { %v1090_v56 = vor.u32 %v1089_v39, %v1088_v50  ;;  %v1093_v2 = vor.u32 %v1092_v24, %v1091_v59  ;;  %v1096_v54 = vor.u32 %v1095_v55, %v1094_v43  ;;  %vm482_vm4 = vcmp.lt.s32.totalorder %v3312_v32, 4 }
 0x15a   : > { %5141 = vst [vmem:[#allocation30_spill] sm:$0xff] %v3479_v28  ;;  %v837_v6 = vshll.u32 %v836_v53, 23  ;;  %v1030_v12 = vshll.u32 %v3479_v28, 30  ;;  %v1099_v10 = vor.u32 %v1098_v18, %v1097_v52  ;;  %v1119_v45 = vshll.u32 %v1079_v41, 8 }
 0x15b   : > { %v2612_v23 = vadd.s32 4294967294, %v931_v33  ;;  %v1100_v4 = vshll.u32 %v5132_v60, %v1085_v44  ;;  %v1101_v26 = vshrl.u32 %v5127_v58, %v1086_v29  ;;  %v1179_v61 = vshrl.u32 %v1178_v21, 23  ;;  %v3497_v21 = vpop.f32.mrb[28].mxu0 }
 0x15c   : > { %v3489_v48 = vsub.s32 %v1027_v63, %v1030_v12  ;;  %vm1103_vm5 = vcmp.lt.s32.totalorder %v1084_v9, 1  ;;  %vm1105_vm6 = vcmp.lt.s32.totalorder %v1084_v9, 3  ;;  %vm1106_vm7 = vcmp.lt.s32.totalorder %v1084_v9, 4  ;;  %5143 = vst [vmem:[#allocation32_spill] sm:$0xff] %v3497_v21 }
 0x15d   : > { %v1102_v57 = vor.u32 %v1101_v26, %v1100_v4  ;;  %v1108_v11 = vsel %vm1106_vm7, %v1096_v54, 2102212464  ;;  %v1111_v53 = vsel %vm1103_vm5, %v1090_v56, %v1093_v2  ;;  %v1112_v50 = vsel %vm1106_vm7, %v1099_v10, 920167782 }
 0x15e   : > { %v1087_v41 = vshrl.u32 %v5129_v15, %v1086_v29  ;;  %vm1104_vm8 = vcmp.lt.s32.totalorder %v1084_v9, 2  ;;  %v1113_v44 = vsel %vm1105_vm6, %v1096_v54, %v1112_v50  ;;  %v5062_v33 = vand.u32 2147483647, %v3460_v47 }
 0x15f   : > { %vm2613_vm9 = vcmp.lt.s32.totalorder %v2612_v23, 0  ;;  %v1114_v59 = vsel %vm1104_vm8, %v1111_v53, %v1113_v44  ;;  %v1115_v12 = vsel %vm1103_vm5, %v1093_v2, %v1096_v54  ;;  %v1116_v63 = vsel %vm1106_vm7, %v1102_v57, 1326507024 }
 0x160   : > { %v1033_v39 = vsub.s32 0, %v3489_v48  ;;  %v1107_v24 = vsel %vm1103_vm5, %v1087_v41, %v1090_v56  ;;  %v1109_v43 = vsel %vm1105_vm6, %v1093_v2, %v1108_v11  ;;  %v1117_v29 = vsel %vm1105_vm6, %v1099_v10, %v1116_v63 }
 0x161   : > { %v1118_v55 = vsel %vm1104_vm8, %v1115_v12, %v1117_v29  ;;  %v3504_v52 = vmul.u32.u64.low %v1119_v45, %v1114_v59  ;;  %v3505_v18 = vmul.u32.u64.high %v1119_v45, %v1114_v59, %v3504_v52  ;;  %v2622_v4 = vadd.s32 4294967169, %v1179_v61 }
 0x162   : > { %v3508_v26 = vmul.f32 %v737_v49, %v735_v17  ;;  %v3510_v54 = vsel %vm2613_vm9, 0, %v2612_v23  ;;  %v3512_v57 = vmul.u32.u64.low %v1119_v45, %v1118_v55  ;;  %v3513_v53 = vmul.u32.u64.high %v1119_v45, %v1118_v55, %v3512_v57 }
 0x163   : > { %v3518_v56 = vsel %vm482_vm4, %v3432_v22, 920167782  ;;  %v3520_v10 = vor.u32 %v833_v8, %v832_v3  ;;  %v1110_v2 = vsel %vm1104_vm8, %v1107_v24, %v1109_v43  ;;  %v1185_v11 = vadd.s32 1, %v2622_v4 }
 0x164   : > { %5144 = vst [vmem:[#allocation33_spill] sm:$0xff] %v3518_v56  ;;  %v3524_v61 = vor.u32 4788187, %v837_v6  ;;  %v1182_v23 = vand.u32 8388607, %v5062_v33  ;;  %v3530_v49 = vadd.f32 %v3199_v19, %v3118_v35  ;;  %v939_v17 = vsub.s32 4294967266, %v3510_v54 }
 0x165   : > { %v2615_v41 = vmin.u32 %v1033_v39, %v3489_v48  ;;  %v1129_v3 = vadd.s32 1, %v3505_v18  ;;  %vm1186_vm10 = vcmp.gt.s32.totalorder %v1185_v11, 0  ;;  %v1126_v8 = vmul.u32 %v1119_v45, %v1110_v2 }
 0x166   : > { %5145 = vst [vmem:[#allocation34_spill] sm:$0xff] %v3530_v49  ;;  %vm1128_vm11 = vc.u32 %v3513_v53, %v3504_v52  ;;  %v1187_v6 = vsel %vm1186_vm10, %v1185_v11, 0  ;;  %v841_v44 = vcvt.s32.f32 %v3520_v10  ;;  %v919_v19 = vadd.s32 %v3347_v1, %v3352_v51 }
 0x167   : > { %v1130_v59 = vsel %vm1128_vm11, %v1129_v3, %v3505_v18  ;;  %v1189_v12 = vand.u32 31, %v1187_v6  ;;  %v839_v63 = vand.u32 2147483647, %v3524_v61  ;;  %v1183_v24 = vor.u32 8388608, %v1182_v23 }
 0x168   : > { %v1131_v39 = vadd.s32 %v1130_v59, %v1126_v8  ;;  %v935_v45 = vsub.s32 32, %v3510_v54  ;;  %v940_v29 = vadd.s32 127, %v939_v17  ;;  %v1035_v55 = vclz %v2615_v41 }
 0x169   : > { %v1190_v4 = vsub.s32 32, %v1189_v12  ;;  %v1192_v10 = vshll.u32 %v5129_v15, %v1189_v12  ;;  %v1195_v2 = vshll.u32 %v5133_v25, %v1189_v12  ;;  %v1282_v51 = vand.u32 2139095040, %v3530_v49 }
 0x16a   : > { %v1132_v57 = vadd.s32 536870912, %v1131_v39  ;;  %v1198_v11 = vshll.u32 %v5134_v46, %v1189_v12  ;;  %v1188_v17 = vshrl.u32 %v1187_v6, 5  ;;  %v1201_v41 = vshll.u32 %v5130_v7, %v1189_v12 }
 0x16b   : > { %v1193_v1 = vshrl.u32 %v5133_v25, %v1190_v4  ;;  %v1196_v18 = vshrl.u32 %v5134_v46, %v1190_v4  ;;  %v1199_v61 = vshrl.u32 %v5130_v7, %v1190_v4  ;;  %v1202_v3 = vshrl.u32 %v5132_v60, %v1190_v4 }
 0x16c   : > { %v3552_v23 = vshrl.u32 %v1132_v57, 30  ;;  %v937_v8 = vshrl.u32 %v919_v19, %v935_v45  ;;  %v941_v50 = vshll.u32 %v940_v29, 23  ;;  %v1223_v28 = vshll.u32 %v1183_v24, 8 }
 0x16d   : > { %v1194_v59 = vor.u32 %v1193_v1, %v1192_v10  ;;  %v1197_v33 = vor.u32 %v1196_v18, %v1195_v2  ;;  %v1200_v9 = vor.u32 %v1199_v61, %v1198_v11  ;;  %v1203_v13 = vor.u32 %v1202_v3, %v1201_v41 }
 0x16e   : > { %5146 = vst [vmem:[#allocation35_spill] sm:$0xff] %v3552_v23  ;;  %v1134_v43 = vshll.u32 %v3552_v23, 30  ;;  %v2616_v56 = vadd.s32 4294967294, %v1035_v55  ;;  %v1204_v22 = vshll.u32 %v5132_v60, %v1189_v12  ;;  %v1205_v57 = vshrl.u32 %v5127_v58, %v1190_v4 }
 0x16f   : > { %v1283_v21 = vshrl.u32 %v1282_v51, 23  ;;  %vm1207_vm12 = vcmp.lt.s32.totalorder %v1188_v17, 1  ;;  %vm1209_vm13 = vcmp.lt.s32.totalorder %v1188_v17, 3  ;;  %vm1210_vm14 = vcmp.lt.s32.totalorder %v1188_v17, 4 }
 0x170   : > { %v3559_v6 = vsub.s32 %v1131_v39, %v1134_v43  ;;  %v1206_v19 = vor.u32 %v1205_v57, %v1204_v22  ;;  %v1212_v45 = vsel %vm1210_vm14, %v1200_v9, 2102212464  ;;  %v1215_v10 = vsel %vm1207_vm12, %v1194_v59, %v1197_v33 }
 0x171   : > { %v1216_v29 = vsel %vm1210_vm14, %v1203_v13, 920167782  ;;  %v1191_v24 = vshrl.u32 %v5129_v15, %v1190_v4  ;;  %vm1208_vm15 = vcmp.lt.s32.totalorder %v1188_v17, 2  ;;  %vm2617_vm0 = vcmp.lt.s32.totalorder %v2616_v56, 0 }
 0x172   : > { %v1137_v2 = vsub.s32 0, %v3559_v6  ;;  %v1217_v12 = vsel %vm1209_vm13, %v1200_v9, %v1216_v29  ;;  %v1219_v39 = vsel %vm1207_vm12, %v1197_v33, %v1200_v9  ;;  %v1220_v43 = vsel %vm1210_vm14, %v1206_v19, 1326507024 }
 0x173   : > { %v1218_v55 = vsel %vm1208_vm15, %v1215_v10, %v1217_v12  ;;  %v1211_v22 = vsel %vm1207_vm12, %v1191_v24, %v1194_v59  ;;  %v1213_v1 = vsel %vm1209_vm13, %v1197_v33, %v1212_v45  ;;  %v1221_v18 = vsel %vm1209_vm13, %v1203_v13, %v1220_v43 }
 0x174   : > { %v2619_v51 = vmin.u32 %v1137_v2, %v3559_v6  ;;  %v1222_v11 = vsel %vm1208_vm15, %v1219_v39, %v1221_v18  ;;  %v3572_v4 = vmul.u32.u64.low %v1223_v28, %v1218_v55  ;;  %v3573_v61 = vmul.u32.u64.high %v1223_v28, %v1218_v55, %v3572_v4 }
 0x175   : > { %v2626_v41 = vadd.s32 4294967169, %v1283_v21  ;;  %v3576_v3 = vsel %vm2617_vm0, 0, %v2616_v56  ;;  %v3578_v9 = vmul.u32.u64.low %v1223_v28, %v1222_v11  ;;  %v3579_v19 = vmul.u32.u64.high %v1223_v28, %v1222_v11, %v3578_v9 }
 0x176   : > { %v1139_v57 = vclz %v2619_v51  ;;  %v3581_v10 = vmul.f32 %v841_v44, %v839_v63  ;;  %v3583_v59 = vor.u32 4788187, %v941_v50  ;;  %v1214_v33 = vsel %vm1208_vm15, %v1211_v22, %v1213_v1  ;;  %v3595_v63 = vpop.f32.mrb[29].mxu0 }
 0x177   : > { %v1289_v13 = vadd.s32 1, %v2626_v41  ;;  %v936_v45 = vshll.u32 %v3406_v20, %v3510_v54  ;;  %v1023_v29 = vadd.s32 %v3426_v34, %v3424_v36  ;;  %v5147_v56 = vand.u32 2147483647, %v3530_v49  ;;  %5148 = vst [vmem:[#allocation36_spill] sm:$0xff] %v3595_v63 }
 0x178   : > { %v2620_v21 = vadd.s32 4294967294, %v1139_v57  ;;  %v1039_v24 = vsub.s32 32, %v3576_v3  ;;  %v1043_v44 = vsub.s32 4294967266, %v3576_v3  ;;  %v1233_v50 = vadd.s32 1, %v3573_v61 }
 0x179   : > { %v1286_v2 = vand.u32 8388607, %v5147_v56  ;;  %vm1290_vm1 = vcmp.gt.s32.totalorder %v1289_v13, 0  ;;  %v3597_v17 = vor.u32 %v937_v8, %v936_v45  ;;  %v1230_v12 = vmul.u32 %v1223_v28, %v1214_v33  ;;  %v3613_v8 = vpop.f32.mrb[30].mxu0 }
 0x17a   : > { %vm1232_vm2 = vc.u32 %v3579_v19, %v3572_v4  ;;  %v1291_v20 = vsel %vm1290_vm1, %v1289_v13, 0  ;;  %vm2621_vm3 = vcmp.lt.s32.totalorder %v2620_v21, 0  ;;  %v1040_v55 = vshll.u32 %v3489_v48, %v3576_v3 }
 0x17b   : > { %v1234_v34 = vsel %vm1232_vm2, %v1233_v50, %v3573_v61  ;;  %v1293_v54 = vand.u32 31, %v1291_v20  ;;  %v3607_v43 = vadd.f32 %v3213_v40, %v3118_v35  ;;  %v3611_v28 = vadd.f32 %v3236_v31, %v3118_v35 }
 0x17c   : > { %v1235_v39 = vadd.s32 %v1234_v34, %v1230_v12  ;;  %v1041_v51 = vshrl.u32 %v1023_v29, %v1039_v24  ;;  %v1044_v22 = vadd.s32 127, %v1043_v44  ;;  %v1287_v1 = vor.u32 8388608, %v1286_v2 }
 0x17d   : > { %v1294_v18 = vsub.s32 32, %v1293_v54  ;;  %v3615_v11 = vsel %vm2621_vm3, 0, %v2620_v21  ;;  %v1296_v48 = vshll.u32 %v5129_v15, %v1293_v54  ;;  %v1299_v41 = vshll.u32 %v5133_v25, %v1293_v54 }
 0x17e   : > { %v1236_v61 = vadd.s32 536870912, %v1235_v39  ;;  %v1302_v31 = vshll.u32 %v5134_v46, %v1293_v54  ;;  %v1292_v33 = vshrl.u32 %v1291_v20, 5  ;;  %v1305_v13 = vshll.u32 %v5130_v7, %v1293_v54 }
 0x17f   : > { %v1297_v40 = vshrl.u32 %v5133_v25, %v1294_v18  ;;  %v1300_v3 = vshrl.u32 %v5134_v46, %v1294_v18  ;;  %v1303_v57 = vshrl.u32 %v5130_v7, %v1294_v18  ;;  %v1306_v45 = vshrl.u32 %v5132_v60, %v1294_v18 }
 0x180   : > { %v3623_v9 = vshrl.u32 %v1236_v61, 30  ;;  %v1045_v29 = vshll.u32 %v1044_v22, 23  ;;  %v1386_v12 = vand.u32 2139095040, %v3607_v43  ;;  %v1147_v34 = vsub.s32 4294967266, %v3615_v11 }
 0x181   : > { %v1298_v21 = vor.u32 %v1297_v40, %v1296_v48  ;;  %v1301_v56 = vor.u32 %v1300_v3, %v1299_v41  ;;  %v1304_v2 = vor.u32 %v1303_v57, %v1302_v31  ;;  %v1307_v44 = vor.u32 %v1306_v45, %v1305_v13  ;;  %v3639_v57 = vpop.f32.mrb[31].mxu0 }
 0x182   : > { %5149 = vst [vmem:[#allocation37_spill] sm:$0xff] %v3623_v9  ;;  %v1238_v24 = vshll.u32 %v3623_v9, 30  ;;  %v1308_v61 = vshll.u32 %v5132_v60, %v1293_v54  ;;  %v1309_v20 = vshrl.u32 %v5127_v58, %v1294_v18  ;;  %v1327_v36 = vshll.u32 %v1287_v1, 8  ;;  %5150 = vst [vmem:[#allocation38_spill] sm:$0xff] %v3639_v57 }
 0x183   : > { %vm1311_vm5 = vcmp.lt.s32.totalorder %v1292_v33, 1  ;;  %vm1313_vm6 = vcmp.lt.s32.totalorder %v1292_v33, 3  ;;  %vm1314_vm7 = vcmp.lt.s32.totalorder %v1292_v33, 4  ;;  %v1143_v3 = vsub.s32 32, %v3615_v11 }
 0x184   : > { %v3633_v63 = vsub.s32 %v1235_v39, %v1238_v24  ;;  %v1310_v22 = vor.u32 %v1309_v20, %v1308_v61  ;;  %v1316_v48 = vsel %vm1314_vm7, %v1304_v2, 2102212464  ;;  %v1319_v41 = vsel %vm1311_vm5, %v1298_v21, %v1301_v56 }
 0x185   : > { %v1320_v40 = vsel %vm1314_vm7, %v1307_v44, 920167782  ;;  %v1295_v31 = vshrl.u32 %v5129_v15, %v1294_v18  ;;  %vm1312_vm8 = vcmp.lt.s32.totalorder %v1292_v33, 2  ;;  %v1148_v1 = vadd.s32 127, %v1147_v34 }
 0x186   : > { %v1321_v54 = vsel %vm1313_vm6, %v1304_v2, %v1320_v40  ;;  %v1323_v13 = vsel %vm1311_vm5, %v1301_v56, %v1304_v2  ;;  %v1324_v45 = vsel %vm1314_vm7, %v1310_v22, 1326507024  ;;  %v1241_v24 = vsub.s32 0, %v3633_v63 }
 0x187   : > { %v1322_v39 = vsel %vm1312_vm8, %v1319_v41, %v1321_v54  ;;  %v1315_v61 = vsel %vm1311_vm5, %v1295_v31, %v1298_v21  ;;  %v1317_v20 = vsel %vm1313_vm6, %v1301_v56, %v1316_v48  ;;  %v1325_v50 = vsel %vm1313_vm6, %v1307_v44, %v1324_v45 }
 0x188   : > { %vm553_vm9 = vcmp.lt.s32.totalorder %v3121_v37, 0  ;;  %vm657_vm10 = vcmp.lt.s32.totalorder %v3127_v42, 0  ;;  %v1326_v18 = vsel %vm1312_vm8, %v1323_v13, %v1325_v50  ;;  %v1387_v2 = vshrl.u32 %v1386_v12, 23 }
 0x189   : > { %v3650_v34 = vmul.u32.u64.low %v1327_v36, %v1322_v39  ;;  %v3651_v40 = vmul.u32.u64.high %v1327_v36, %v1322_v39, %v3650_v34  ;;  %v1042_v22 = vor.u32 %v1041_v51, %v1040_v55  ;;  %v1127_v41 = vadd.s32 %v3504_v52, %v3513_v53 }
 0x18a   : > { %v3656_v21 = vmul.u32.u64.low %v1327_v36, %v1326_v18  ;;  %v3657_v31 = vmul.u32.u64.high %v1327_v36, %v1326_v18, %v3656_v21  ;;  %v1046_v56 = vor.u32 4788187, %v1045_v29  ;;  %v1318_v44 = vsel %vm1312_vm8, %v1315_v61, %v1317_v20 }
 0x18b   : > { %v2630_v48 = vadd.s32 4294967169, %v1387_v2  ;;  %v1490_v54 = vand.u32 2139095040, %v3611_v28  ;;  %v945_v50 = vcvt.s32.f32 %v3597_v17  ;;  %v1145_v13 = vshrl.u32 %v1127_v41, %v1143_v3 }
 0x18c   : > { %v1149_v39 = vshll.u32 %v1148_v1, 23  ;;  %v5151_v45 = vand.u32 2147483647, %v3607_v43  ;;  %v2623_v55 = vmin.u32 %v1241_v24, %v3633_v63  ;;  %v1337_v52 = vadd.s32 1, %v3651_v40 }
 0x18d   : > { %v1393_v53 = vadd.s32 1, %v2630_v48  ;;  %v1491_v51 = vshrl.u32 %v1490_v54, 23  ;;  %v5152_v29 = vand.u32 2147483647, %v3583_v59  ;;  %v1144_v61 = vshll.u32 %v3559_v6, %v3615_v11 }
 0x18e   : > { %v1390_v12 = vand.u32 8388607, %v5151_v45  ;;  %v1334_v20 = vmul.u32 %v1327_v36, %v1318_v44  ;;  %vm1336_vm11 = vc.u32 %v3657_v31, %v3650_v34  ;;  %v1047_v17 = vand.u32 2147483647, %v1046_v56 }
 0x18f   : > { %v3668_v33 = vmul.f32 %v945_v50, %v5152_v29  ;;  %v1049_v3 = vcvt.s32.f32 %v1042_v22  ;;  %v1338_v1 = vsel %vm1336_vm11, %v1337_v52, %v3651_v40  ;;  %vm1394_vm12 = vcmp.gt.s32.totalorder %v1393_v53, 0 }
 0x190   : > { %v3675_v24 = vor.u32 %v1145_v13, %v1144_v61  ;;  %v3677_v18 = vor.u32 4788187, %v1149_v39  ;;  %v1339_v2 = vadd.s32 %v1338_v1, %v1334_v20  ;;  %v5066_v59 = vand.u32 2147483647, %v3611_v28 }
 0x191   : > { %v1243_v41 = vclz %v2623_v55  ;;  %v1391_v21 = vor.u32 8388608, %v1390_v12  ;;  %v1395_v48 = vsel %vm1394_vm12, %v1393_v53, 0  ;;  %v2634_v6 = vadd.s32 4294967169, %v1491_v51 }
 0x192   : > { %v5153_v36 = vor.u32 %v3440_v14, %v3436_v38  ;;  %v5154_v40 = vxor.u32 2147483648, %v3462_v30  ;;  %v5155_v56 = vxor.u32 2147483648, %v3508_v26  ;;  %v1340_v54 = vadd.s32 536870912, %v1339_v2 }
 0x193   : > { %v843_v38 = vxor.u32 2147483648, %v3581_v10  ;;  %v947_v14 = vxor.u32 2147483648, %v3668_v33  ;;  %v3703_v50 = vmul.f32 %v1049_v3, %v1047_v17  ;;  %v1397_v13 = vand.u32 31, %v1395_v48 }
 0x194   : > { %v3685_v11 = vsel %vm482_vm4, %v5153_v36, 1326507024  ;;  %v3692_v22 = vsel %vm553_vm9, %v5154_v40, %v3462_v30  ;;  %v3699_v44 = vsel %vm657_vm10, %v5155_v56, %v3508_v26  ;;  %v1151_v39 = vand.u32 2147483647, %v3677_v18 }
 0x195   : > { %5156 = vst [vmem:[#allocation39_spill] sm:$0xff] %v3699_v44  ;;  %v1153_v30 = vcvt.s32.f32 %v3675_v24  ;;  %v3707_v45 = vshrl.u32 %v1340_v54, 30  ;;  %v3711_v12 = vand.u32 8388607, %v5066_v59  ;;  %v2624_v26 = vadd.s32 4294967294, %v1243_v41 }
 0x196   : > { %v1398_v55 = vsub.s32 32, %v1397_v13  ;;  %v3713_v52 = vshll.u32 %v1391_v21, 8  ;;  %v1497_v53 = vadd.s32 1, %v2634_v6  ;;  %v1396_v29 = vshrl.u32 %v1395_v48, 5 }
 0x197   : > { %5157 = vst [vmem:[#allocation40_spill] sm:$0xff] %v3707_v45  ;;  %v1342_v51 = vshll.u32 %v3707_v45, 30  ;;  %v1400_v61 = vshll.u32 %v5129_v15, %v1397_v13  ;;  %v1403_v20 = vshll.u32 %v5133_v25, %v1397_v13  ;;  %v1406_v1 = vshll.u32 %v5134_v46, %v1397_v13 }
 0x198   : > { %v1401_v17 = vshrl.u32 %v5133_v25, %v1398_v55  ;;  %v1404_v3 = vshrl.u32 %v5134_v46, %v1398_v55  ;;  %v1407_v24 = vshrl.u32 %v5130_v7, %v1398_v55  ;;  %v1409_v41 = vshll.u32 %v5130_v7, %v1397_v13 }
 0x199   : > { %v3722_v18 = vsub.s32 %v1339_v2, %v1342_v51  ;;  %v1410_v21 = vshrl.u32 %v5132_v60, %v1398_v55  ;;  %v1412_v48 = vshll.u32 %v5132_v60, %v1397_v13  ;;  %vm761_vm13 = vcmp.lt.s32.totalorder %v3153_v0, 0 }
 0x19a   : > { %vm865_vm14 = vcmp.lt.s32.totalorder %v3255_v16, 0  ;;  %v1402_v6 = vor.u32 %v1401_v17, %v1400_v61  ;;  %v1405_v36 = vor.u32 %v1404_v3, %v1403_v20  ;;  %v1408_v40 = vor.u32 %v1407_v24, %v1406_v1 }
 0x19b   : > { %v1413_v56 = vshrl.u32 %v5127_v58, %v1398_v55  ;;  %vm2625_vm15 = vcmp.lt.s32.totalorder %v2624_v26, 0  ;;  %v1345_v54 = vsub.s32 0, %v3722_v18  ;;  %v1411_v2 = vor.u32 %v1410_v21, %v1409_v41 }
 0x19c   : > { %v1495_v51 = vor.u32 8388608, %v3711_v12  ;;  %vm1415_vm0 = vcmp.lt.s32.totalorder %v1396_v29, 1  ;;  %vm1418_vm1 = vcmp.lt.s32.totalorder %v1396_v29, 4  ;;  %vm1498_vm2 = vcmp.gt.s32.totalorder %v1497_v53, 0 }
 0x19d   : > { %v1414_v59 = vor.u32 %v1413_v56, %v1412_v48  ;;  %v2627_v13 = vmin.u32 %v1345_v54, %v3722_v18  ;;  %v1399_v57 = vshrl.u32 %v5129_v15, %v1398_v55  ;;  %v1420_v45 = vsel %vm1418_vm1, %v1408_v40, 2102212464 }
 0x19e   : > { %v1423_v61 = vsel %vm1415_vm0, %v1402_v6, %v1405_v36  ;;  %vm1417_vm3 = vcmp.lt.s32.totalorder %v1396_v29, 3  ;;  %v1424_v20 = vsel %vm1418_vm1, %v1411_v2, 920167782  ;;  %v1427_v17 = vsel %vm1415_vm0, %v1405_v36, %v1408_v40 }
 0x19f   : > { %v1428_v3 = vsel %vm1418_vm1, %v1414_v59, 1326507024  ;;  %v3735_v1 = vsel %vm2625_vm15, 0, %v2624_v26  ;;  %vm1416_vm5 = vcmp.lt.s32.totalorder %v1396_v29, 2  ;;  %v1419_v24 = vsel %vm1415_vm0, %v1399_v57, %v1402_v6 }
 0x1a0   : > { %v1425_v12 = vsel %vm1417_vm3, %v1408_v40, %v1424_v20  ;;  %v1421_v41 = vsel %vm1417_vm3, %v1405_v36, %v1420_v45  ;;  %v1429_v48 = vsel %vm1417_vm3, %v1411_v2, %v1428_v3  ;;  %v1499_v56 = vsel %vm1498_vm2, %v1497_v53, 0 }
 0x1a1   : > { %v1426_v21 = vsel %vm1416_vm5, %v1423_v61, %v1425_v12  ;;  %v1347_v54 = vclz %v2627_v13  ;;  %v1430_v55 = vsel %vm1416_vm5, %v1427_v17, %v1429_v48  ;;  %v1501_v57 = vand.u32 31, %v1499_v56 }
 0x1a2   : > { %v3741_v9 = vmul.u32.u64.low %v3713_v52, %v1426_v21  ;;  %v3742_v23 = vmul.u32.u64.high %v3713_v52, %v1426_v21, %v3741_v9  ;;  %v3746_v59 = vmul.u32.u64.low %v3713_v52, %v1430_v55  ;;  %v3747_v26 = vmul.u32.u64.high %v3713_v52, %v1430_v55, %v3746_v59 }
 0x1a3   : > { %v3751_v45 = vadd.f32 %v3280_v27, %v3118_v35  ;;  %v3756_v53 = vsel %vm761_vm13, %v843_v38, %v3581_v10  ;;  %v3761_v6 = vsel %vm865_vm14, %v947_v14, %v3668_v33  ;;  %v1422_v40 = vsel %vm1416_vm5, %v1419_v24, %v1421_v41 }
 0x1a4   : > { %5158 = vst [vmem:[#allocation41_spill] sm:$0xff] %v3756_v53  ;;  %5159 = vst [vmem:[#allocation42_spill] sm:$0xff] %v3761_v6  ;;  %v3765_v2 = vmul.f32 %v1153_v30, %v1151_v39  ;;  %v3769_v27 = vadd.s32 %v3572_v4, %v3579_v19  ;;  %v1502_v61 = vsub.s32 32, %v1501_v57  ;;  %v1251_v10 = vsub.s32 4294967266, %v3735_v1 }
 0x1a5   : > { %v2628_v38 = vadd.s32 4294967294, %v1347_v54  ;;  %v1441_v20 = vadd.s32 1, %v3742_v23  ;;  %v3774_v33 = vshll.u32 %v1495_v51, 8  ;;  %v1438_v14 = vmul.u32 %v3713_v52, %v1422_v40 }
 0x1a6   : > { %vm1440_vm6 = vc.u32 %v3747_v26, %v3741_v9  ;;  %v1505_v39 = vshrl.u32 %v5133_v25, %v1502_v61  ;;  %v1594_v4 = vand.u32 2139095040, %v3751_v45  ;;  %v1504_v30 = vshll.u32 %v5129_v15, %v1501_v57 }
 0x1a7   : > { %v1442_v19 = vsel %vm1440_vm6, %v1441_v20, %v3742_v23  ;;  %v1507_v29 = vshll.u32 %v5133_v25, %v1501_v57  ;;  %v1508_v17 = vshrl.u32 %v5134_v46, %v1502_v61  ;;  %v1510_v51 = vshll.u32 %v5134_v46, %v1501_v57 }
 0x1a8   : > { %v1443_v3 = vadd.s32 %v1442_v19, %v1438_v14  ;;  %v1511_v52 = vshrl.u32 %v5130_v7, %v1502_v61  ;;  %vm2629_vm7 = vcmp.lt.s32.totalorder %v2628_v38, 0  ;;  %v1500_v12 = vshrl.u32 %v1499_v56, 5 }
 0x1a9   : > { %v1506_v41 = vor.u32 %v1505_v39, %v1504_v30  ;;  %v1509_v21 = vor.u32 %v1508_v17, %v1507_v29  ;;  %v1513_v23 = vshll.u32 %v5130_v7, %v1501_v57  ;;  %v1514_v55 = vshrl.u32 %v5132_v60, %v1502_v61 }
 0x1aa   : > { %v1444_v48 = vadd.s32 536870912, %v1443_v3  ;;  %v1512_v54 = vor.u32 %v1511_v52, %v1510_v51  ;;  %v1252_v59 = vadd.s32 127, %v1251_v10  ;;  %v1516_v40 = vshll.u32 %v5132_v60, %v1501_v57 }
 0x1ab   : > { %v1517_v20 = vshrl.u32 %v5127_v58, %v1502_v61  ;;  %v1595_v14 = vshrl.u32 %v1594_v4, 23  ;;  %v1350_v19 = vsel %vm2629_vm7, 0, %v2628_v38  ;;  %v1503_v24 = vshrl.u32 %v5129_v15, %v1502_v61 }
 0x1ac   : > { %v3792_v36 = vshrl.u32 %v1444_v48, 30  ;;  %v1515_v56 = vor.u32 %v1514_v55, %v1513_v23  ;;  %vm1519_vm8 = vcmp.lt.s32.totalorder %v1500_v12, 1  ;;  %vm1521_vm11 = vcmp.lt.s32.totalorder %v1500_v12, 3 }
 0x1ad   : > { %v1518_v39 = vor.u32 %v1517_v20, %v1516_v40  ;;  %vm1522_vm12 = vcmp.lt.s32.totalorder %v1500_v12, 4  ;;  %v1527_v17 = vsel %vm1519_vm8, %v1506_v41, %v1509_v21  ;;  %v1351_v51 = vsub.s32 32, %v1350_v19 }
 0x1ae   : > { %5160 = vst [vmem:[#allocation43_spill] sm:$0xff] %v3792_v36  ;;  %v1446_v30 = vshll.u32 %v3792_v36, 30  ;;  %v1524_v29 = vsel %vm1522_vm12, %v1512_v54, 2102212464  ;;  %v1528_v10 = vsel %vm1522_vm12, %v1515_v56, 920167782  ;;  %v1531_v4 = vsel %vm1519_vm8, %v1509_v21, %v1512_v54 }
 0x1af   : > { %vm1520_vm15 = vcmp.lt.s32.totalorder %v1500_v12, 2  ;;  %v1529_v57 = vsel %vm1521_vm11, %v1512_v54, %v1528_v10  ;;  %vm969_vm0 = vcmp.lt.s32.totalorder %v3276_v62, 0  ;;  %v1523_v61 = vsel %vm1519_vm8, %v1503_v24, %v1506_v41 }
 0x1b0   : > { %v3798_v38 = vsub.s32 %v1443_v3, %v1446_v30  ;;  %v1530_v52 = vsel %vm1520_vm15, %v1527_v17, %v1529_v57  ;;  %v1532_v48 = vsel %vm1522_vm12, %v1518_v39, 1326507024  ;;  %v1525_v23 = vsel %vm1521_vm11, %v1509_v21, %v1524_v29 }
 0x1b1   : > { %v1533_v55 = vsel %vm1521_vm11, %v1515_v56, %v1532_v48  ;;  %v3804_v40 = vmul.u32.u64.low %v3774_v33, %v1530_v52  ;;  %v3805_v20 = vmul.u32.u64.high %v3774_v33, %v1530_v52, %v3804_v40  ;;  %v1355_v13 = vsub.s32 4294967266, %v1350_v19 }
 0x1b2   : > { %v1449_v54 = vsub.s32 0, %v3798_v38  ;;  %v1534_v10 = vsel %vm1520_vm15, %v1531_v4, %v1533_v55  ;;  %v2638_v3 = vadd.s32 4294967169, %v1595_v14  ;;  %v1248_v24 = vshll.u32 %v3633_v63, %v3735_v1 }
 0x1b3   : > { %v1335_v41 = vadd.s32 %v3650_v34, %v3657_v31  ;;  %v3815_v21 = vmul.u32.u64.low %v3774_v33, %v1534_v10  ;;  %v3816_v56 = vmul.u32.u64.high %v3774_v33, %v1534_v10, %v3815_v21  ;;  %v1526_v30 = vsel %vm1520_vm15, %v1523_v61, %v1525_v23 }
 0x1b4   : > { %v2631_v39 = vmin.u32 %v1449_v54, %v3798_v38  ;;  %v1601_v29 = vadd.s32 1, %v2638_v3  ;;  %v3822_v17 = vadd.f32 %v3341_v5, %v3118_v35  ;;  %v5161_v14 = vsub.s32 32, %v3735_v1 }
 0x1b5   : > { %v1253_v57 = vshll.u32 %v1252_v59, 23  ;;  %v1545_v34 = vadd.s32 1, %v3805_v20  ;;  %v5162_v31 = vand.u32 2147483647, %v3751_v45  ;;  %v1353_v52 = vshrl.u32 %v1335_v41, %v1351_v51 }
 0x1b6   : > { %v1249_v63 = vshrl.u32 %v3769_v27, %v5161_v14  ;;  %v1356_v48 = vadd.s32 127, %v1355_v13  ;;  %v1451_v55 = vclz %v2631_v39  ;;  %vm1602_vm1 = vcmp.gt.s32.totalorder %v1601_v29, 0 }
 0x1b7   : > { %v1598_v4 = vand.u32 8388607, %v5162_v31  ;;  %v1352_v12 = vshll.u32 %v3722_v18, %v1350_v19  ;;  %v1542_v61 = vmul.u32 %v3774_v33, %v1526_v30  ;;  %vm1544_vm2 = vc.u32 %v3816_v56, %v3804_v40 }
 0x1b8   : > { %v1603_v5 = vsel %vm1602_vm1, %v1601_v29, 0  ;;  %v2632_v1 = vadd.s32 4294967294, %v1451_v55  ;;  %v1546_v27 = vsel %vm1544_vm2, %v1545_v34, %v3805_v20  ;;  %v1698_v23 = vand.u32 2139095040, %v3822_v17 }
 0x1b9   : > { %v1605_v59 = vand.u32 31, %v1603_v5  ;;  %v5163_v51 = vxor.u32 2147483648, %v3703_v50  ;;  %v3844_v33 = vor.u32 %v1249_v63, %v1248_v24  ;;  %v1547_v19 = vadd.s32 %v1546_v27, %v1542_v61 }
 0x1ba   : > { %v3846_v54 = vor.u32 4788187, %v1253_v57  ;;  %v3848_v10 = vor.u32 %v1353_v52, %v1352_v12  ;;  %v1357_v20 = vshll.u32 %v1356_v48, 23  ;;  %vm2633_vm3 = vcmp.lt.s32.totalorder %v2632_v1, 0 }
 0x1bb   : > { %v3841_v13 = vsel %vm969_vm0, %v5163_v51, %v3703_v50  ;;  %v1606_v3 = vsub.s32 32, %v1605_v59  ;;  %v1548_v41 = vadd.s32 536870912, %v1547_v19  ;;  %v1599_v21 = vor.u32 8388608, %v1598_v4 }
 0x1bc   : > { %5164 = vst [vmem:[#allocation44_spill] sm:$0xff] %v3841_v13  ;;  %v1608_v30 = vshll.u32 %v5129_v15, %v1605_v59  ;;  %v1611_v50 = vshll.u32 %v5133_v25, %v1605_v59  ;;  %v1614_v29 = vshll.u32 %v5134_v46, %v1605_v59  ;;  %v1699_v24 = vshrl.u32 %v1698_v23, 23 }
 0x1bd   : > { %v3854_v14 = vshrl.u32 %v1548_v41, 30  ;;  %v1609_v63 = vshrl.u32 %v5133_v25, %v1606_v3  ;;  %v1612_v57 = vshrl.u32 %v5134_v46, %v1606_v3  ;;  %v1615_v34 = vshrl.u32 %v5130_v7, %v1606_v3 }
 0x1be   : > { %v3859_v31 = vsel %vm2633_vm3, 0, %v2632_v1  ;;  %v1604_v4 = vshrl.u32 %v1603_v5, 5  ;;  %v1617_v52 = vshll.u32 %v5130_v7, %v1605_v59  ;;  %v1618_v48 = vshrl.u32 %v5132_v60, %v1606_v3 }
 0x1bf   : > { %5165 = vst [vmem:[#allocation45_spill] sm:$0xff] %v3854_v14  ;;  %v1550_v55 = vshll.u32 %v3854_v14, 30  ;;  %v1610_v12 = vor.u32 %v1609_v63, %v1608_v30  ;;  %v1613_v61 = vor.u32 %v1612_v57, %v1611_v50  ;;  %v1616_v27 = vor.u32 %v1615_v34, %v1614_v29 }
 0x1c0   : > { %v3864_v23 = vor.u32 4788187, %v1357_v20  ;;  %v1619_v51 = vor.u32 %v1618_v48, %v1617_v52  ;;  %v1620_v41 = vshll.u32 %v5132_v60, %v1605_v59  ;;  %v1621_v18 = vshrl.u32 %v5127_v58, %v1606_v3 }
 0x1c1   : > { %v3868_v39 = vsub.s32 %v1547_v19, %v1550_v55  ;;  %v1639_v1 = vshll.u32 %v1599_v21, 8  ;;  %v2642_v5 = vadd.s32 4294967169, %v1699_v24  ;;  %v5166_v36 = vand.u32 2147483647, %v3822_v17  ;;  %v5167_v24 = vld [vmem:[#allocation24_spill] sm:$0xff] }
 0x1c2   : > { %v1455_v62 = vsub.s32 32, %v3859_v31  ;;  %v1622_v14 = vor.u32 %v1621_v18, %v1620_v41  ;;  %vm1623_vm5 = vcmp.lt.s32.totalorder %v1604_v4, 1  ;;  %vm1626_vm6 = vcmp.lt.s32.totalorder %v1604_v4, 4 }
 0x1c3   : > { %v1702_v13 = vand.u32 8388607, %v5166_v36  ;;  %v1459_v20 = vsub.s32 4294967266, %v3859_v31  ;;  %v1553_v30 = vsub.s32 0, %v3868_v39  ;;  %v1628_v50 = vsel %vm1626_vm6, %v1616_v27, 2102212464 }
 0x1c4   : > { %v1631_v59 = vsel %vm1623_vm5, %v1610_v12, %v1613_v61  ;;  %v1607_v29 = vshrl.u32 %v5129_v15, %v1606_v3  ;;  %vm1625_vm7 = vcmp.lt.s32.totalorder %v1604_v4, 3  ;;  %v1632_v19 = vsel %vm1626_vm6, %v1619_v51, 920167782 }
 0x1c5   : > { %v1635_v21 = vsel %vm1623_vm5, %v1613_v61, %v1616_v27  ;;  %vm1073_vm8 = vcmp.lt.s32.totalorder %v5167_v24, 0  ;;  %v2635_v36 = vmin.u32 %v1553_v30, %v3868_v39  ;;  %vm1624_vm11 = vcmp.lt.s32.totalorder %v1604_v4, 2 }
 0x1c6   : > { %v1633_v63 = vsel %vm1625_vm7, %v1616_v27, %v1632_v19  ;;  %v1636_v18 = vsel %vm1626_vm6, %v1622_v14, 1326507024  ;;  %v1627_v57 = vsel %vm1623_vm5, %v1607_v29, %v1610_v12  ;;  %v1629_v34 = vsel %vm1625_vm7, %v1613_v61, %v1628_v50  ;;  %v5168_v12 = vld [vmem:[#allocation27_spill] sm:$0xff] }
 0x1c7   : > { %v1634_v52 = vsel %vm1624_vm11, %v1631_v59, %v1633_v63  ;;  %v1637_v48 = vsel %vm1625_vm7, %v1619_v51, %v1636_v18  ;;  %v1555_v55 = vclz %v2635_v36  ;;  %v1460_v3 = vadd.s32 127, %v1459_v20 }
 0x1c8   : > { %v1638_v41 = vsel %vm1624_vm11, %v1635_v21, %v1637_v48  ;;  %v3878_v6 = vmul.u32.u64.low %v1639_v1, %v1634_v52  ;;  %v3879_v16 = vmul.u32.u64.high %v1639_v1, %v1634_v52, %v3878_v6  ;;  %v1705_v44 = vadd.s32 1, %v2642_v5 }
 0x1c9   : > { %v3882_v53 = vmul.u32.u64.low %v1639_v1, %v1638_v41  ;;  %v3883_v0 = vmul.u32.u64.high %v1639_v1, %v1638_v41, %v3882_v53  ;;  %v1257_v30 = vcvt.s32.f32 %v3844_v33  ;;  %v1439_v14 = vadd.s32 %v3741_v9, %v3747_v26 }
 0x1ca   : > { %v1630_v4 = vsel %vm1624_vm11, %v1627_v57, %v1629_v34  ;;  %v3890_v61 = vadd.f32 %v5168_v12, %v3118_v35  ;;  %v1255_v27 = vand.u32 2147483647, %v3846_v54  ;;  %v1361_v51 = vcvt.s32.f32 %v3848_v10 }
 0x1cb   : > { %v2636_v50 = vadd.s32 4294967294, %v1555_v55  ;;  %vm1706_vm12 = vcmp.gt.s32.totalorder %v1705_v44, 0  ;;  %v1359_v20 = vand.u32 2147483647, %v3864_v23  ;;  %v1457_v53 = vshrl.u32 %v1439_v14, %v1455_v62 }
 0x1cc   : > { %v1649_v5 = vadd.s32 1, %v3879_v16  ;;  %v1707_v33 = vsel %vm1706_vm12, %v1705_v44, 0  ;;  %v1461_v59 = vshll.u32 %v1460_v3, 23  ;;  %v1646_v29 = vmul.u32 %v1639_v1, %v1630_v4 }
 0x1cd   : > { %vm1648_vm15 = vc.u32 %v3883_v0, %v3878_v6  ;;  %v1703_v9 = vor.u32 8388608, %v1702_v13  ;;  %v1456_v26 = vshll.u32 %v3798_v38, %v3859_v31  ;;  %v3901_v10 = vshrl.u32 %v1707_v33, 5 }
 0x1ce   : > { %v1650_v54 = vsel %vm1648_vm15, %v1649_v5, %v3879_v16  ;;  %v1802_v19 = vand.u32 2139095040, %v3890_v61  ;;  %v5169_v62 = vxor.u32 2147483648, %v3765_v2  ;;  %vm2637_vm1 = vcmp.lt.s32.totalorder %v2636_v50, 0 }
 0x1cf   : > { %v1651_v23 = vadd.s32 %v1650_v54, %v1646_v29  ;;  %v1709_v1 = vand.u32 31, %v1707_v33  ;;  %v3911_v13 = vmul.f32 %v1257_v30, %v1255_v27  ;;  %v3913_v21 = vmul.f32 %v1361_v51, %v1359_v20 }
 0x1d0   : > { %v3909_v44 = vsel %vm1073_vm8, %v5169_v62, %v3765_v2  ;;  %v1458_v38 = vor.u32 %v1457_v53, %v1456_v26  ;;  %v5083_v16 = vand.u32 2147483647, %v3890_v61  ;;  %v1462_v31 = vor.u32 4788187, %v1461_v59 }
 0x1d1   : > { %v1652_v36 = vadd.s32 536870912, %v1651_v23  ;;  %v1710_v63 = vsub.s32 32, %v1709_v1  ;;  %v3916_v18 = vshll.u32 %v1703_v9, 8  ;;  %v3918_v57 = vsel %vm2637_vm1, 0, %v2636_v50 }
 0x1d2   : > { %v1712_v2 = vshll.u32 %v5129_v15, %v1709_v1  ;;  %vm1727_vm2 = vcmp.lt.s32.totalorder %v3901_v10, 1  ;;  %v1803_v34 = vshrl.u32 %v1802_v19, 23  ;;  %v1715_v55 = vshll.u32 %v5133_v25, %v1709_v1 }
 0x1d3   : > { %v3922_v52 = vshrl.u32 %v1652_v36, 30  ;;  %v1713_v48 = vshrl.u32 %v5133_v25, %v1710_v63  ;;  %v1716_v41 = vshrl.u32 %v5134_v46, %v1710_v63  ;;  %v1718_v3 = vshll.u32 %v5134_v46, %v1709_v1 }
 0x1d4   : > { %v1719_v30 = vshrl.u32 %v5130_v7, %v1710_v63  ;;  %v1721_v14 = vshll.u32 %v5130_v7, %v1709_v1  ;;  %v1722_v4 = vshrl.u32 %v5132_v60, %v1710_v63  ;;  %vm1728_vm3 = vcmp.lt.s32.totalorder %v3901_v10, 2 }
 0x1d5   : > { %5170 = vst [vmem:[#allocation24_spill] sm:$0xff] %v3922_v52  ;;  %v1654_v12 = vshll.u32 %v3922_v52, 30  ;;  %v1714_v27 = vor.u32 %v1713_v48, %v1712_v2  ;;  %v1717_v51 = vor.u32 %v1716_v41, %v1715_v55  ;;  %v1724_v53 = vshll.u32 %v5132_v60, %v1709_v1 }
 0x1d6   : > { %v1720_v50 = vor.u32 %v1719_v30, %v1718_v3  ;;  %v1723_v20 = vor.u32 %v1722_v4, %v1721_v14  ;;  %v1725_v5 = vshrl.u32 %v5127_v58, %v1710_v63  ;;  %vm1729_vm5 = vcmp.lt.s32.totalorder %v3901_v10, 3 }
 0x1d7   : > { %v3935_v33 = vsub.s32 %v1651_v23, %v1654_v12  ;;  %vm1730_vm6 = vcmp.lt.s32.totalorder %v3901_v10, 4  ;;  %v1735_v59 = vsel %vm1727_vm2, %v1714_v27, %v1717_v51  ;;  %v1711_v29 = vshrl.u32 %v5129_v15, %v1710_v63 }
 0x1d8   : > { %v1726_v9 = vor.u32 %v1725_v5, %v1724_v53  ;;  %v1732_v26 = vsel %vm1730_vm6, %v1720_v50, 2102212464  ;;  %v1736_v54 = vsel %vm1730_vm6, %v1723_v20, 920167782  ;;  %vm1177_vm7 = vcmp.lt.s32.totalorder %v3460_v47, 0 }
 0x1d9   : > { %vm1281_vm11 = vcmp.lt.s32.totalorder %v3530_v49, 0  ;;  %v1657_v19 = vsub.s32 0, %v3935_v33  ;;  %v1737_v62 = vsel %vm1729_vm5, %v1720_v50, %v1736_v54  ;;  %v1739_v23 = vsel %vm1727_vm2, %v1717_v51, %v1720_v50  ;;  %v2114_v50 = vld [vmem:[%s5026_s3 + $0x18] sm:$0xff] }
 0x1da   : > { %v2646_v1 = vadd.s32 4294967169, %v1803_v34  ;;  %v1463_v36 = vand.u32 2147483647, %v1462_v31  ;;  %v1731_v63 = vsel %vm1727_vm2, %v1711_v29, %v1714_v27  ;;  %v1738_v2 = vsel %vm1728_vm3, %v1735_v59, %v1737_v62  ;;  %v2111_v31 = vld [vmem:[%s5026_s3] sm:$0xff]  ;;  %v2112_v34 = vld [vmem:[%s5026_s3 + $0x8] sm:$0xff] }
 0x1db   : > { %v1740_v48 = vsel %vm1730_vm6, %v1726_v9, 1326507024  ;;  %v1733_v55 = vsel %vm1729_vm5, %v1717_v51, %v1732_v26  ;;  %v3958_v3 = vmul.u32.u64.low %v3916_v18, %v1738_v2  ;;  %v3959_v30 = vmul.u32.u64.high %v3916_v18, %v1738_v2, %v3958_v3  ;;  %v2113_v51 = vld [vmem:[%s5026_s3 + $0x10] sm:$0xff] }
 0x1dc   : > { %v1741_v41 = vsel %vm1729_vm5, %v1723_v20, %v1740_v48  ;;  %v1465_v14 = vcvt.s32.f32 %v1458_v38  ;;  %v1563_v4 = vsub.s32 4294967266, %v3918_v57  ;;  %v2639_v12 = vmin.u32 %v1657_v19, %v3935_v33 }
 0x1dd   : > { %v1742_v27 = vsel %vm1728_vm3, %v1739_v23, %v1741_v41  ;;  %v1259_v20 = vxor.u32 2147483648, %v3911_v13  ;;  %v1809_v5 = vadd.s32 1, %v2646_v1  ;;  %v1363_v59 = vxor.u32 2147483648, %v3913_v21 }
 0x1de   : > { %v3980_v53 = vmul.u32.u64.low %v3916_v18, %v1742_v27  ;;  %v3981_v38 = vmul.u32.u64.high %v3916_v18, %v1742_v27, %v3980_v53  ;;  %v3984_v29 = vmul.f32 %v1465_v14, %v1463_v36  ;;  %v1734_v9 = vsel %vm1728_vm3, %v1731_v63, %v1733_v55  ;;  %v5171_v63 = vld [vmem:[#allocation32_spill] sm:$0xff] }
 0x1df   : > { %v2756_v26 = vpack.c.bf16 %v2112_v34, %v2111_v31  ;;  %v1559_v54 = vsub.s32 32, %v3918_v57  ;;  %v1753_v19 = vadd.s32 1, %v3959_v30  ;;  %vm1810_vm12 = vcmp.gt.s32.totalorder %v1809_v5, 0 }
 0x1e0   : > { %v2760_v62 = vpack.c.bf16 %v2114_v50, %v2113_v51  ;;  %v1564_v23 = vadd.s32 127, %v1563_v4  ;;  %v1659_v2 = vclz %v2639_v12  ;;  %v1806_v48 = vand.u32 8388607, %v5083_v16 }
 0x1e1   : > { %v1811_v1 = vsel %vm1810_vm12, %v1809_v5, 0  ;;  %2757 = vmatprep.subr.bf16.mxu1 %v2756_v26  ;;  %v1543_v36 = vadd.s32 %v3804_v40, %v3816_v56  ;;  %v1750_v10 = vmul.u32 %v3916_v18, %v1734_v9  ;;  %vm1752_vm15 = vc.u32 %v3981_v38, %v3958_v3 }
 0x1e2   : > { %v3999_v55 = vadd.f32 %v5171_v63, %v3118_v35  ;;  %2759 = vmatpush3.bf16.msra.mxu1 %v2756_v26  ;;  %v4004_v41 = vsel %vm1177_vm7, %v1259_v20, %v3911_v13  ;;  %v4009_v31 = vsel %vm1281_vm11, %v1363_v59, %v3913_v21  ;;  %v1754_v40 = vsel %vm1752_vm15, %v1753_v19, %v3959_v30 }
 0x1e3   : > { %5172 = vst [vmem:[#allocation27_spill] sm:$0xff] %v4004_v41  ;;  %5173 = vst [vmem:[#allocation32_spill] sm:$0xff] %v4009_v31  ;;  %v1813_v56 = vand.u32 31, %v1811_v1  ;;  %2761 = vmatprep.subr.bf16.mxu1 %v2760_v62  ;;  %v1560_v34 = vshll.u32 %v3868_v39, %v3918_v57  ;;  %v1561_v14 = vshrl.u32 %v1543_v36, %v1559_v54  ;;  %v1565_v12 = vshll.u32 %v1564_v23, 23 }
 0x1e4   : > { %v1755_v4 = vadd.s32 %v1754_v40, %v1750_v10  ;;  %v2640_v27 = vadd.s32 4294967294, %v1659_v2  ;;  %v1807_v13 = vor.u32 8388608, %v1806_v48  ;;  %v1906_v30 = vand.u32 2139095040, %v3999_v55 }
 0x1e5   : > { %v1814_v51 = vsub.s32 32, %v1813_v56  ;;  %v1816_v20 = vshll.u32 %v5129_v15, %v1813_v56  ;;  %v1819_v21 = vshll.u32 %v5133_v25, %v1813_v56  ;;  %v1822_v39 = vshll.u32 %v5134_v46, %v1813_v56 }
 0x1e6   : > { %v1756_v50 = vadd.s32 536870912, %v1755_v4  ;;  %2763 = vmatpush3.bf16.msra.mxu1 %v2760_v62  ;;  %v1812_v9 = vshrl.u32 %v1811_v1, 5  ;;  %v1825_v26 = vshll.u32 %v5130_v7, %v1813_v56  ;;  %v4026_v19 = vor.u32 %v1561_v14, %v1560_v34 }
 0x1e7   : > { %v1817_v53 = vshrl.u32 %v5133_v25, %v1814_v51  ;;  %v1820_v5 = vshrl.u32 %v5134_v46, %v1814_v51  ;;  %v1823_v57 = vshrl.u32 %v5130_v7, %v1814_v51  ;;  %v1826_v54 = vshrl.u32 %v5132_v60, %v1814_v51 }
 0x1e8   : > { %v4022_v59 = vshrl.u32 %v1756_v50, 30  ;;  %v4028_v48 = vor.u32 4788187, %v1565_v12  ;;  %v4031_v63 = vshll.u32 %v1807_v13, 8  ;;  %vm2641_vm1 = vcmp.lt.s32.totalorder %v2640_v27, 0 }
 0x1e9   : > { %v1818_v23 = vor.u32 %v1817_v53, %v1816_v20  ;;  %v1821_v2 = vor.u32 %v1820_v5, %v1819_v21  ;;  %v1824_v62 = vor.u32 %v1823_v57, %v1822_v39  ;;  %v1827_v10 = vor.u32 %v1826_v54, %v1825_v26 }
 0x1ea   : > { %5174 = vst [vmem:[#allocation46_spill] sm:$0xff] %v4022_v59  ;;  %v1758_v36 = vshll.u32 %v4022_v59, 30  ;;  %v1828_v40 = vshll.u32 %v5132_v60, %v1813_v56  ;;  %v1829_v1 = vshrl.u32 %v5127_v58, %v1814_v51  ;;  %v1907_v50 = vshrl.u32 %v1906_v30, 23 }
 0x1eb   : > { %vm1831_vm2 = vcmp.lt.s32.totalorder %v1812_v9, 1  ;;  %vm1833_vm3 = vcmp.lt.s32.totalorder %v1812_v9, 3  ;;  %vm1834_vm5 = vcmp.lt.s32.totalorder %v1812_v9, 4  ;;  %v1815_v13 = vshrl.u32 %v5129_v15, %v1814_v51  ;;  %v2115_v51 = vld [vmem:[%s5026_s3 + $0x20] sm:$0xff] }
 0x1ec   : > { %v4035_v16 = vsub.s32 %v1755_v4, %v1758_v36  ;;  %v1830_v34 = vor.u32 %v1829_v1, %v1828_v40  ;;  %v1836_v14 = vsel %vm1834_vm5, %v1824_v62, 2102212464  ;;  %v1839_v12 = vsel %vm1831_vm2, %v1818_v23, %v1821_v2 }
 0x1ed   : > { %v1840_v20 = vsel %vm1834_vm5, %v1827_v10, 920167782  ;;  %vm1832_vm6 = vcmp.lt.s32.totalorder %v1812_v9, 2  ;;  %v4042_v53 = vsel %vm2641_vm1, 0, %v2640_v27  ;;  %v1843_v30 = vsel %vm1831_vm2, %v1821_v2, %v1824_v62  ;;  %v2120_v9 = vld [vmem:[%s5026_s3 + $0x48] sm:$0xff] }
 0x1ee   : > { %v1761_v21 = vsub.s32 0, %v4035_v16  ;;  %v1841_v56 = vsel %vm1833_vm3, %v1824_v62, %v1840_v20  ;;  %v1844_v5 = vsel %vm1834_vm5, %v1830_v34, 1326507024  ;;  %v1835_v57 = vsel %vm1831_vm2, %v1815_v13, %v1818_v23  ;;  %v2116_v23 = vld [vmem:[%s5026_s3 + $0x28] sm:$0xff] }
 0x1ef   : > { %v1842_v4 = vsel %vm1832_vm6, %v1839_v12, %v1841_v56  ;;  %v1837_v26 = vsel %vm1833_vm3, %v1821_v2, %v1836_v14  ;;  %v1845_v54 = vsel %vm1833_vm3, %v1827_v10, %v1844_v5  ;;  %v2650_v62 = vadd.s32 4294967169, %v1907_v50  ;;  %v2117_v2 = vld [vmem:[%s5026_s3 + $0x30] sm:$0xff]  ;;  %v2118_v10 = vld [vmem:[%s5026_s3 + $0x38] sm:$0xff] }
 0x1f0   : > { %v2643_v39 = vmin.u32 %v1761_v21, %v4035_v16  ;;  %v1846_v27 = vsel %vm1832_vm6, %v1843_v30, %v1845_v54  ;;  %v4055_v36 = vmul.u32.u64.low %v4031_v63, %v1842_v4  ;;  %v4056_v40 = vmul.u32.u64.high %v4031_v63, %v1842_v4, %v4055_v36 }
 0x1f1   : > { %v1647_v1 = vadd.s32 %v3878_v6, %v3883_v0  ;;  %v4071_v14 = vmul.u32.u64.low %v4031_v63, %v1846_v27  ;;  %v4072_v12 = vmul.u32.u64.high %v4031_v63, %v1846_v27, %v4071_v14  ;;  %v1838_v21 = vsel %vm1832_vm6, %v1835_v57, %v1837_v26  ;;  %v2119_v0 = vld [vmem:[%s5026_s3 + $0x40] sm:$0xff] }
 0x1f2   : > { %v1763_v34 = vclz %v2643_v39  ;;  %v1913_v13 = vadd.s32 1, %v2650_v62  ;;  %v1663_v56 = vsub.s32 32, %v4042_v53  ;;  %v2764_v30 = vpack.c.bf16 %v2116_v23, %v2115_v51 }
 0x1f3   : > { %v2768_v5 = vpack.c.bf16 %v2118_v10, %v2117_v2  ;;  %v1667_v6 = vsub.s32 4294967266, %v4042_v53  ;;  %v1857_v39 = vadd.s32 1, %v4056_v40  ;;  %v5084_v54 = vand.u32 2147483647, %v3999_v55 }
 0x1f4   : > { %v2644_v4 = vadd.s32 4294967294, %v1763_v34  ;;  %vm1914_vm12 = vcmp.gt.s32.totalorder %v1913_v13, 0  ;;  %v1854_v57 = vmul.u32 %v4031_v63, %v1838_v21  ;;  %vm1856_vm1 = vc.u32 %v4072_v12, %v4055_v36  ;;  %2765 = vmatprep.subr.bf16.mxu1 %v2764_v30 }
 0x1f5   : > { %v1915_v26 = vsel %vm1914_vm12, %v1913_v13, 0  ;;  %v1751_v51 = vadd.s32 %v3958_v3, %v3981_v38  ;;  %v1858_v62 = vsel %vm1856_vm1, %v1857_v39, %v4056_v40  ;;  %2767 = vmatpush3.bf16.msra.mxu1 %v2764_v30  ;;  %v1664_v2 = vshll.u32 %v3935_v33, %v4042_v53 }
 0x1f6   : > { %vm2645_vm15 = vcmp.lt.s32.totalorder %v2644_v4, 0  ;;  %v1917_v23 = vand.u32 31, %v1915_v26  ;;  %v1665_v10 = vshrl.u32 %v1647_v1, %v1663_v56  ;;  %v1859_v34 = vadd.s32 %v1858_v62, %v1854_v57  ;;  %2769 = vmatprep.subr.bf16.mxu1 %v2768_v5 }
 0x1f7   : > { %v4092_v27 = vsel %vm2645_vm15, 0, %v2644_v4  ;;  %v2772_v63 = vpack.c.bf16 %v2120_v9, %v2119_v0  ;;  %v4097_v14 = vadd.s32 127, %v1667_v6  ;;  %v1910_v21 = vand.u32 8388607, %v5084_v54 }
 0x1f8   : > { %v1918_v13 = vsub.s32 32, %v1917_v23  ;;  %v4103_v3 = vadd.f32 %v3613_v8, %v3118_v35  ;;  %v1771_v38 = vsub.s32 4294967266, %v4092_v27  ;;  %v1860_v40 = vadd.s32 536870912, %v1859_v34 }
 0x1f9   : > { %v4106_v4 = vshrl.u32 %v1915_v26, 5  ;;  %v1920_v33 = vshll.u32 %v5129_v15, %v1917_v23  ;;  %v1923_v1 = vshll.u32 %v5133_v25, %v1917_v23  ;;  %2771 = vmatpush3.bf16.msra.mxu1 %v2768_v5  ;;  %v1926_v35 = vshll.u32 %v5134_v46, %v1917_v23 }
 0x1fa   : > { %v1921_v53 = vshrl.u32 %v5133_v25, %v1918_v13  ;;  %v1924_v56 = vshrl.u32 %v5134_v46, %v1918_v13  ;;  %v1927_v30 = vshrl.u32 %v5130_v7, %v1918_v13  ;;  %v4113_v0 = vshrl.u32 %v1860_v40, 30  ;;  %2773 = vmatprep.subr.bf16.mxu1 %v2772_v63 }
 0x1fb   : > { %v1929_v8 = vshll.u32 %v5130_v7, %v1917_v23  ;;  %v1930_v6 = vshrl.u32 %v5132_v60, %v1918_v13  ;;  %v4118_v39 = vor.u32 %v1665_v10, %v1664_v2  ;;  %v1669_v9 = vshll.u32 %v4097_v14, 23 }
 0x1fc   : > { %5175 = vst [vmem:[#allocation47_spill] sm:$0xff] %v4113_v0  ;;  %v1922_v57 = vor.u32 %v1921_v53, %v1920_v33  ;;  %v1925_v26 = vor.u32 %v1924_v56, %v1923_v1  ;;  %v1767_v62 = vsub.s32 32, %v4092_v27  ;;  %v1862_v54 = vshll.u32 %v4113_v0, 30 }
 0x1fd   : > { %v1928_v5 = vor.u32 %v1927_v30, %v1926_v35  ;;  %v1931_v40 = vor.u32 %v1930_v6, %v1929_v8  ;;  %v1911_v18 = vor.u32 8388608, %v1910_v21  ;;  %v1932_v20 = vshll.u32 %v5132_v60, %v1917_v23  ;;  %2775 = vmatpush3.bf16.msra.mxu1 %v2772_v63 }
 0x1fe   : > { %v1933_v50 = vshrl.u32 %v5127_v58, %v1918_v13  ;;  %v5087_v59 = vand.u32 2147483647, %v4103_v3  ;;  %v1772_v2 = vadd.s32 127, %v1771_v38  ;;  %v4126_v10 = vsub.s32 %v1859_v34, %v1862_v54 }
 0x1ff   : > { %vm1935_vm2 = vcmp.lt.s32.totalorder %v4106_v4, 1  ;;  %vm1938_vm3 = vcmp.lt.s32.totalorder %v4106_v4, 4  ;;  %vm1937_vm5 = vcmp.lt.s32.totalorder %v4106_v4, 3  ;;  %v1769_v23 = vshrl.u32 %v1751_v51, %v1767_v62  ;;  %v2122_v62 = vld [vmem:[%s5026_s3 + $0x58] sm:$0xff] }
 0x200   : > { %v1934_v14 = vor.u32 %v1933_v50, %v1932_v20  ;;  %v1943_v21 = vsel %vm1935_vm2, %v1922_v57, %v1925_v26  ;;  %v1944_v33 = vsel %vm1938_vm3, %v1931_v40, 920167782  ;;  %v1865_v53 = vsub.s32 0, %v4126_v10 }
 0x201   : > { %v1919_v1 = vshrl.u32 %v5129_v15, %v1918_v13  ;;  %v1945_v54 = vsel %vm1937_vm5, %v1928_v5, %v1944_v33  ;;  %vm1936_vm6 = vcmp.lt.s32.totalorder %v4106_v4, 2  ;;  %v1940_v34 = vsel %vm1938_vm3, %v1928_v5, 2102212464  ;;  %v2121_v13 = vld [vmem:[%s5026_s3 + $0x50] sm:$0xff] }
 0x202   : > { %v1947_v50 = vsel %vm1935_vm2, %v1925_v26, %v1928_v5  ;;  %v1948_v20 = vsel %vm1938_vm3, %v1934_v14, 1326507024  ;;  %v2647_v63 = vmin.u32 %v1865_v53, %v4126_v10  ;;  %v1946_v38 = vsel %vm1936_vm6, %v1943_v21, %v1945_v54  ;;  %v2124_v5 = vld [vmem:[%s5026_s3 + $0x68] sm:$0xff] }
 0x203   : > { %v1949_v51 = vsel %vm1937_vm5, %v1931_v40, %v1948_v20  ;;  %v1951_v56 = vshll.u32 %v1911_v18, 8  ;;  %v1773_v30 = vshll.u32 %v1772_v2, 23  ;;  %v1939_v35 = vsel %vm1935_vm2, %v1919_v1, %v1922_v57  ;;  %v2123_v18 = vld [vmem:[%s5026_s3 + $0x60] sm:$0xff] }
 0x204   : > { %v1950_v8 = vsel %vm1936_vm6, %v1947_v50, %v1949_v51  ;;  %v2010_v6 = vand.u32 2139095040, %v4103_v3  ;;  %v1867_v40 = vclz %v2647_v63  ;;  %v1941_v57 = vsel %vm1937_vm5, %v1925_v26, %v1940_v34 }
 0x205   : > { %v4164_v2 = vmul.u32.u64.low %v1951_v56, %v1950_v8  ;;  %v4165_v14 = vmul.u32.u64.high %v1951_v56, %v1950_v8, %v4164_v2  ;;  %v4167_v21 = vmul.u32.u64.low %v1951_v56, %v1946_v38  ;;  %v4168_v33 = vmul.u32.u64.high %v1951_v56, %v1946_v38, %v4167_v21 }
 0x206   : > { %v2011_v53 = vshrl.u32 %v2010_v6, 23  ;;  %v2014_v1 = vand.u32 8388607, %v5087_v59  ;;  %v1768_v54 = vshll.u32 %v4035_v16, %v4092_v27  ;;  %v2648_v50 = vadd.s32 4294967294, %v1867_v40  ;;  %v2125_v2 = vld [vmem:[%s5026_s3 + $0x70] sm:$0xff]  ;;  %v2126_v16 = vld [vmem:[%s5026_s3 + $0x78] sm:$0xff] }
 0x207   : > { %v2776_v20 = vpack.c.bf16 %v2122_v62, %v2121_v13  ;;  %v2780_v51 = vpack.c.bf16 %v2124_v5, %v2123_v18  ;;  %v5176_v63 = vand.u32 2147483647, %v4028_v48  ;;  %v5177_v26 = vcvt.s32.f32 %v4026_v19 }
 0x208   : > { %v4180_v8 = vor.u32 4788187, %v1669_v9  ;;  %v1942_v38 = vsel %vm1936_vm6, %v1939_v35, %v1941_v57  ;;  %v2654_v6 = vadd.s32 4294967169, %v2011_v53  ;;  %v4190_v27 = vor.u32 %v1769_v23, %v1768_v54  ;;  %v5178_v23 = vld [vmem:[#allocation6_spill] sm:$0xff] }
 0x209   : > { %v4178_v34 = vmul.f32 %v5177_v26, %v5176_v63  ;;  %v4192_v48 = vor.u32 4788187, %v1773_v30  ;;  %vm2649_vm12 = vcmp.lt.s32.totalorder %v2648_v50, 0  ;;  %vm1960_vm15 = vc.u32 %v4165_v14, %v4167_v21  ;;  %2777 = vmatprep.subr.bf16.mxu1 %v2776_v20 }
 0x20a   : > { %v4195_v19 = vsel %vm2649_vm12, 0, %v2648_v50  ;;  %v1961_v4 = vadd.s32 1, %v4168_v33  ;;  %v2015_v9 = vor.u32 8388608, %v2014_v1  ;;  %v2017_v13 = vadd.s32 1, %v2654_v6  ;;  %2779 = vmatpush3.bf16.msra.mxu1 %v2776_v20 }
 0x20b   : > { %v1958_v62 = vmul.u32 %v1951_v56, %v1942_v38  ;;  %2781 = vmatprep.subr.bf16.mxu1 %v2780_v51  ;;  %v2784_v18 = vpack.c.bf16 %v2126_v16, %v2125_v2  ;;  %v5088_v5 = vand.u32 2147483647, %v5178_v23  ;;  %v1875_v40 = vsub.s32 4294967266, %v4195_v19  ;;  %v5179_v16 = vld [vmem:[#allocation21_spill] sm:$0xff] }
 0x20c   : > { %v1962_v57 = vsel %vm1960_vm15, %v1961_v4, %v4168_v33  ;;  %vm2018_vm1 = vcmp.gt.s32.totalorder %v2017_v13, 0  ;;  %v1855_v1 = vadd.s32 %v4055_v36, %v4072_v12  ;;  %v4208_v20 = vadd.s32 %v4167_v21, %v4165_v14  ;;  %v5180_v21 = vld [vmem:[#allocation20_spill] sm:$0xff] }
 0x20d   : > { %v1963_v54 = vadd.s32 %v1962_v57, %v1958_v62  ;;  %v2019_v50 = vsel %vm2018_vm1, %v2017_v13, 0  ;;  %v4210_v26 = vshll.u32 %v2015_v9, 8  ;;  %v1871_v38 = vsub.s32 32, %v4195_v19 }
 0x20e   : > { %v2021_v63 = vand.u32 31, %v2019_v50  ;;  %2783 = vmatpush3.bf16.msra.mxu1 %v2780_v51  ;;  %v1872_v33 = vshll.u32 %v4126_v10, %v4195_v19  ;;  %v4217_v36 = vand.u32 8388607, %v5088_v5  ;;  %v1876_v12 = vadd.s32 127, %v1875_v40 }
 0x20f   : > { %v1964_v6 = vadd.s32 536870912, %v1963_v54  ;;  %2785 = vmatprep.subr.bf16.mxu1 %v2784_v18  ;;  %v4221_v14 = vshrl.u32 %v5129_v15, %v5179_v16  ;;  %v464_v51 = vshll.u32 %v5129_v15, %v5180_v21  ;;  %v2020_v9 = vshrl.u32 %v2019_v50, 5 }
 0x210   : > { %v2022_v2 = vsub.s32 32, %v2021_v63  ;;  %v2024_v10 = vshll.u32 %v5129_v15, %v2021_v63  ;;  %v2027_v19 = vshll.u32 %v5133_v25, %v2021_v63  ;;  %v2030_v40 = vshll.u32 %v5134_v46, %v2021_v63 }
 0x211   : > { %v4225_v4 = vshrl.u32 %v1964_v6, 30  ;;  %v2033_v5 = vshll.u32 %v5130_v7, %v2021_v63  ;;  %v2036_v50 = vshll.u32 %v5132_v60, %v2021_v63  ;;  %v1873_v0 = vshrl.u32 %v1855_v1, %v1871_v38 }
 0x212   : > { %v2025_v13 = vshrl.u32 %v5133_v25, %v2022_v2  ;;  %v2028_v62 = vshrl.u32 %v5134_v46, %v2022_v2  ;;  %v2031_v57 = vshrl.u32 %v5130_v7, %v2022_v2  ;;  %2787 = vmatpush3.bf16.msra.mxu1 %v2784_v18  ;;  %v2034_v6 = vshrl.u32 %v5132_v60, %v2022_v2 }
 0x213   : > { %5181 = vst [vmem:[#allocation6_spill] sm:$0xff] %v4225_v4  ;;  %v1966_v59 = vshll.u32 %v4225_v4, 30  ;;  %v2037_v30 = vshrl.u32 %v5127_v58, %v2022_v2  ;;  %v455_v49 = vor.u32 8388608, %v4217_v36  ;;  %v1877_v18 = vshll.u32 %v1876_v12, 23 }
 0x214   : > { %v2026_v53 = vor.u32 %v2025_v13, %v2024_v10  ;;  %v2029_v56 = vor.u32 %v2028_v62, %v2027_v19  ;;  %v2032_v35 = vor.u32 %v2031_v57, %v2030_v40  ;;  %v2035_v31 = vor.u32 %v2034_v6, %v2033_v5 }
 0x215   : > { %v4238_v52 = vsub.s32 %v1963_v54, %v1966_v59  ;;  %v2038_v41 = vor.u32 %v2037_v30, %v2036_v50  ;;  %vm2042_vm2 = vcmp.lt.s32.totalorder %v2020_v9, 4  ;;  %v465_v4 = vshrl.u32 %v5133_v25, %v5179_v16 }
 0x216   : > { %vm2039_vm3 = vcmp.lt.s32.totalorder %v2020_v9, 1  ;;  %v2044_v60 = vsel %vm2042_vm2, %v2032_v35, 2102212464  ;;  %v467_v58 = vshll.u32 %v5133_v25, %v5180_v21  ;;  %v2023_v59 = vshrl.u32 %v5129_v15, %v2022_v2 }
 0x217   : > { %v1969_v47 = vsub.s32 0, %v4238_v52  ;;  %vm2041_vm5 = vcmp.lt.s32.totalorder %v2020_v9, 3  ;;  %v2047_v5 = vsel %vm2039_vm3, %v2026_v53, %v2029_v56  ;;  %v2048_v1 = vsel %vm2042_vm2, %v2035_v31, 920167782 }
 0x218   : > { %vm2040_vm6 = vcmp.lt.s32.totalorder %v2020_v9, 2  ;;  %v2049_v54 = vsel %vm2041_vm5, %v2032_v35, %v2048_v1  ;;  %v2051_v63 = vsel %vm2039_vm3, %v2029_v56, %v2032_v35  ;;  %v2043_v38 = vsel %vm2039_vm3, %v2023_v59, %v2026_v53  ;;  %v5183_v9 = vld [vmem:[#allocation33_spill] sm:$0xff] }
 0x219   : > { %v2651_v30 = vmin.u32 %v1969_v47, %v4238_v52  ;;  %v2045_v36 = vsel %vm2041_vm5, %v2029_v56, %v2044_v60  ;;  %v2050_v12 = vsel %vm2040_vm6, %v2047_v5, %v2049_v54  ;;  %v2052_v10 = vsel %vm2042_vm2, %v2038_v41, 1326507024 }
 0x21a   : > { %v2053_v13 = vsel %vm2041_vm5, %v2035_v31, %v2052_v10  ;;  %v4253_v25 = vmul.u32.u64.low %v4210_v26, %v2050_v12  ;;  %v4254_v15 = vmul.u32.u64.high %v4210_v26, %v2050_v12, %v4253_v25  ;;  %v468_v47 = vshrl.u32 %v5134_v46, %v5179_v16 }
 0x21b   : > { %v1971_v19 = vclz %v2651_v30  ;;  %v2054_v2 = vsel %vm2040_vm6, %v2051_v63, %v2053_v13  ;;  %v470_v35 = vshll.u32 %v5134_v46, %v5180_v21  ;;  %v471_v53 = vshrl.u32 %v5130_v7, %v5179_v16 }
 0x21c   : > { %v4265_v41 = vmul.u32.u64.low %v4210_v26, %v2054_v2  ;;  %v4266_v31 = vmul.u32.u64.high %v4210_v26, %v2054_v2, %v4265_v41  ;;  %v466_v62 = vor.u32 %v465_v4, %v464_v51  ;;  %v4268_v40 = vor.u32 %v1873_v0, %v1872_v33  ;;  %v5182_v0 = vld [vmem:[#allocation28_spill] sm:$0xff] }
 0x21d   : > { %v2652_v56 = vadd.s32 4294967294, %v1971_v19  ;;  %v4270_v57 = vor.u32 4788187, %v1877_v18  ;;  %v469_v6 = vor.u32 %v468_v47, %v467_v58  ;;  %v472_v50 = vor.u32 %v471_v53, %v470_v35  ;;  %v5184_v19 = vld [vmem:[#allocation15_spill] sm:$0xff] }
 0x21e   : > { %v2046_v60 = vsel %vm2040_vm6, %v2043_v38, %v2045_v36  ;;  %v2065_v46 = vadd.s32 1, %v4254_v15  ;;  %vm481_vm15 = vcmp.lt.s32.totalorder %v3312_v32, 3  ;;  %vm479_vm1 = vcmp.lt.s32.totalorder %v3312_v32, 1 }
 0x21f   : > { %vm2653_vm12 = vcmp.lt.s32.totalorder %v2652_v56, 0  ;;  %v484_v16 = vsel %vm482_vm4, %v472_v50, 2102212464  ;;  %v493_v33 = vsel %vm481_vm15, %v5182_v0, %v3685_v11  ;;  %v487_v4 = vsel %vm479_vm1, %v466_v62, %v469_v6 }
 0x220   : > { %v1974_v7 = vsel %vm2653_vm12, 0, %v2652_v56  ;;  %v489_v18 = vsel %vm481_vm15, %v472_v50, %v5183_v9  ;;  %v2062_v58 = vmul.u32 %v4210_v26, %v2046_v60  ;;  %vm2064_vm2 = vc.u32 %v4266_v31, %v4253_v25  ;;  %v5196_v9 = vld [vmem:[#allocation39_spill] sm:$0xff] }
 0x221   : > { %v1975_v21 = vsub.s32 32, %v1974_v7  ;;  %v1979_v51 = vsub.s32 4294967266, %v1974_v7  ;;  %vm480_vm3 = vcmp.lt.s32.totalorder %v3312_v32, 2  ;;  %v491_v59 = vsel %vm479_vm1, %v469_v6, %v472_v50 }
 0x222   : > { %v2066_v1 = vsel %vm2064_vm2, %v2065_v46, %v4254_v15  ;;  %v483_v11 = vsel %vm479_vm1, %v4221_v14, %v466_v62  ;;  %v485_v30 = vsel %vm481_vm15, %v469_v6, %v484_v16  ;;  %v490_v63 = vsel %vm480_vm3, %v487_v4, %v489_v18 }
 0x223   : > { %v1980_v5 = vadd.s32 127, %v1979_v51  ;;  %v2067_v54 = vadd.s32 %v2066_v1, %v2062_v58  ;;  %v494_v38 = vsel %vm480_vm3, %v491_v59, %v493_v33  ;;  %v495_v36 = vshll.u32 %v455_v49, 8  ;;  %v5195_v33 = vld [vmem:[#allocation17_spill] sm:$0xff] }
 0x224   : > { %v1976_v26 = vshll.u32 %v4238_v52, %v1974_v7  ;;  %v1977_v12 = vshrl.u32 %v4208_v20, %v1975_v21  ;;  %v637_v13 = vsub.s32 4, %v5184_v19  ;;  %v486_v47 = vsel %vm480_vm3, %v483_v11, %v485_v30 }
 0x225   : > { %v1981_v10 = vshll.u32 %v1980_v5, 23  ;;  %v2068_v2 = vadd.s32 536870912, %v2067_v54  ;;  %v4296_v35 = vmul.u32.u64.low %v495_v36, %v494_v38  ;;  %v4297_v15 = vmul.u32.u64.high %v495_v36, %v494_v38, %v4296_v35 }
 0x226   : > { %v4299_v53 = vmul.u32.u64.low %v495_v36, %v490_v63  ;;  %v4300_v32 = vmul.u32.u64.high %v495_v36, %v490_v63, %v4299_v53  ;;  %v5185_v56 = vand.u32 2147483647, %v3121_v37  ;;  %vm5104_vm5 = vcmp.lt.s32.totalorder %v3607_v43, 0 }
 0x227   : > { %v1982_v14 = vor.u32 4788187, %v1981_v10  ;;  %vm5103_vm6 = vcmp.lt.s32.totalorder %v3611_v28, 0  ;;  %v5188_v52 = vand.u32 2147483647, %v4180_v8  ;;  %v5189_v20 = vcvt.s32.f32 %v4118_v39 }
 0x228   : > { %vm4305_vm4 = vcmp.le.f32.partialorder %v5185_v56, 0.7853982  ;;  %v5190_v62 = vand.u32 2147483647, %v4192_v48  ;;  %v5191_v6 = vcvt.s32.f32 %v4190_v27  ;;  %v4319_v60 = vshrl.u32 %v2068_v2, 30 }
 0x229   : > { %v1674_v41 = vmul.f32 %v5189_v20, %v5188_v52  ;;  %v639_v46 = vsel %vm4305_vm4, %v3121_v37, %v3692_v22  ;;  %vm5102_vm12 = vcmp.lt.s32.totalorder %v3751_v45, 0  ;;  %v1879_v7 = vand.u32 2147483647, %v4270_v57 }
 0x22a   : > { %v1778_v50 = vmul.f32 %v5191_v6, %v5190_v62  ;;  %v1881_v8 = vcvt.s32.f32 %v4268_v40  ;;  %v1978_v39 = vor.u32 %v1977_v12, %v1976_v26  ;;  %v638_v48 = vsel %vm553_vm9, %v637_v13, %v5184_v19 }
 0x22b   : > { %vm5100_vm15 = vcmp.lt.s32.totalorder %v3822_v17, 0  ;;  %v1983_v27 = vand.u32 2147483647, %v1982_v14  ;;  %v2070_v16 = vshll.u32 %v4319_v60, 30  ;;  %v502_v0 = vmul.u32 %v495_v36, %v486_v47 }
 0x22c   : > { %vm504_vm1 = vc.u32 %v4297_v15, %v4299_v53  ;;  %v505_v22 = vadd.s32 1, %v4300_v32  ;;  %2867 = vcosq.f32 %v639_v46  ;;  %v5192_v57 = vand.u32 2147483647, %v3127_v42 }
 0x22d   : > { %v741_v21 = vsub.s32 4, %v5195_v33  ;;  %v4343_v51 = vsub.s32 %v2067_v54, %v2070_v16  ;;  %v640_v4 = vsel %vm4305_vm4, 0, %v638_v48  ;;  %2869 = vsinq.f32 %v639_v46 }
 0x22e   : > { %vm4338_vm2 = vcmp.le.f32.partialorder %v5192_v57, 0.7853982  ;;  %v1571_v58 = vxor.u32 2147483648, %v4178_v34  ;;  %v1882_v59 = vmul.f32 %v1881_v8, %v1879_v7  ;;  %v1985_v5 = vcvt.s32.f32 %v1978_v39  ;;  %v5201_v39 = vld [vmem:[#allocation22_spill] sm:$0xff] }
 0x22f   : > { %v743_v18 = vsel %vm4338_vm2, %v3127_v42, %v5196_v9  ;;  %v506_v1 = vsel %vm504_vm1, %v505_v22, %v4300_v32  ;;  %v1675_v11 = vxor.u32 2147483648, %v1674_v41  ;;  %v1779_v30 = vxor.u32 2147483648, %v1778_v50  ;;  %v5202_v22 = vld [vmem:[#allocation9_spill] sm:$0xff] }
 0x230   : > { %v2073_v54 = vsub.s32 0, %v4343_v51  ;;  %v507_v63 = vadd.s32 %v506_v1, %v502_v0  ;;  %v1986_v38 = vmul.f32 %v1985_v5, %v1983_v27  ;;  %v644_v36 = vadd.s32 3, %v640_v4 }
 0x231   : > { %v742_v26 = vsel %vm657_vm10, %v741_v21, %v5195_v33  ;;  %2871 = vcosq.f32 %v743_v18  ;;  %vm5099_vm9 = vcmp.lt.s32.totalorder %v3890_v61, 0  ;;  %v5197_v19 = vxor.u32 2147483648, %v3984_v29 }
 0x232   : > { %v2655_v12 = vmin.u32 %v2073_v54, %v4343_v51  ;;  %v508_v10 = vadd.s32 536870912, %v507_v63  ;;  %2873 = vsinq.f32 %v743_v18  ;;  %v4369_v2 = vsel %vm5103_vm6, %v1571_v58, %v4178_v34 }
 0x233   : > { %v4364_v13 = vsel %vm5104_vm5, %v5197_v19, %v3984_v29  ;;  %v1883_v47 = vxor.u32 2147483648, %v1882_v59  ;;  %vm5101_vm10 = vcmp.lt.s32.totalorder %v3999_v55, 0  ;;  %v4374_v35 = vsel %vm5102_vm12, %v1675_v11, %v1674_v41 }
 0x234   : > { %v2075_v14 = vclz %v2655_v12  ;;  %v509_v32 = vshrl.u32 %v508_v10, 30  ;;  %v744_v56 = vsel %vm4338_vm2, 0, %v742_v26  ;;  %v4380_v29 = vsel %vm5100_vm15, %v1779_v30, %v1778_v50 }
 0x235   : > { %v1987_v49 = vxor.u32 2147483648, %v1986_v38  ;;  %vm449_vm3 = vcmp.lt.s32.totalorder %v5178_v23, 0  ;;  %v645_v34 = vand.u32 3, %v644_v36  ;;  %v5198_v20 = vand.u32 2147483647, %v5178_v23 }
 0x236   : > { %v2656_v52 = vadd.s32 4294967294, %v2075_v14  ;;  %v510_v41 = vshll.u32 %v509_v32, 30  ;;  %v533_v6 = vsub.s32 4, %v509_v32  ;;  %v2868_v46 = vpop.eup %2867  ;;  %v4391_v7 = vsel %vm5099_vm9, %v1883_v47, %v1882_v59 }
 0x237   : > { %vm4385_vm4 = vcmp.le.f32.partialorder %v5198_v20, 0.7853982  ;;  %v2063_v50 = vadd.s32 %v4253_v25, %v4266_v31  ;;  %v748_v8 = vadd.s32 3, %v744_v56  ;;  %v845_v48 = vsub.s32 4, %v5201_v39  ;;  %v2870_v27 = vpop.eup %2869  ;;  %v5206_v31 = vld [vmem:[#allocation41_spill] sm:$0xff] }
 0x238   : > { %vm2657_vm1 = vcmp.lt.s32.totalorder %v2656_v52, 0  ;;  %v503_v16 = vadd.s32 %v4299_v53, %v4297_v15  ;;  %v4398_v0 = vsub.s32 %v507_v63, %v510_v41  ;;  %v5203_v57 = vand.u32 2147483647, %v5202_v22 }
 0x239   : > { %v4408_v33 = vsel %vm5101_vm10, %v1987_v49, %v1986_v38  ;;  %v2078_v25 = vsel %vm2657_vm1, 0, %v2656_v52  ;;  %vm646_vm9 = vcmp.lt.s32.totalorder %v645_v34, 2  ;;  %v534_v4 = vsel %vm449_vm3, %v533_v6, %v509_v32  ;;  %v5207_v38 = vld [vmem:[#allocation16_spill] sm:$0xff]  ;;  %v5211_v49 = vld [vmem:[#allocation25_spill] sm:$0xff]  ;;  %v5212_v6 = vld [vmem:[#allocation42_spill] sm:$0xff] }
 0x23a   : > { %vm4402_vm2 = vcmp.le.f32.partialorder %v5203_v57, 0.7853982  ;;  %v2083_v15 = vsub.s32 4294967266, %v2078_v25  ;;  %v513_v53 = vsub.s32 0, %v4398_v0  ;;  %vm647_vm15 = vcmp.eq.s32.totalorder %v645_v34, 0 }
 0x23b   : > { %v847_v21 = vsel %vm4402_vm2, %v5202_v22, %v5206_v31  ;;  %v2872_v9 = vpop.eup %2871  ;;  %v648_v18 = vxor.u32 2147483648, %v2870_v27  ;;  %v651_v58 = vxor.u32 2147483648, %v2868_v46  ;;  %v749_v59 = vand.u32 3, %v748_v8 }
 0x23c   : > { %v846_v5 = vsel %vm761_vm13, %v845_v48, %v5201_v39  ;;  %v2874_v1 = vpop.eup %2873  ;;  %v2079_v11 = vsub.s32 32, %v2078_v25  ;;  %v2084_v30 = vadd.s32 127, %v2083_v15  ;;  %v2595_v54 = vmin.u32 %v513_v53, %v4398_v0 }
 0x23d   : > { %vm643_vm1 = vweird.f32 %v3121_v37  ;;  %2875 = vcosq.f32 %v847_v21  ;;  %v536_v63 = vsel %vm4385_vm4, 0, %v534_v4  ;;  %vm650_vm10 = vcmp.eq.s32.totalorder %v645_v34, 2 }
 0x23e   : > { %2877 = vsinq.f32 %v847_v21  ;;  %v5208_v36 = vand.u32 2147483647, %v5207_v38  ;;  %v515_v12 = vclz %v2595_v54  ;;  %v752_v10 = vxor.u32 2147483648, %v2874_v1 }
 0x23f   : > { %v755_v19 = vxor.u32 2147483648, %v2872_v9  ;;  %v848_v47 = vsel %vm4402_vm2, 0, %v846_v5  ;;  %v2085_v14 = vshll.u32 %v2084_v30, 23  ;;  %v649_v32 = vsel %vm647_vm15, %v2868_v46, %v648_v18 }
 0x240   : > { %vm4426_vm12 = vcmp.le.f32.partialorder %v5208_v36, 0.7853982  ;;  %v652_v56 = vsel %vm650_vm10, %v651_v58, %v2870_v27  ;;  %v949_v52 = vsub.s32 4, %v5211_v49  ;;  %v2081_v20 = vshrl.u32 %v2063_v50, %v2079_v11  ;;  %v5217_v36 = vld [vmem:[#allocation30_spill] sm:$0xff] }
 0x241   : > { %v2596_v41 = vadd.s32 4294967294, %v515_v12  ;;  %vm747_vm13 = vweird.f32 %v3127_v42  ;;  %vm751_vm6 = vcmp.eq.s32.totalorder %v749_v59, 0  ;;  %v951_v8 = vsel %vm4426_vm12, %v5207_v38, %v5212_v6 }
 0x242   : > { %v2080_v39 = vshll.u32 %v4343_v51, %v2078_v25  ;;  %v540_v48 = vadd.s32 3, %v536_v63  ;;  %vm754_vm2 = vcmp.eq.s32.totalorder %v749_v59, 2  ;;  %v852_v57 = vadd.s32 3, %v848_v47 }
 0x243   : > { %vm2597_vm5 = vcmp.lt.s32.totalorder %v2596_v41, 0  ;;  %v653_v46 = vsel %vm646_vm9, %v649_v32, %v652_v56  ;;  %v753_v27 = vsel %vm751_vm6, %v2872_v9, %v752_v10  ;;  %v756_v40 = vsel %vm754_vm2, %v755_v19, %v2874_v1 }
 0x244   : > { %v2086_v50 = vor.u32 4788187, %v2085_v14  ;;  %v518_v31 = vsel %vm2597_vm5, 0, %v2596_v41  ;;  %v950_v21 = vsel %vm865_vm14, %v949_v52, %v5211_v49  ;;  %2879 = vcosq.f32 %v951_v8 }
 0x245   : > { %v2082_v15 = vor.u32 %v2081_v20, %v2080_v39  ;;  %v519_v53 = vsub.s32 32, %v518_v31  ;;  %v523_v4 = vsub.s32 4294967266, %v518_v31  ;;  %vm750_vm15 = vcmp.lt.s32.totalorder %v749_v59, 2  ;;  %v5213_v59 = vld [vmem:[#allocation19_spill] sm:$0xff] }
 0x246   : > { %v4446_v51 = vsel %vm643_vm1, nan, %v653_v46  ;;  %v757_v25 = vsel %vm750_vm15, %v753_v27, %v756_v40  ;;  %v4448_v34 = vand.u32 3, %v852_v57  ;;  %2881 = vsinq.f32 %v951_v8 }
 0x247   : > { %v2876_v9 = vpop.eup %2875  ;;  %v520_v18 = vshll.u32 %v4398_v0, %v518_v31  ;;  %v521_v58 = vshrl.u32 %v503_v16, %v519_v53  ;;  %v524_v5 = vadd.s32 127, %v523_v4  ;;  %v952_v1 = vsel %vm4426_vm12, 0, %v950_v21  ;;  %v5218_v16 = vld [vmem:[#allocation44_spill] sm:$0xff] }
 0x248   : > { %v2878_v11 = vpop.eup %2877  ;;  %v2087_v30 = vand.u32 2147483647, %v2086_v50  ;;  %v4453_v54 = vand.u32 3, %v540_v48  ;;  %v5214_v37 = vand.u32 2147483647, %v5213_v59  ;;  %v1053_v12 = vsub.s32 4, %v5217_v36 }
 0x249   : > { %v2089_v10 = vcvt.s32.f32 %v2082_v15  ;;  %v522_v19 = vor.u32 %v521_v58, %v520_v18  ;;  %v525_v0 = vshll.u32 %v524_v5, 23  ;;  %v4468_v47 = vsel %vm747_vm13, nan, %v757_v25  ;;  %v5222_v48 = vld [vmem:[#allocation35_spill] sm:$0xff]  ;;  %v5223_v50 = vld [vmem:[#allocation37_spill] sm:$0xff] }
 0x24a   : > { %vm4457_vm14 = vcmp.le.f32.partialorder %v5214_v37, 0.7853982  ;;  %vm855_vm5 = vcmp.eq.s32.totalorder %v4448_v34, 0  ;;  %v956_v14 = vadd.s32 3, %v952_v1  ;;  %v1054_v32 = vsel %vm969_vm0, %v1053_v12, %v5217_v36  ;;  %v5224_v37 = vld [vmem:[#allocation29_spill] sm:$0xff] }
 0x24b   : > { %v1055_v26 = vsel %vm4457_vm14, %v5213_v59, %v5218_v16  ;;  %v526_v56 = vor.u32 4788187, %v525_v0  ;;  %v856_v49 = vxor.u32 2147483648, %v2878_v11  ;;  %v859_v52 = vxor.u32 2147483648, %v2876_v9 }
 0x24c   : > { %2883 = vcosq.f32 %v1055_v26  ;;  %v2090_v20 = vmul.f32 %v2089_v10, %v2087_v30  ;;  %v529_v41 = vcvt.s32.f32 %v522_v19  ;;  %vm854_vm6 = vcmp.lt.s32.totalorder %v4448_v34, 2 }
 0x24d   : > { %v1056_v42 = vsel %vm4457_vm14, 0, %v1054_v32  ;;  %v5219_v6 = vand.u32 2147483647, %v5167_v24  ;;  %v527_v39 = vand.u32 2147483647, %v526_v56  ;;  %2885 = vsinq.f32 %v1055_v26 }
 0x24e   : > { %v1157_v57 = vsub.s32 4, %v5222_v48  ;;  %v2880_v27 = vpop.eup %2879  ;;  %vm858_vm0 = vcmp.eq.s32.totalorder %v4448_v34, 2  ;;  %v957_v40 = vand.u32 3, %v956_v14  ;;  %v1261_v31 = vsub.s32 4, %v5223_v50  ;;  %v5234_v34 = vld [vmem:[#allocation32_spill] sm:$0xff] }
 0x24f   : > { %vm4479_vm12 = vcmp.le.f32.partialorder %v5219_v6, 0.7853982  ;;  %vm5105_vm9 = vcmp.lt.s32.totalorder %v4103_v3, 0  ;;  %v530_v21 = vmul.f32 %v529_v41, %v527_v39  ;;  %vm851_vm10 = vweird.f32 %v5202_v22 }
 0x250   : > { %v1159_v46 = vsel %vm4479_vm12, %v5167_v24, %v3909_v44  ;;  %v1060_v15 = vadd.s32 3, %v1056_v42  ;;  %v1158_v53 = vsel %vm1073_vm8, %v1157_v57, %v5222_v48  ;;  %v2882_v4 = vpop.eup %2881  ;;  %v857_v44 = vsel %vm855_vm5, %v2876_v9, %v856_v49  ;;  %v5229_v42 = vld [vmem:[#allocation34_spill] sm:$0xff]  ;;  %v5233_v48 = vld [vmem:[#allocation40_spill] sm:$0xff] }
 0x251   : > { %2887 = vcosq.f32 %v1159_v46  ;;  %v860_v25 = vsel %vm858_vm0, %v859_v52, %v2878_v11  ;;  %v963_v18 = vxor.u32 2147483648, %v2880_v27  ;;  %v1160_v58 = vsel %vm4479_vm12, 0, %v1158_v53  ;;  %v5228_v11 = vld [vmem:[#allocation27_spill] sm:$0xff] }
 0x252   : > { %2889 = vsinq.f32 %v1159_v46  ;;  %v2091_v5 = vxor.u32 2147483648, %v2090_v20  ;;  %v531_v1 = vxor.u32 2147483648, %v530_v21  ;;  %v960_v30 = vxor.u32 2147483648, %v2882_v4 }
 0x253   : > { %v5225_v63 = vand.u32 2147483647, %v5224_v37  ;;  %vm959_vm8 = vcmp.eq.s32.totalorder %v957_v40, 0  ;;  %v1164_v12 = vadd.s32 3, %v1160_v58  ;;  %v1262_v9 = vsel %vm1177_vm7, %v1261_v31, %v5223_v50 }
 0x254   : > { %v532_v19 = vsel %vm449_vm3, %v531_v1, %v530_v21  ;;  %vm962_vm13 = vcmp.eq.s32.totalorder %v957_v40, 2  ;;  %v4514_v0 = vand.u32 3, %v1060_v15  ;;  %v961_v14 = vsel %vm959_vm8, %v2880_v27, %v960_v30 }
 0x255   : > { %vm4501_vm1 = vcmp.le.f32.partialorder %v5225_v63, 0.7853982  ;;  %v535_v26 = vsel %vm4385_vm4, %v5178_v23, %v532_v19  ;;  %v964_v32 = vsel %vm962_vm13, %v963_v18, %v2882_v4  ;;  %v861_v49 = vsel %vm854_vm6, %v857_v44, %v860_v25 }
 0x256   : > { %v1263_v10 = vsel %vm4501_vm1, %v5224_v37, %v5228_v11  ;;  %v1264_v16 = vsel %vm4501_vm1, 0, %v1262_v9  ;;  %v2884_v56 = vpop.eup %2883  ;;  %vm955_vm7 = vweird.f32 %v5207_v38  ;;  %vm958_vm3 = vcmp.lt.s32.totalorder %v957_v40, 2  ;;  %v5240_v11 = vld [vmem:[#allocation45_spill] sm:$0xff] }
 0x257   : > { %2891 = vcosq.f32 %v1263_v10  ;;  %v1268_v52 = vadd.s32 3, %v1264_v16  ;;  %v4524_v41 = vand.u32 3, %v1164_v12  ;;  %v5230_v6 = vand.u32 2147483647, %v5229_v42  ;;  %v2886_v8 = vpop.eup %2885 }
 0x258   : > { %2893 = vcosq.f32 %v535_v26  ;;  %v965_v39 = vsel %vm958_vm3, %v961_v14, %v964_v32  ;;  %v1365_v57 = vsub.s32 4, %v5233_v48  ;;  %v4539_v40 = vsel %vm5105_vm9, %v2091_v5, %v2090_v20  ;;  %v5238_v5 = vld [vmem:[#allocation43_spill] sm:$0xff] }
 0x259   : > { %2895 = vsinq.f32 %v535_v26  ;;  %vm4528_vm2 = vcmp.le.f32.partialorder %v5230_v6, 0.7853982  ;;  %v4543_v50 = vsel %vm851_vm10, nan, %v861_v49  ;;  %vm1063_vm4 = vcmp.eq.s32.totalorder %v4514_v0, 0 }
 0x25a   : > { %2897 = vsinq.f32 %v1263_v10  ;;  %v1367_v46 = vsel %vm4528_vm2, %v5229_v42, %v5234_v34  ;;  %v1067_v31 = vxor.u32 2147483648, %v2884_v56  ;;  %vm546_vm15 = vcmp.eq.s32.totalorder %v4453_v54, 2 }
 0x25b   : > { %v2888_v27 = vpop.eup %2887  ;;  %vm1066_vm14 = vcmp.eq.s32.totalorder %v4514_v0, 2  ;;  %v4548_v15 = vand.u32 3, %v1268_v52  ;;  %v1366_v53 = vsel %vm1281_vm11, %v1365_v57, %v5233_v48  ;;  %2899 = vcosq.f32 %v1367_v46 }
 0x25c   : > { %v2890_v21 = vpop.eup %2889  ;;  %vm543_vm5 = vcmp.eq.s32.totalorder %v4453_v54, 0  ;;  %v4556_v22 = vsel %vm955_vm7, nan, %v965_v39  ;;  %vm1062_vm6 = vcmp.lt.s32.totalorder %v4514_v0, 2  ;;  %v1064_v20 = vxor.u32 2147483648, %v2886_v8 }
 0x25d   : > { %v1368_v4 = vsel %vm4528_vm2, 0, %v1366_v53  ;;  %2901 = vsinq.f32 %v1367_v46  ;;  %vm542_vm12 = vcmp.lt.s32.totalorder %v4453_v54, 2  ;;  %vm1166_vm0 = vcmp.lt.s32.totalorder %v4524_v41, 2 }
 0x25e   : > { %vm1167_vm11 = vcmp.eq.s32.totalorder %v4524_v41, 0  ;;  %v1168_v44 = vxor.u32 2147483648, %v2890_v21  ;;  %v1171_v25 = vxor.u32 2147483648, %v2888_v27  ;;  %vm539_vm10 = vweird.f32 %v5178_v23 }
 0x25f   : > { %v1068_v38 = vsel %vm1066_vm14, %v1067_v31, %v2886_v8  ;;  %vm1170_vm1 = vcmp.eq.s32.totalorder %v4524_v41, 2  ;;  %v5235_v18 = vand.u32 2147483647, %v3607_v43  ;;  %v1469_v1 = vsub.s32 4, %v5238_v5 }
 0x260   : > { %vm1059_vm13 = vweird.f32 %v5213_v59  ;;  %vm1163_vm7 = vweird.f32 %v5167_v24  ;;  %vm1271_vm3 = vcmp.eq.s32.totalorder %v4548_v15, 0  ;;  %vm1274_vm2 = vcmp.eq.s32.totalorder %v4548_v15, 2  ;;  %v5248_v59 = vld [vmem:[#allocation24_spill] sm:$0xff] }
 0x261   : > { %vm4570_vm8 = vcmp.le.f32.partialorder %v5235_v18, 0.7853982  ;;  %v1372_v30 = vadd.s32 3, %v1368_v4  ;;  %v2892_v36 = vpop.eup %2891  ;;  %v1065_v12 = vsel %vm1063_vm4, %v2884_v56, %v1064_v20  ;;  %vm5239_vm14 = vcmp.lt.s32.totalorder %v3607_v43, 0 }
 0x262   : > { %v1471_v63 = vsel %vm4570_vm8, %v3607_v43, %v4364_v13  ;;  %v1470_v9 = vsel %vm5239_vm14, %v1469_v1, %v5238_v5  ;;  %v1573_v10 = vsub.s32 4, %v5240_v11  ;;  %v2894_v19 = vpop.eup %2893  ;;  %v1169_v16 = vsel %vm1167_vm11, %v2888_v27, %v1168_v44 }
 0x263   : > { %2903 = vcosq.f32 %v1471_v63  ;;  %v1172_v26 = vsel %vm1170_vm1, %v1171_v25, %v2890_v21  ;;  %vm1270_vm9 = vcmp.lt.s32.totalorder %v4548_v15, 2  ;;  %v1275_v13 = vxor.u32 2147483648, %v2892_v36  ;;  %v2896_v56 = vpop.eup %2895  ;;  %v5250_v15 = vld [vmem:[#allocation46_spill] sm:$0xff] }
 0x264   : > { %v5241_v14 = vand.u32 2147483647, %v3611_v28  ;;  %v547_v49 = vxor.u32 2147483648, %v2894_v19  ;;  %v1472_v52 = vsel %vm4570_vm8, 0, %v1470_v9  ;;  %2905 = vsinq.f32 %v1471_v63  ;;  %v2898_v62 = vpop.eup %2897 }
 0x265   : > { %vm5244_vm11 = vcmp.lt.s32.totalorder %v3611_v28, 0  ;;  %v544_v8 = vxor.u32 2147483648, %v2896_v56  ;;  %v1373_v39 = vand.u32 3, %v1372_v30  ;;  %v1476_v48 = vadd.s32 3, %v1472_v52  ;;  %v2900_v31 = vpop.eup %2899 }
 0x266   : > { %vm4596_vm4 = vcmp.le.f32.partialorder %v5241_v14, 0.7853982  ;;  %v1574_v6 = vsel %vm5244_vm11, %v1573_v10, %v5240_v11  ;;  %v548_v34 = vsel %vm546_vm15, %v547_v49, %v2896_v56  ;;  %v1272_v46 = vxor.u32 2147483648, %v2898_v62 }
 0x267   : > { %v1575_v57 = vsel %vm4596_vm4, %v3611_v28, %v4369_v2  ;;  %v1576_v27 = vsel %vm4596_vm4, 0, %v1574_v6  ;;  %v545_v21 = vsel %vm543_vm5, %v2894_v19, %v544_v8  ;;  %v1069_v53 = vsel %vm1062_vm6, %v1065_v12, %v1068_v38  ;;  %v2902_v2 = vpop.eup %2901 }
 0x268   : > { %2907 = vcosq.f32 %v1575_v57  ;;  %v1173_v20 = vsel %vm1166_vm0, %v1169_v16, %v1172_v26  ;;  %v549_v4 = vsel %vm542_vm12, %v545_v21, %v548_v34  ;;  %v1276_v44 = vsel %vm1274_vm2, %v1275_v13, %v2898_v62 }
 0x269   : > { %2909 = vsinq.f32 %v1575_v57  ;;  %v1379_v25 = vxor.u32 2147483648, %v2900_v31  ;;  %v1477_v18 = vand.u32 3, %v1476_v48  ;;  %v550_v58 = vsel %vm539_vm10, nan, %v549_v4 }
 0x26a   : > { %v1273_v0 = vsel %vm1271_vm3, %v2892_v36, %v1272_v46  ;;  %v1376_v38 = vxor.u32 2147483648, %v2902_v2  ;;  %v1580_v5 = vadd.s32 3, %v1576_v27  ;;  %2724 = vmatprep.mubr.f32.mxu1 %v550_v58  ;;  %v1070_v41 = vsel %vm1059_vm13, nan, %v1069_v53  ;;  %v5263_v58 = vld [vmem:[#allocation6_spill] sm:$0xff] }
 0x26b   : > { %v1174_v54 = vsel %vm1163_vm7, nan, %v1173_v20  ;;  %vm1375_vm15 = vcmp.eq.s32.totalorder %v1373_v39, 0  ;;  %vm1378_vm5 = vcmp.eq.s32.totalorder %v1373_v39, 2  ;;  %2725 = vmatmul.mubr.f32.vlgmr.msra.gmra.mrb[0].mxu1 %v4446_v51  ;;  %vm1267_vm6 = vweird.f32 %v5224_v37  ;;  %v5258_v20 = vld [vmem:[#allocation47_spill] sm:$0xff] }
 0x26c   : > { %vm1371_vm12 = vweird.f32 %v5229_v42  ;;  %v1377_v23 = vsel %vm1375_vm15, %v2900_v31, %v1376_v38  ;;  %v1380_v1 = vsel %vm1378_vm5, %v1379_v25, %v2902_v2  ;;  %v5245_v30 = vand.u32 2147483647, %v3751_v45  ;;  %2727 = vmatprep.mubr.f32.mxu1 %v4468_v47 }
 0x26d   : > { %v1677_v36 = vsub.s32 4, %v5248_v59  ;;  %v2904_v24 = vpop.eup %2903  ;;  %v1277_v51 = vsel %vm1270_vm9, %v1273_v0, %v1276_v44  ;;  %vm1374_vm10 = vcmp.lt.s32.totalorder %v1373_v39, 2  ;;  %vm1478_vm1 = vcmp.lt.s32.totalorder %v1477_v18, 2 }
 0x26e   : > { %vm4636_vm0 = vcmp.le.f32.partialorder %v5245_v30, 0.7853982  ;;  %vm1475_vm8 = vweird.f32 %v3607_v43  ;;  %vm1479_vm13 = vcmp.eq.s32.totalorder %v1477_v18, 0  ;;  %vm1482_vm7 = vcmp.eq.s32.totalorder %v1477_v18, 2  ;;  %v2906_v10 = vpop.eup %2905 }
 0x26f   : > { %v1679_v12 = vsel %vm4636_vm0, %v3751_v45, %v4374_v35  ;;  %v1483_v9 = vxor.u32 2147483648, %v2904_v24  ;;  %v1581_v11 = vand.u32 3, %v1580_v5  ;;  %v1381_v19 = vsel %vm1374_vm10, %v1377_v23, %v1380_v1  ;;  %2728 = vmatmul.mubr.f32.gmra.mrb[2].mxu1 %v4543_v50 }
 0x270   : > { %vm5249_vm3 = vcmp.lt.s32.totalorder %v3751_v45, 0  ;;  %2911 = vcosq.f32 %v1679_v12  ;;  %v1781_v16 = vsub.s32 4, %v5250_v15  ;;  %v1480_v26 = vxor.u32 2147483648, %v2906_v10  ;;  %2730 = vmatprep.mubr.f32.mxu1 %v4556_v22 }
 0x271   : > { %v1678_v47 = vsel %vm5249_vm3, %v1677_v36, %v5248_v59  ;;  %2913 = vsinq.f32 %v1679_v12  ;;  %v5251_v13 = vand.u32 2147483647, %v3822_v17  ;;  %v1484_v56 = vsel %vm1482_vm7, %v1483_v9, %v2906_v10 }
 0x272   : > { %v1680_v35 = vsel %vm4636_vm0, 0, %v1678_v47  ;;  %v2908_v32 = vpop.eup %2907  ;;  %vm5254_vm2 = vcmp.lt.s32.totalorder %v3822_v17, 0  ;;  %v1481_v62 = vsel %vm1479_vm13, %v2904_v24, %v1480_v26  ;;  %vm1586_vm14 = vcmp.eq.s32.totalorder %v1581_v11, 2 }
 0x273   : > { %vm4658_vm9 = vcmp.le.f32.partialorder %v5251_v13, 0.7853982  ;;  %v1684_v49 = vadd.s32 3, %v1680_v35  ;;  %v1782_v50 = vsel %vm5254_vm2, %v1781_v16, %v5250_v15  ;;  %v2910_v6 = vpop.eup %2909  ;;  %v1587_v8 = vxor.u32 2147483648, %v2908_v32  ;;  %2731 = vmatmul.mubr.f32.gmra.mrb[4].mxu1 %v1070_v41 }
 0x274   : > { %v1783_v52 = vsel %vm4658_vm9, %v3822_v17, %v4380_v29  ;;  %v1584_v39 = vxor.u32 2147483648, %v2910_v6  ;;  %v1784_v22 = vsel %vm4658_vm9, 0, %v1782_v50  ;;  %v1485_v57 = vsel %vm1478_vm1, %v1481_v62, %v1484_v56  ;;  %2733 = vmatprep.mubr.f32.mxu1 %v1174_v54 }
 0x275   : > { %2915 = vcosq.f32 %v1783_v52  ;;  %v1685_v48 = vand.u32 3, %v1684_v49  ;;  %vm1579_vm4 = vweird.f32 %v3611_v28  ;;  %vm1583_vm11 = vcmp.eq.s32.totalorder %v1581_v11, 0 }
 0x276   : > { %2917 = vsinq.f32 %v1783_v52  ;;  %v1588_v34 = vsel %vm1586_vm14, %v1587_v8, %v2910_v6  ;;  %v1278_v29 = vsel %vm1267_vm6, nan, %v1277_v51  ;;  %v1382_v46 = vsel %vm1371_vm12, nan, %v1381_v19 }
 0x277   : > { %v1585_v27 = vsel %vm1583_vm11, %v2908_v32, %v1584_v39  ;;  %v5255_v31 = vand.u32 2147483647, %v3890_v61  ;;  %vm1582_vm5 = vcmp.lt.s32.totalorder %v1581_v11, 2  ;;  %v1788_v53 = vadd.s32 3, %v1784_v22  ;;  %2734 = vmatmul.mubr.f32.gmra.mrb[6].mxu1 %v1278_v29 }
 0x278   : > { %v1885_v2 = vsub.s32 4, %v5258_v20  ;;  %v1486_v42 = vsel %vm1475_vm8, nan, %v1485_v57  ;;  %v1589_v4 = vsel %vm1582_vm5, %v1585_v27, %v1588_v34  ;;  %vm1686_vm6 = vcmp.lt.s32.totalorder %v1685_v48, 2  ;;  %2736 = vmatprep.mubr.f32.mxu1 %v1382_v46 }
 0x279   : > { %vm4681_vm15 = vcmp.le.f32.partialorder %v5255_v31, 0.7853982  ;;  %vm1687_vm12 = vcmp.eq.s32.totalorder %v1685_v48, 0  ;;  %vm1690_vm0 = vcmp.eq.s32.totalorder %v1685_v48, 2  ;;  %vm5259_vm10 = vcmp.lt.s32.totalorder %v3890_v61, 0 }
 0x27a   : > { %v1887_v37 = vsel %vm4681_vm15, %v3890_v61, %v4391_v7  ;;  %v1886_v44 = vsel %vm5259_vm10, %v1885_v2, %v5258_v20  ;;  %v5260_v25 = vand.u32 2147483647, %v3999_v55  ;;  %v2912_v7 = vpop.eup %2911  ;;  %v1989_v0 = vsub.s32 4, %v5263_v58 }
 0x27b   : > { %2919 = vcosq.f32 %v1887_v37  ;;  %v1888_v43 = vsel %vm4681_vm15, 0, %v1886_v44  ;;  %v2914_v5 = vpop.eup %2913  ;;  %v1590_v41 = vsel %vm1579_vm4, nan, %v1589_v4  ;;  %v1691_v54 = vxor.u32 2147483648, %v2912_v7  ;;  %2737 = vmatmul.mubr.f32.gmra.mrb[8].mxu1 %v1486_v42 }
 0x27c   : > { %vm4697_vm1 = vcmp.le.f32.partialorder %v5260_v25, 0.7853982  ;;  %2921 = vsinq.f32 %v1887_v37  ;;  %v1789_v23 = vand.u32 3, %v1788_v53  ;;  %v1688_v1 = vxor.u32 2147483648, %v2914_v5  ;;  %2739 = vmatprep.mubr.f32.mxu1 %v1590_v41  ;;  %v5269_v25 = vld [vmem:[#allocation2_spill] sm:$0xff] }
 0x27d   : > { %v1991_v38 = vsel %vm4697_vm1, %v3999_v55, %v4408_v33  ;;  %v1892_v30 = vadd.s32 3, %v1888_v43  ;;  %vm5264_vm8 = vcmp.lt.s32.totalorder %v3999_v55, 0  ;;  %v1692_v36 = vsel %vm1690_vm0, %v1691_v54, %v2914_v5  ;;  %v5270_v43 = vld [vmem:[#allocation4_spill] sm:$0xff] }
 0x27e   : > { %2923 = vcosq.f32 %v1991_v38  ;;  %v1990_v63 = vsel %vm5264_vm8, %v1989_v0, %v5263_v58  ;;  %v5265_v28 = vand.u32 2147483647, %v4103_v3  ;;  %v2093_v51 = vsub.s32 4, %v4319_v60  ;;  %v5271_v0 = vld [vmem:[#allocation3_spill] sm:$0xff] }
 0x27f   : > { %2925 = vsinq.f32 %v1991_v38  ;;  %v2916_v59 = vpop.eup %2915  ;;  %v1992_v33 = vsel %vm4697_vm1, 0, %v1990_v63  ;;  %v1689_v9 = vsel %vm1687_vm12, %v2912_v7, %v1688_v1  ;;  %vm1683_vm7 = vweird.f32 %v3751_v45  ;;  %v5273_v63 = vld [vmem:[#allocation5_spill] sm:$0xff] }
 0x280   : > { %vm4718_vm13 = vcmp.le.f32.partialorder %v5265_v28, 0.7853982  ;;  %v2918_v12 = vpop.eup %2917  ;;  %v1795_v11 = vxor.u32 2147483648, %v2916_v59  ;;  %v1996_v10 = vadd.s32 3, %v1992_v33  ;;  %v1693_v47 = vsel %vm1686_vm6, %v1689_v9, %v1692_v36 }
 0x281   : > { %v2095_v19 = vsel %vm4718_vm13, %v4103_v3, %v4539_v40  ;;  %v1792_v15 = vxor.u32 2147483648, %v2918_v12  ;;  %vm1794_vm3 = vcmp.eq.s32.totalorder %v1789_v23, 2  ;;  %v1694_v16 = vsel %vm1683_vm7, nan, %v1693_v47 }
 0x282   : > { %vm1791_vm9 = vcmp.eq.s32.totalorder %v1789_v23, 0  ;;  %v1796_v26 = vsel %vm1794_vm3, %v1795_v11, %v2918_v12  ;;  %v1893_v35 = vand.u32 3, %v1892_v30  ;;  %2740 = vmatmul.mubr.f32.gmra.mrb[10].mxu1 %v1694_v16  ;;  %vm1790_vm2 = vcmp.lt.s32.totalorder %v1789_v23, 2  ;;  %v5272_v23 = vld [vmem:[#allocation7_spill] sm:$0xff]  ;;  %v5274_v12 = vld [vmem:[#allocation10_spill] sm:$0xff] }
 0x283   : > { %v1793_v13 = vsel %vm1791_vm9, %v2916_v59, %v1792_v15  ;;  %vm5268_vm14 = vcmp.lt.s32.totalorder %v4103_v3, 0  ;;  %2927 = vcosq.f32 %v2095_v19  ;;  %vm1787_vm4 = vweird.f32 %v3822_v17 }
 0x284   : > { %v2094_v14 = vsel %vm5268_vm14, %v2093_v51, %v4319_v60  ;;  %v1797_v45 = vsel %vm1790_vm2, %v1793_v13, %v1796_v26  ;;  %v1997_v40 = vand.u32 3, %v1996_v10  ;;  %2929 = vsinq.f32 %v2095_v19  ;;  %v5275_v10 = vld [vmem:[#allocation8_spill] sm:$0xff] }
 0x285   : > { %v2920_v32 = vpop.eup %2919  ;;  %v1798_v56 = vsel %vm1787_vm4, nan, %v1797_v45  ;;  %v2096_v50 = vsel %vm4718_vm13, 0, %v2094_v14  ;;  %vm1898_vm11 = vcmp.eq.s32.totalorder %v1893_v35, 2  ;;  %vm1895_vm15 = vcmp.eq.s32.totalorder %v1893_v35, 0  ;;  %v5276_v13 = vld [vmem:[#allocation12_spill] sm:$0xff]  ;;  %v5277_v45 = vld [vmem:[#allocation11_spill] sm:$0xff] }
 0x286   : > { %v1899_v49 = vxor.u32 2147483648, %v2920_v32  ;;  %v2922_v52 = vpop.eup %2921  ;;  %2742 = vmatprep.mubr.f32.mxu1 %v1798_v56  ;;  %v2100_v39 = vadd.s32 3, %v2096_v50  ;;  %vm1894_vm5 = vcmp.lt.s32.totalorder %v1893_v35, 2  ;;  %vm2002_vm6 = vcmp.eq.s32.totalorder %v1997_v40, 2 }
 0x287   : > { %v1896_v62 = vxor.u32 2147483648, %v2922_v52  ;;  %vm1891_vm12 = vweird.f32 %v3890_v61  ;;  %vm1999_vm0 = vcmp.eq.s32.totalorder %v1997_v40, 0  ;;  %vm1998_vm10 = vcmp.lt.s32.totalorder %v1997_v40, 2 }
 0x288   : > { %v2924_v6 = vpop.eup %2923  ;;  %v1900_v8 = vsel %vm1898_vm11, %v1899_v49, %v2922_v52  ;;  %v2101_v27 = vand.u32 3, %v2100_v39  ;;  %vm1995_vm1 = vweird.f32 %v3999_v55  ;;  %vm2099_vm3 = vweird.f32 %v4103_v3  ;;  %v2995_v55 = vld [vmem:[%s5025_s2] sm:$0x3] }
 0x289   : > { %v2926_v60 = vpop.eup %2925  ;;  %v2003_v48 = vxor.u32 2147483648, %v2924_v6  ;;  %v1897_v17 = vsel %vm1895_vm15, %v2920_v32, %v1896_v62  ;;  %v233_v18 = vsub.s32 1, %v5269_v25  ;;  %vm2496_vm9 = vcmask 523264  }
 0x28a   : > { %v2000_v22 = vxor.u32 2147483648, %v2926_v60  ;;  %v1901_v57 = vsel %vm1894_vm5, %v1897_v17, %v1900_v8  ;;  %vm2106_vm8 = vcmp.eq.s32.totalorder %v2101_v27, 2  ;;  %vm2103_vm13 = vcmp.eq.s32.totalorder %v2101_v27, 0  ;;  %v5278_v17 = vld [vmem:[#allocation14_spill] sm:$0xff] }
 0x28b   : > { %v2004_v34 = vsel %vm2002_vm6, %v2003_v48, %v2926_v60  ;;  %v1902_v29 = vsel %vm1891_vm12, nan, %v1901_v57  ;;  %vm2102_vm7 = vcmp.lt.s32.totalorder %v2101_v27, 2  ;;  %v4743_v7 = vrot.slane %v2995_v55, %v233_v18  ;;  %v5283_v18 = vld [vmem:[#allocation31_spill] sm:$0xff] }
 0x28c   : > { %v2001_v46 = vsel %vm1999_vm0, %v2924_v6, %v2000_v22  ;;  %2743 = vmatmul.mubr.f32.gmra.mrb[12].mxu1 %v1902_v29 }
 0x28d   : > { %v2005_v31 = vsel %vm1998_vm10, %v2001_v46, %v2004_v34  ;;  %v2928_v21 = vpop.eup %2927  ;;  %v361_v58 = vadd.f32 %v5270_v43, %v4743_v7  ;;  %v355_v38 = vadd.f32 %v5271_v0, %v4743_v7  ;;  %v373_v1 = vadd.f32 %v5272_v23, %v4743_v7  ;;  %v5279_v46 = vld [vmem:[#allocation13_spill] sm:$0xff] }
 0x28e   : > { %v2006_v53 = vsel %vm1995_vm1, nan, %v2005_v31  ;;  %v2107_v20 = vxor.u32 2147483648, %v2928_v21  ;;  %v2930_v2 = vpop.eup %2929  ;;  %v367_v59 = vadd.f32 %v5273_v63, %v4743_v7  ;;  %v385_v9 = vadd.f32 %v5274_v12, %v4743_v7  ;;  %v5280_v31 = vld [vmem:[#allocation18_spill] sm:$0xff] }
 0x28f   : > { %2745 = vmatprep.mubr.f32.mxu1 %v2006_v53  ;;  %v2104_v37 = vxor.u32 2147483648, %v2930_v2  ;;  %v379_v19 = vadd.f32 %v5275_v10, %v4743_v7  ;;  %v397_v14 = vadd.f32 %v5276_v13, %v4743_v7  ;;  %v391_v40 = vadd.f32 %v5277_v45, %v4743_v7 }
 0x290   : > { %v2108_v42 = vsel %vm2106_vm8, %v2107_v20, %v2930_v2  ;;  %v409_v22 = vadd.f32 %v5278_v17, %v4743_v7  ;;  %v403_v27 = vadd.f32 %v5279_v46, %v4743_v7  ;;  %v5281_v2 = vld [vmem:[#allocation23_spill] sm:$0xff]  ;;  %v4802_v55 = vadd.f32 %v5283_v18, %v4743_v7 }
 0x291   : > { %v2105_v61 = vsel %vm2103_vm13, %v2928_v21, %v2104_v37  ;;  %v4790_v21 = vadd.f32 %v5280_v31, %v4743_v7  ;;  %v421_v37 = vadd.f32 %v5281_v2, %v4743_v7 }
 0x292   : > { %v2109_v4 = vsel %vm2102_vm7, %v2105_v61, %v2108_v42 }
 0x293   : > { %v2110_v44 = vsel %vm2099_vm3, nan, %v2109_v4 }
 0x294   : > { %2746 = vmatmul.mubr.f32.gmra.mrb[14].mxu1 %v2110_v44  ;;  %v5282_v44 = vld [vmem:[#allocation26_spill] sm:$0xff] }
 0x295   : > { %v4798_v25 = vadd.f32 %v5282_v44, %v4743_v7 }
 0x33e   : > { %v2726_v5 = vpop.f32.mrb[0].mxu1 }
 0x33f   : > { %v4749_v41 = vadd.f32 %v2726_v5, %v361_v58  ;;  %v2193_v3 = vpop.f32.mrb[1].mxu1 }
 0x340   : > { %v4751_v54 = vadd.f32 %v2193_v3, %v355_v38 }
 0x341   : > { %v2306_v30 = vmul.f32 1.442695, %v4749_v41  ;;  %vm2289_vm2 = vcmp.gt.f32.partialorder %v4749_v41, 20.0 }
 0x342   : > { %v2304_v36 = vmul.f32 1.442695, %v4751_v54  ;;  %v2729_v33 = vpop.f32.mrb[2].mxu1  ;;  %vm2288_vm4 = vcmp.gt.f32.partialorder %v4751_v54, 20.0 }
 0x343   : > { %2931 = vpow2.f32 %v2306_v30  ;;  %v4759_v28 = vadd.f32 %v2729_v33, %v373_v1  ;;  %v2203_v24 = vpop.f32.mrb[3].mxu1  ;;  %v5284_v30 = vld [vmem:[#allocation38_spill] sm:$0xff] }
 0x344   : > { %2933 = vpow2.f32 %v2304_v36  ;;  %v4761_v51 = vadd.f32 %v2203_v24, %v367_v59  ;;  %v4806_v63 = vadd.f32 %v5284_v30, %v4743_v7 }
 0x345   : > { %v2310_v11 = vmul.f32 1.442695, %v4759_v28  ;;  %vm2291_vm15 = vcmp.gt.f32.partialorder %v4759_v28, 20.0 }
 0x346   : > { %v2308_v47 = vmul.f32 1.442695, %v4761_v51  ;;  %v2732_v15 = vpop.f32.mrb[4].mxu1  ;;  %vm2290_vm6 = vcmp.gt.f32.partialorder %v4761_v51, 20.0 }
 0x347   : > { %2935 = vpow2.f32 %v2310_v11  ;;  %v4769_v16 = vadd.f32 %v2732_v15, %v385_v9  ;;  %v2213_v26 = vpop.f32.mrb[5].mxu1 }
 0x348   : > { %2937 = vpow2.f32 %v2308_v47  ;;  %v4771_v35 = vadd.f32 %v2213_v26, %v379_v19 }
 0x349   : > { %v2314_v32 = vmul.f32 1.442695, %v4769_v16  ;;  %vm2293_vm10 = vcmp.gt.f32.partialorder %v4769_v16, 20.0 }
 0x34a   : > { %v2312_v56 = vmul.f32 1.442695, %v4771_v35  ;;  %v2735_v49 = vpop.f32.mrb[6].mxu1  ;;  %vm2292_vm8 = vcmp.gt.f32.partialorder %v4771_v35, 20.0 }
 0x34b   : > { %2939 = vpow2.f32 %v2314_v32  ;;  %v4779_v50 = vadd.f32 %v2735_v49, %v397_v14  ;;  %v2223_v52 = vpop.f32.mrb[7].mxu1 }
 0x34c   : > { %2941 = vpow2.f32 %v2312_v56  ;;  %v4781_v6 = vadd.f32 %v2223_v52, %v391_v40 }
 0x34d   : > { %v2932_v62 = vpop.eup %2931  ;;  %v2318_v8 = vmul.f32 1.442695, %v4779_v50  ;;  %vm2295_vm7 = vcmp.gt.f32.partialorder %v4779_v50, 20.0 }
 0x34e   : > { %v2934_v39 = vpop.eup %2933  ;;  %v2345_v60 = vadd.f32 1.0, %v2932_v62  ;;  %v2738_v48 = vpop.f32.mrb[8].mxu1  ;;  %v2348_v57 = vmul.f32 -0.5, %v2932_v62  ;;  %v2351_v42 = vand.u32 2147483647, %v2932_v62  ;;  %vm2294_vm3 = vcmp.gt.f32.partialorder %v4781_v6, 20.0 }
 0x34f   : > { %v2336_v34 = vadd.f32 1.0, %v2934_v39  ;;  %2943 = vpow2.f32 %v2318_v8  ;;  %v2233_v29 = vpop.f32.mrb[9].mxu1  ;;  %v2339_v53 = vmul.f32 -0.5, %v2934_v39  ;;  %v4794_v61 = vadd.f32 %v2738_v48, %v409_v22 }
 0x350   : > { %2945 = vlog2.f32 %v2345_v60  ;;  %v2349_v38 = vadd.f32 1.0, %v2348_v57  ;;  %v2342_v5 = vand.u32 2147483647, %v2934_v39  ;;  %vm4811_vm14 = vcmp.lt.f32.partialorder %v2351_v42, 0.0004427343 }
 0x351   : > { %v2936_v20 = vpop.eup %2935  ;;  %2947 = vlog2.f32 %v2336_v34  ;;  %v2340_v59 = vadd.f32 1.0, %v2339_v53  ;;  %v2316_v24 = vmul.f32 1.442695, %v4781_v6  ;;  %v4826_v45 = vadd.f32 %v2233_v29, %v403_v27 }
 0x352   : > { %v2938_v4 = vpop.eup %2937  ;;  %v2363_v43 = vadd.f32 1.0, %v2936_v20  ;;  %v2366_v58 = vmul.f32 -0.5, %v2936_v20  ;;  %v2369_v11 = vand.u32 2147483647, %v2936_v20  ;;  %v2350_v47 = vmul.f32 %v2932_v62, %v2349_v38 }
 0x353   : > { %v2354_v3 = vadd.f32 1.0, %v2938_v4  ;;  %v2357_v23 = vmul.f32 -0.5, %v2938_v4  ;;  %v2360_v10 = vand.u32 2147483647, %v2938_v4  ;;  %vm4820_vm11 = vcmp.lt.f32.partialorder %v2342_v5, 0.0004427343 }
 0x354   : > { %2949 = vlog2.f32 %v2363_v43  ;;  %v2367_v9 = vadd.f32 1.0, %v2366_v58  ;;  %v2341_v14 = vmul.f32 %v2934_v39, %v2340_v59  ;;  %v2322_v49 = vmul.f32 1.442695, %v4794_v61 }
 0x355   : > { %v2741_v0 = vpop.f32.mrb[10].mxu1  ;;  %v4808_v36 = vpop.eup %2939  ;;  %2951 = vlog2.f32 %v2354_v3  ;;  %v2358_v26 = vadd.f32 1.0, %v2357_v23  ;;  %vm4835_vm5 = vcmp.lt.f32.partialorder %v2369_v11, 0.0004427343  ;;  %vm4840_vm12 = vcmp.lt.f32.partialorder %v2360_v10, 0.0004427343 }
 0x356   : > { %v2243_v1 = vpop.f32.mrb[11].mxu1  ;;  %v4816_v12 = vpop.eup %2941  ;;  %v2381_v19 = vadd.f32 1.0, %v4808_v36  ;;  %v2384_v32 = vmul.f32 -0.5, %v4808_v36  ;;  %v4833_v52 = vadd.f32 %v2741_v0, %v421_v37  ;;  %v2368_v8 = vmul.f32 %v2936_v20, %v2367_v9 }
 0x357   : > { %v2372_v13 = vadd.f32 1.0, %v4816_v12  ;;  %v2375_v56 = vmul.f32 -0.5, %v4816_v12  ;;  %v2359_v57 = vmul.f32 %v2938_v4, %v2358_v26  ;;  %v2387_v34 = vand.u32 2147483647, %v4808_v36 }
 0x358   : > { %2953 = vlog2.f32 %v2381_v19  ;;  %v2385_v27 = vadd.f32 1.0, %v2384_v32  ;;  %v2378_v31 = vand.u32 2147483647, %v4816_v12  ;;  %v2320_v37 = vmul.f32 1.442695, %v4826_v45 }
 0x359   : > { %v4828_v40 = vpop.eup %2943  ;;  %2955 = vlog2.f32 %v2372_v13  ;;  %v2376_v2 = vadd.f32 1.0, %v2375_v56  ;;  %v2326_v43 = vmul.f32 1.442695, %v4833_v52  ;;  %v4870_v5 = vadd.f32 %v2243_v1, %v4790_v21 }
 0x35a   : > { %v2946_v62 = vpop.eup %2945  ;;  %v2399_v48 = vadd.f32 1.0, %v4828_v40  ;;  %2957 = vpow2.f32 %v2316_v24  ;;  %v2402_v18 = vmul.f32 -0.5, %v4828_v40  ;;  %v2386_v30 = vmul.f32 %v4808_v36, %v2385_v27 }
 0x35b   : > { %v2948_v17 = vpop.eup %2947  ;;  %v2347_v22 = vmul.f32 0.6931472, %v2946_v62  ;;  %vm4883_vm0 = vcmp.lt.f32.partialorder %v2387_v34, 0.0004427343  ;;  %v2324_v1 = vmul.f32 1.442695, %v4870_v5  ;;  %v2377_v19 = vmul.f32 %v4816_v12, %v2376_v2 }
 0x35c   : > { %v2338_v46 = vmul.f32 0.6931472, %v2948_v17  ;;  %2959 = vlog2.f32 %v2399_v48  ;;  %v2405_v33 = vand.u32 2147483647, %v4828_v40  ;;  %v2403_v10 = vadd.f32 1.0, %v2402_v18 }
 0x35d   : > { %v2353_v20 = vsel %vm4811_vm14, %v2350_v47, %v2347_v22  ;;  %2961 = vpow2.f32 %v2322_v49  ;;  %vm2379_vm1 = vcmp.lt.f32.partialorder %v2378_v31, 0.0004427343 }
 0x35e   : > { %v2950_v42 = vpop.eup %2949  ;;  %v2481_v4 = vsel %vm2289_vm2, %v4749_v41, %v2353_v20  ;;  %v2344_v44 = vsel %vm4820_vm11, %v2341_v14, %v2338_v46  ;;  %2963 = vpow2.f32 %v2320_v37  ;;  %v2404_v60 = vmul.f32 %v4828_v40, %v2403_v10 }
 0x35f   : > { %v2744_v29 = vpop.f32.mrb[12].mxu1  ;;  %v2952_v58 = vpop.eup %2951  ;;  %2498 = vst.msk [vmem:[%s4851_s29 + $0x8] sm:$0xff] %vm2496_vm9, %v2481_v4  ;;  %v2480_v0 = vsel %vm2288_vm4, %v4751_v54, %v2344_v44  ;;  %v2365_v38 = vmul.f32 0.6931472, %v2950_v42  ;;  %2965 = vpow2.f32 %v2326_v43  ;;  %vm2297_vm2 = vcmp.gt.f32.partialorder %v4794_v61, 20.0 }
 0x360   : > { %v2253_v53 = vpop.f32.mrb[13].mxu1  ;;  %2497 = vst.msk [vmem:[%s4851_s29] sm:$0xff] %vm2496_vm9, %v2480_v0  ;;  %v2356_v41 = vmul.f32 0.6931472, %v2952_v58  ;;  %v4875_v3 = vadd.f32 %v2744_v29, %v4802_v55  ;;  %2967 = vpow2.f32 %v2324_v1  ;;  %vm2406_vm13 = vcmp.lt.f32.partialorder %v2405_v33, 0.0004427343 }
 0x361   : > { %v4878_v23 = vadd.f32 %v2253_v53, %v4798_v25  ;;  %v2371_v54 = vsel %vm4835_vm5, %v2368_v8, %v2365_v38  ;;  %vm2296_vm4 = vcmp.gt.f32.partialorder %v4826_v45, 20.0 }
 0x362   : > { %v2954_v59 = vpop.eup %2953  ;;  %v2483_v55 = vsel %vm2291_vm15, %v4759_v28, %v2371_v54  ;;  %v2362_v25 = vsel %vm4840_vm12, %v2359_v57, %v2356_v41  ;;  %v2330_v24 = vmul.f32 1.442695, %v4875_v3  ;;  %vm2299_vm15 = vcmp.gt.f32.partialorder %v4833_v52, 20.0 }
 0x363   : > { %v2956_v9 = vpop.eup %2955  ;;  %2500 = vst.msk [vmem:[%s4851_s29 + $0x18] sm:$0xff] %vm2496_vm9, %v2483_v55  ;;  %v2482_v36 = vsel %vm2290_vm6, %v4761_v51, %v2362_v25  ;;  %v2383_v11 = vmul.f32 0.6931472, %v2954_v59  ;;  %v2328_v47 = vmul.f32 1.442695, %v4878_v23 }
 0x364   : > { %2499 = vst.msk [vmem:[%s4851_s29 + $0x10] sm:$0xff] %vm2496_vm9, %v2482_v36  ;;  %v2374_v28 = vmul.f32 0.6931472, %v2956_v9  ;;  %2969 = vpow2.f32 %v2330_v24  ;;  %v2958_v26 = vpop.eup %2957 }
 0x365   : > { %v2389_v51 = vsel %vm4883_vm0, %v2386_v30, %v2383_v11  ;;  %v2390_v49 = vadd.f32 1.0, %v2958_v26  ;;  %2971 = vpow2.f32 %v2328_v47  ;;  %v2393_v57 = vmul.f32 -0.5, %v2958_v26 }
 0x366   : > { %v2960_v32 = vpop.eup %2959  ;;  %v2485_v12 = vsel %vm2293_vm10, %v4769_v16, %v2389_v51  ;;  %v2380_v56 = vsel %vm2379_vm1, %v2377_v19, %v2374_v28  ;;  %v2396_v31 = vand.u32 2147483647, %v2958_v26  ;;  %vm2298_vm0 = vcmp.gt.f32.partialorder %v4870_v5, 20.0 }
 0x367   : > { %v2747_v15 = vpop.f32.mrb[14].mxu1  ;;  %v2962_v62 = vpop.eup %2961  ;;  %2502 = vst.msk [vmem:[%s4851_s29 + $0x28] sm:$0xff] %vm2496_vm9, %v2485_v12  ;;  %v2484_v8 = vsel %vm2292_vm8, %v4771_v35, %v2380_v56  ;;  %v2401_v39 = vmul.f32 0.6931472, %v2960_v32  ;;  %2973 = vlog2.f32 %v2390_v49  ;;  %v2394_v27 = vadd.f32 1.0, %v2393_v57 }
 0x368   : > { %v4908_v13 = vadd.f32 %v2747_v15, %v4806_v63  ;;  %v2263_v14 = vpop.f32.mrb[15].mxu1  ;;  %2501 = vst.msk [vmem:[%s4851_s29 + $0x20] sm:$0xff] %vm2496_vm9, %v2484_v8  ;;  %v2417_v63 = vadd.f32 1.0, %v2962_v62  ;;  %v4918_v16 = vpop.eup %2963  ;;  %v2420_v40 = vmul.f32 -0.5, %v2962_v62  ;;  %v2423_v2 = vand.u32 2147483647, %v2962_v62 }
 0x369   : > { %v2407_v48 = vsel %vm2406_vm13, %v2404_v60, %v2401_v39  ;;  %v4921_v17 = vpop.eup %2965  ;;  %v2408_v35 = vadd.f32 1.0, %v4918_v16  ;;  %v2411_v44 = vmul.f32 -0.5, %v4918_v16  ;;  %v2395_v0 = vmul.f32 %v2958_v26, %v2394_v27 }
 0x36a   : > { %v2487_v22 = vsel %vm2295_vm7, %v4779_v50, %v2407_v48  ;;  %2975 = vlog2.f32 %v2417_v63  ;;  %v2435_v34 = vadd.f32 1.0, %v4921_v17  ;;  %v4928_v29 = vpop.eup %2967  ;;  %v5295_v50 = vld [vmem:[#allocation36_spill] sm:$0xff]  ;;  %v2334_v42 = vmul.f32 1.442695, %v4908_v13 }
 0x36b   : > { %2504 = vst.msk [vmem:[%s4851_s29 + $0x38] sm:$0xff] %vm2496_vm9, %v2487_v22  ;;  %2977 = vlog2.f32 %v2408_v35  ;;  %v2426_v53 = vadd.f32 1.0, %v4928_v29  ;;  %v439_v20 = vadd.f32 %v5295_v50, %v4743_v7  ;;  %v2421_v4 = vadd.f32 1.0, %v2420_v40 }
 0x36c   : > { %2979 = vlog2.f32 %v2435_v34  ;;  %v2438_v43 = vmul.f32 -0.5, %v4921_v17  ;;  %vm4945_vm14 = vcmp.lt.f32.partialorder %v2396_v31, 0.0004427343  ;;  %v2429_v41 = vmul.f32 -0.5, %v4928_v29 }
 0x36d   : > { %2981 = vlog2.f32 %v2426_v53  ;;  %v4943_v58 = vadd.f32 %v2263_v14, %v439_v20  ;;  %vm4952_vm11 = vcmp.lt.f32.partialorder %v2423_v2, 0.0004427343  ;;  %v2414_v1 = vand.u32 2147483647, %v4918_v16 }
 0x36e   : > { %v4930_v46 = vpop.eup %2969  ;;  %v2422_v55 = vmul.f32 %v2962_v62, %v2421_v4  ;;  %v2412_v25 = vadd.f32 1.0, %v2411_v44  ;;  %v2439_v36 = vadd.f32 1.0, %v2438_v43  ;;  %v2441_v28 = vand.u32 2147483647, %v4921_v17 }
 0x36f   : > { %v2453_v37 = vadd.f32 1.0, %v4930_v46  ;;  %v4939_v18 = vpop.eup %2971  ;;  %v2456_v33 = vmul.f32 -0.5, %v4930_v46  ;;  %v2332_v11 = vmul.f32 1.442695, %v4943_v58  ;;  %v2430_v19 = vadd.f32 1.0, %v2429_v41 }
 0x370   : > { %v2444_v54 = vadd.f32 1.0, %v4939_v18  ;;  %v2432_v47 = vand.u32 2147483647, %v4928_v29  ;;  %v2447_v51 = vmul.f32 -0.5, %v4939_v18  ;;  %v2413_v12 = vmul.f32 %v4918_v16, %v2412_v25 }
 0x371   : > { %2983 = vlog2.f32 %v2453_v37  ;;  %v2974_v7 = vpop.eup %2973  ;;  %v2457_v56 = vadd.f32 1.0, %v2456_v33  ;;  %vm2415_vm5 = vcmp.lt.f32.partialorder %v2414_v1, 0.0004427343  ;;  %v2440_v62 = vmul.f32 %v4921_v17, %v2439_v36 }
 0x372   : > { %v2392_v30 = vmul.f32 0.6931472, %v2974_v7  ;;  %2985 = vpow2.f32 %v2334_v42  ;;  %v2459_v8 = vand.u32 2147483647, %v4930_v46  ;;  %vm2442_vm6 = vcmp.lt.f32.partialorder %v2441_v28, 0.0004427343 }
 0x373   : > { %2987 = vlog2.f32 %v2444_v54  ;;  %v2431_v63 = vmul.f32 %v4928_v29, %v2430_v19  ;;  %vm4981_vm12 = vcmp.lt.f32.partialorder %v2432_v47, 0.0004427343  ;;  %v2448_v17 = vadd.f32 1.0, %v2447_v51 }
 0x374   : > { %v2976_v59 = vpop.eup %2975  ;;  %v2398_v24 = vsel %vm4945_vm14, %v2395_v0, %v2392_v30  ;;  %2989 = vpow2.f32 %v2332_v11  ;;  %v2458_v34 = vmul.f32 %v4930_v46, %v2457_v56  ;;  %v2450_v29 = vand.u32 2147483647, %v4939_v18 }
 0x375   : > { %v2419_v9 = vmul.f32 0.6931472, %v2976_v59  ;;  %v2486_v10 = vsel %vm2294_vm3, %v4781_v6, %v2398_v24  ;;  %v2978_v15 = vpop.eup %2977  ;;  %vm2460_vm10 = vcmp.lt.f32.partialorder %v2459_v8, 0.0004427343  ;;  %vm2301_vm1 = vcmp.gt.f32.partialorder %v4875_v3, 20.0 }
 0x376   : > { %2503 = vst.msk [vmem:[%s4851_s29 + $0x30] sm:$0xff] %vm2496_vm9, %v2486_v10  ;;  %v2980_v14 = vpop.eup %2979  ;;  %v2410_v32 = vmul.f32 0.6931472, %v2978_v15  ;;  %v2449_v2 = vmul.f32 %v4939_v18, %v2448_v17  ;;  %vm2451_vm8 = vcmp.lt.f32.partialorder %v2450_v29, 0.0004427343  ;;  %vm2300_vm13 = vcmp.gt.f32.partialorder %v4878_v23, 20.0 }
 0x377   : > { %v2425_v26 = vsel %vm4952_vm11, %v2422_v55, %v2419_v9  ;;  %v2437_v49 = vmul.f32 0.6931472, %v2980_v14  ;;  %v2982_v39 = vpop.eup %2981  ;;  %vm2303_vm3 = vcmp.gt.f32.partialorder %v4908_v13, 20.0  ;;  %vm2302_vm14 = vcmp.gt.f32.partialorder %v4943_v58, 20.0 }
 0x378   : > { %v2489_v6 = vsel %vm2297_vm2, %v4794_v61, %v2425_v26  ;;  %v2416_v60 = vsel %vm2415_vm5, %v2413_v12, %v2410_v32  ;;  %v2428_v57 = vmul.f32 0.6931472, %v2982_v39 }
 0x379   : > { %2506 = vst.msk [vmem:[%s4851_s29 + $0x48] sm:$0xff] %vm2496_vm9, %v2489_v6  ;;  %v2488_v48 = vsel %vm2296_vm4, %v4826_v45, %v2416_v60  ;;  %v2443_v22 = vsel %vm2442_vm6, %v2440_v62, %v2437_v49 }
 0x37a   : > { %2505 = vst.msk [vmem:[%s4851_s29 + $0x40] sm:$0xff] %vm2496_vm9, %v2488_v48  ;;  %v2491_v35 = vsel %vm2299_vm15, %v4833_v52, %v2443_v22  ;;  %v2434_v45 = vsel %vm4981_vm12, %v2431_v63, %v2428_v57 }
 0x37b   : > { %v2984_v16 = vpop.eup %2983  ;;  %2508 = vst.msk [vmem:[%s4851_s29 + $0x58] sm:$0xff] %vm2496_vm9, %v2491_v35  ;;  %v2490_v53 = vsel %vm2298_vm0, %v4870_v5, %v2434_v45 }
 0x37c   : > { %v2455_v40 = vmul.f32 0.6931472, %v2984_v16  ;;  %v2986_v27 = vpop.eup %2985  ;;  %2507 = vst.msk [vmem:[%s4851_s29 + $0x50] sm:$0xff] %vm2496_vm9, %v2490_v53 }
 0x37d   : > { %v2988_v31 = vpop.eup %2987  ;;  %v2471_v46 = vadd.f32 1.0, %v2986_v27  ;;  %v2474_v44 = vmul.f32 -0.5, %v2986_v27  ;;  %v2477_v7 = vand.u32 2147483647, %v2986_v27 }
 0x37e   : > { %v2461_v52 = vsel %vm2460_vm10, %v2458_v34, %v2455_v40  ;;  %v2446_v20 = vmul.f32 0.6931472, %v2988_v31  ;;  %v2990_v37 = vpop.eup %2989 }
 0x37f   : > { %v2493_v50 = vsel %vm2301_vm1, %v4875_v3, %v2461_v52  ;;  %2991 = vlog2.f32 %v2471_v46  ;;  %v2462_v4 = vadd.f32 1.0, %v2990_v37  ;;  %v2475_v3 = vadd.f32 1.0, %v2474_v44 }
 0x380   : > { %2510 = vst.msk [vmem:[%s4851_s29 + $0x68] sm:$0xff] %vm2496_vm9, %v2493_v50  ;;  %v2452_v5 = vsel %vm2451_vm8, %v2449_v2, %v2446_v20  ;;  %v2465_v43 = vmul.f32 -0.5, %v2990_v37  ;;  %vm2478_vm7 = vcmp.lt.f32.partialorder %v2477_v7, 0.0004427343  ;;  %v2468_v54 = vand.u32 2147483647, %v2990_v37 }
 0x381   : > { %v2492_v42 = vsel %vm2300_vm13, %v4878_v23, %v2452_v5  ;;  %2993 = vlog2.f32 %v2462_v4  ;;  %v2476_v38 = vmul.f32 %v2986_v27, %v2475_v3 }
 0x382   : > { %2509 = vst.msk [vmem:[%s4851_s29 + $0x60] sm:$0xff] %vm2496_vm9, %v2492_v42  ;;  %v2466_v41 = vadd.f32 1.0, %v2465_v43  ;;  %vm2469_vm2 = vcmp.lt.f32.partialorder %v2468_v54, 0.0004427343 }
 0x384   : > { %v2467_v59 = vmul.f32 %v2990_v37, %v2466_v41 }
 0x389   : > { %v2992_v18 = vpop.eup %2991 }
 0x38a   : > { %v2473_v0 = vmul.f32 0.6931472, %v2992_v18 }
 0x38b   : > { %v2994_v23 = vpop.eup %2993 }
 0x38c   : > { %v2479_v30 = vsel %vm2478_vm7, %v2476_v38, %v2473_v0  ;;  %v2464_v1 = vmul.f32 0.6931472, %v2994_v23 }
 0x38d   : > { %v2495_v21 = vsel %vm2303_vm3, %v4908_v13, %v2479_v30 }
 0x38e   : > { %2512 = vst.msk [vmem:[%s4851_s29 + $0x78] sm:$0xff] %vm2496_vm9, %v2495_v21  ;;  %v2470_v55 = vsel %vm2469_vm2, %v2467_v59, %v2464_v1 }
 0x38f   : > { %v2494_v25 = vsel %vm2302_vm14, %v4943_v58, %v2470_v55 }
 0x390   : > { %2511 = vst.msk [vmem:[%s4851_s29 + $0x70] sm:$0xff] %vm2496_vm9, %v2494_v25 }
 0x391 PF: > { %s14_s15 = sadd.s32 1, %s3002_s15  }
 0x392   : > { %p11_p4 = scmp.ge.s32.totalorder %s14_s15, 4  }
 0x394   :  { %13 = sbr.rel (!%p11_p4) target bundleno = 1 (0x1), region = 66 }

</bundles_post_ra>
